<compile_context>
chip_gen: v7x
topology: tpu7x:2x2x1
jax: 0.10.0
libtpu: 0.0.40
codegen_flags: <defaults>
</compile_context>

<pallas_src>
import jax
import jax.numpy as jnp
from jax import lax
from jax.experimental import pallas as pl
from jax.experimental.pallas import tpu as pltpu


def make_decoder_kernel(L, T, Bp, E, H, V, w_dtype):
    f32 = jnp.float32

    def kernel(*refs):
        it = iter(refs)
        emb_ref = next(it)                 # (T*Bp, E)
        ctx_ref = next(it)                 # (Bp, H)
        h0_ref = next(it)                  # (L, Bp, H)

        layers = []
        for l in range(L):
            wir, wiz, win = next(it), next(it), next(it)          # (in_l, H) each
            if l == 0:
                wicr, wicz, wicn = next(it), next(it), next(it)   # (H, H) context weights
            else:
                wicr = wicz = wicn = None
            whr, whz, whn = next(it), next(it), next(it)          # (H, H) each
            br, bz, bnin, bhn = next(it), next(it), next(it), next(it)  # (1, H) each
            layers.append((wir, wiz, win, wicr, wicz, wicn,
                           whr, whz, whn, br, bz, bnin, bhn))

        wd_ref = next(it)                  # (H, V)
        bd_ref = next(it)                  # (1, V)
        out_ref = next(it)                 # (T*Bp, V)
        hT_ref = next(it)                  # (L, Bp, H)
        gr_scr = next(it)                  # (T*Bp, H)
        gz_scr = next(it)                  # (T*Bp, H)
        gn_scr = next(it)                  # (T*Bp, H)
        y_scr = next(it)                   # (T*Bp, H)

        def mm(x, w):
            # x already cast to weight dtype by caller; accumulate in f32 on the MXU.
            return jnp.dot(x, w, preferred_element_type=f32)

        for l in range(L):
            (wir, wiz, win, wicr, wicz, wicn,
             whr, whz, whn, br, bz, bnin, bhn) = layers[l]

            # ---- hoisted input-to-hidden matmuls: one big MXU matmul per gate ----
            x_seq = (emb_ref[...] if l == 0 else y_scr[...]).astype(w_dtype)  # (T*Bp, in_l)
            gr_scr[...] = mm(x_seq, wir[...]) + br[...]        # bi_r + bh_r folded
            gz_scr[...] = mm(x_seq, wiz[...]) + bz[...]        # bi_z + bh_z folded
            gn_scr[...] = mm(x_seq, win[...]) + bnin[...]      # bi_n only

            if l == 0:
                # context is constant across t: compute its gate contribution ONCE
                ctx = ctx_ref[...].astype(w_dtype)             # (Bp, H)
                c_r = mm(ctx, wicr[...])
                c_z = mm(ctx, wicz[...])
                c_n = mm(ctx, wicn[...])

            # hoist weight loads and bias broadcast out of the (unrolled) time loop
            whr_v, whz_v, whn_v = whr[...], whz[...], whn[...]
            bhn_b = jnp.broadcast_to(bhn[...], (Bp, H))
            h0 = h0_ref[l]                                     # (Bp, H)

            def step(t, h, _l=l, _whr=whr_v, _whz=whz_v, _whn=whn_v, _bhn=bhn_b):
                row = pl.ds(pl.multiple_of(t * Bp, Bp), Bp)    # 8-aligned sublane slice
                gi_r = gr_scr[row, :]
                gi_z = gz_scr[row, :]
                gi_n = gn_scr[row, :]
                if _l == 0:
                    # constant context contribution; off the MXU critical path (VALU filler)
                    gi_r = gi_r + c_r
                    gi_z = gi_z + c_z
                    gi_n = gi_n + c_n
                hc = h.astype(w_dtype)
                gh_r = mm(hc, _whr)
                gh_z = mm(hc, _whz)
                gh_n = mm(hc, _whn) + _bhn
                r = jax.nn.sigmoid(gi_r + gh_r)
                z = jax.nn.sigmoid(gi_z + gh_z)
                n = jnp.tanh(gi_n + r * gh_n)
                h_new = (1.0 - z) * n + z * h
                y_scr[row, :] = h_new
                return h_new

            h_last = lax.fori_loop(0, T, step, h0, unroll=True)
            hT_ref[l] = h_last

        # ---- hoisted output projection: one matmul + one slab store ----
        out_ref[...] = mm(y_scr[...].astype(w_dtype), wd_ref[...]) + bd_ref[...]

    return kernel


def seq2seq_decoder_forward(X, state, params, *, L, T, B, E, H, V,
                            param_dtype=jnp.float32):
    """Pallas-backed forward.  X: (B, T) int32 tokens; state: (L, B, H) f32."""
    Bp = ((B + 7) // 8) * 8   # pad batch to a sublane multiple: all slices 8-aligned

    # ---- glue (plain JAX): embedding gather, time-major layout, batch padding ----
    # TODO(synk): the token-id gather (nn.Embedding) is data-dependent; at these sizes
    # XLA's gather is the right tool, so it stays outside the kernel.
    emb = params["emb"][X]                               # (B, T, E)
    x_tm = jnp.transpose(emb, (1, 0, 2))                 # (T, B, E)
    ctx = state[-1]                                      # (B, H)
    h0 = state.astype(jnp.float32)                       # (L, B, H)
    if Bp != B:
        pad = Bp - B
        x_tm = jnp.pad(x_tm, ((0, 0), (0, pad), (0, 0)))
        ctx = jnp.pad(ctx, ((0, pad), (0, 0)))
        h0 = jnp.pad(h0, ((0, 0), (0, pad), (0, 0)))
    emb_flat = x_tm.reshape(T * Bp, E)                   # (T*Bp, E)
    ctx = ctx.astype(jnp.float32)

    def cast(w):
        return w.astype(param_dtype)

    flat_params = []
    for l in range(L):
        wi = params["wi"][l]          # (in, 3H), gate order [r | z | n]
        wh = params["wh"][l]          # (H, 3H)
        bi = params["bi"][l]          # (1, 3H)
        bh = params["bh"][l]          # (1, 3H)
        if l == 0:
            wi_x, wi_c = wi[:E], wi[E:]   # split embedding vs. context columns
        else:
            wi_x, wi_c = wi, None
        # per-gate weight blocks -> lane-aligned gates inside the kernel
        flat_params += [cast(wi_x[:, 0:H]), cast(wi_x[:, H:2 * H]), cast(wi_x[:, 2 * H:3 * H])]
        if l == 0:
            flat_params += [cast(wi_c[:, 0:H]), cast(wi_c[:, H:2 * H]), cast(wi_c[:, 2 * H:3 * H])]
        flat_params += [cast(wh[:, 0:H]), cast(wh[:, H:2 * H]), cast(wh[:, 2 * H:3 * H])]
        # fold bh_r / bh_z into the hoisted input gates; bh_n must stay inside r*(...)
        flat_params += [
            (bi[:, 0:H] + bh[:, 0:H]).astype(jnp.float32),
            (bi[:, H:2 * H] + bh[:, H:2 * H]).astype(jnp.float32),
            bi[:, 2 * H:3 * H].astype(jnp.float32),
            bh[:, 2 * H:3 * H].astype(jnp.float32),
        ]
    flat_params += [cast(params["wd"]), params["bd"].astype(jnp.float32)]

    inputs = (emb_flat, ctx, h0, *flat_params)
    vmem = pl.BlockSpec(memory_space=pltpu.MemorySpace.VMEM)

    # TODO(synk): at production sizes (large T / V / B) add a grid over time-chunks
    # (BlockSpec tiling of emb/out, h carried in scratch) and shard the batch across
    # v7x's two TensorCores; at these toy shapes a single VMEM-resident call is both
    # simplest and fastest (everything fits with huge margin in 64 MiB VMEM).
    out_flat, hT_p = pl.pallas_call(
        make_decoder_kernel(L, T, Bp, E, H, V, param_dtype),
        out_shape=(jax.ShapeDtypeStruct((T * Bp, V), jnp.float32),
                   jax.ShapeDtypeStruct((L, Bp, H), jnp.float32)),
        in_specs=[vmem] * len(inputs),
        out_specs=(vmem, vmem),
        scratch_shapes=[pltpu.VMEM((T * Bp, H), jnp.float32),   # g_r
                        pltpu.VMEM((T * Bp, H), jnp.float32),   # g_z
                        pltpu.VMEM((T * Bp, H), jnp.float32),   # g_n
                        pltpu.VMEM((T * Bp, H), jnp.float32)],  # layer output / y
    )(*inputs)

    out = out_flat.reshape(T, Bp, V)[:, :B]              # (T, B, V)
    return jnp.transpose(out, (1, 0, 2)), hT_p[:, :B]    # (B, T, V), (L, B, H)


def reference_forward(X, state, params, *, L, T, B, E, H, V):
    """Pure-JAX reference mirroring torch.nn.Embedding + nn.GRU + nn.Linear semantics."""
    emb = params["emb"][X]
    x_tm = jnp.transpose(emb, (1, 0, 2))
    ctx = jnp.broadcast_to(state[-1][None], (T, B, H))
    x_and_ctx = jnp.concatenate([x_tm, ctx], axis=-1)

    h = [state[l] for l in range(L)]
    outs = []
    for t in range(T):
        inp = x_and_ctx[t]
        for l in range(L):
            gi = inp @ params["wi"][l] + params["bi"][l]
            gh = h[l] @ params["wh"][l] + params["bh"][l]
            r = jax.nn.sigmoid(gi[:, 0:H] + gh[:, 0:H])
            z = jax.nn.sigmoid(gi[:, H:2 * H] + gh[:, H:2 * H])
            n = jnp.tanh(gi[:, 2 * H:3 * H] + r * gh[:, 2 * H:3 * H])
            h[l] = (1.0 - z) * n + z * h[l]
            inp = h[l]
        outs.append(inp @ params["wd"] + params["bd"])
    out = jnp.stack(outs, axis=0)
    return jnp.transpose(out, (1, 0, 2)), jnp.stack(h, axis=0)


def init_params(key, *, L, E, H, V):
    """Deterministic synthetic parameters (shapes match nn.Embedding/GRU/Linear)."""
    ks = jax.random.split(key, 4 + 4 * L)
    scale = 0.1
    params = {
        "emb": scale * jax.random.normal(ks[0], (V, E), jnp.float32),
        # dense stored transposed: (H, V), bias (1, V)
        "wd": scale * jax.random.normal(ks[1], (H, V), jnp.float32),
        "bd": scale * jax.random.normal(ks[2], (1, V), jnp.float32),
        "wi": [], "wh": [], "bi": [], "bh": [],
    }
    for l in range(L):
        in_size = (E + H) if l == 0 else H
        k0, k1, k2, k3 = ks[3 + 4 * l: 3 + 4 * l + 4]
        # GRU weights stored transposed: (in, 3H) / (H, 3H), gate order [r | z | n]
        params["wi"].append(scale * jax.random.normal(k0, (in_size, 3 * H), jnp.float32))
        params["wh"].append(scale * jax.random.normal(k1, (H, 3 * H), jnp.float32))
        params["bi"].append(scale * jax.random.normal(k2, (1, 3 * H), jnp.float32))
        params["bh"].append(scale * jax.random.normal(k3, (1, 3 * H), jnp.float32))
    return params


if __name__ == "__main__":
    # Small shapes consistent with the module's forward.
    V = 32   # vocab_size
    E = 16   # embed_size
    H = 32   # num_hiddens
    L = 2    # num_layers
    B = 2    # batch
    T = 8    # sequence length

    key = jax.random.PRNGKey(0)
    k_param, k_tok, k_state = jax.random.split(key, 3)

    params = init_params(k_param, L=L, E=E, H=H, V=V)
    X = jax.random.randint(k_tok, (B, T), 0, V, dtype=jnp.int32)
    # init_state(...) supplies the encoder's final hidden state (L, B, H)
    state = 0.1 * jax.random.normal(k_state, (L, B, H), jnp.float32)

    ref_out, ref_state = reference_forward(X, state, params,
                                           L=L, T=T, B=B, E=E, H=H, V=V)

    # ---- f32 path (numerically exact vs. reference) ----
    out, new_state = seq2seq_decoder_forward(X, state, params,
                                             L=L, T=T, B=B, E=E, H=H, V=V,
                                             param_dtype=jnp.float32)
    out = jax.block_until_ready(out)
    new_state = jax.block_until_ready(new_state)
    assert out.shape == (B, T, V) and new_state.shape == (L, B, H)
    assert jnp.max(jnp.abs(out - ref_out)) < 1e-4
    assert jnp.max(jnp.abs(new_state - ref_state)) < 1e-4

    # ---- bf16 MXU path (v6e/v7x recommendation; f32 accumulation + f32 gate math) ----
    out_bf, state_bf = seq2seq_decoder_forward(X, state, params,
                                               L=L, T=T, B=B, E=E, H=H, V=V,
                                               param_dtype=jnp.bfloat16)
    out_bf = jax.block_until_ready(out_bf)
    state_bf = jax.block_until_ready(state_bf)
    assert jnp.max(jnp.abs(out_bf - ref_out)) < 5e-2
    assert jnp.max(jnp.abs(state_bf - ref_state)) < 5e-2

    print("KERNEL_OK")
</pallas_src>

<mosaic_0001>
module attributes {stable_mosaic.version = 11 : i64} {
  func.func @kernel(%arg0: memref<64x16xf32, #tpu.memory_space<vmem>>, %arg1: memref<8x32xf32, #tpu.memory_space<vmem>>, %arg2: memref<2x8x32xf32, #tpu.memory_space<vmem>>, %arg3: memref<16x32xf32, #tpu.memory_space<vmem>>, %arg4: memref<16x32xf32, #tpu.memory_space<vmem>>, %arg5: memref<16x32xf32, #tpu.memory_space<vmem>>, %arg6: memref<32x32xf32, #tpu.memory_space<vmem>>, %arg7: memref<32x32xf32, #tpu.memory_space<vmem>>, %arg8: memref<32x32xf32, #tpu.memory_space<vmem>>, %arg9: memref<32x32xf32, #tpu.memory_space<vmem>>, %arg10: memref<32x32xf32, #tpu.memory_space<vmem>>, %arg11: memref<32x32xf32, #tpu.memory_space<vmem>>, %arg12: memref<1x32xf32, #tpu.memory_space<vmem>>, %arg13: memref<1x32xf32, #tpu.memory_space<vmem>>, %arg14: memref<1x32xf32, #tpu.memory_space<vmem>>, %arg15: memref<1x32xf32, #tpu.memory_space<vmem>>, %arg16: memref<32x32xf32, #tpu.memory_space<vmem>>, %arg17: memref<32x32xf32, #tpu.memory_space<vmem>>, %arg18: memref<32x32xf32, #tpu.memory_space<vmem>>, %arg19: memref<32x32xf32, #tpu.memory_space<vmem>>, %arg20: memref<32x32xf32, #tpu.memory_space<vmem>>, %arg21: memref<32x32xf32, #tpu.memory_space<vmem>>, %arg22: memref<1x32xf32, #tpu.memory_space<vmem>>, %arg23: memref<1x32xf32, #tpu.memory_space<vmem>>, %arg24: memref<1x32xf32, #tpu.memory_space<vmem>>, %arg25: memref<1x32xf32, #tpu.memory_space<vmem>>, %arg26: memref<32x32xf32, #tpu.memory_space<vmem>>, %arg27: memref<1x32xf32, #tpu.memory_space<vmem>>, %arg28: memref<64x32xf32, #tpu.memory_space<vmem>>, %arg29: memref<2x8x32xf32, #tpu.memory_space<vmem>>, %arg30: memref<64x32xf32, #tpu.memory_space<vmem>>, %arg31: memref<64x32xf32, #tpu.memory_space<vmem>>, %arg32: memref<64x32xf32, #tpu.memory_space<vmem>>, %arg33: memref<64x32xf32, #tpu.memory_space<vmem>>) attributes {dimension_semantics = [], scalar_prefetch = 0 : i64, scratch_operands = 4 : i64, tpu.core_type = #tpu.core_type<tc>} {
    %c0 = arith.constant 0 : index
    %c0_0 = arith.constant 0 : index
    %0 = vector.load %arg0[%c0, %c0_0] : memref<64x16xf32, #tpu.memory_space<vmem>>, vector<64x16xf32>
    %c0_1 = arith.constant 0 : index
    %c0_2 = arith.constant 0 : index
    %1 = vector.load %arg3[%c0_1, %c0_2] : memref<16x32xf32, #tpu.memory_space<vmem>>, vector<16x32xf32>
    %cst = arith.constant dense<0.000000e+00> : vector<64x32xf32>
    %2 = tpu.matmul %0, %1, %cst {dimension_numbers = #tpu.dot_dimension_numbers<[1], [0], [0], [1], [0, 0, 1, 1], [], []>} : vector<64x16xf32>, vector<16x32xf32>, vector<64x32xf32> -> vector<64x32xf32>
    %c0_3 = arith.constant 0 : index
    %c0_4 = arith.constant 0 : index
    %3 = vector.load %arg12[%c0_3, %c0_4] : memref<1x32xf32, #tpu.memory_space<vmem>>, vector<1x32xf32>
    %4 = vector.broadcast %3 : vector<1x32xf32> to vector<64x32xf32>
    %5 = arith.addf %2, %4 : vector<64x32xf32>
    %c0_5 = arith.constant 0 : index
    %c0_6 = arith.constant 0 : index
    %6 = vector.load %arg30[%c0_5, %c0_6] : memref<64x32xf32, #tpu.memory_space<vmem>>, vector<64x32xf32>
    tpu.vector_store %arg30[%c0_5, %c0_6], %5 {strides = array<i32>} : memref<64x32xf32, #tpu.memory_space<vmem>>, vector<64x32xf32>,
    %c0_7 = arith.constant 0 : index
    %c0_8 = arith.constant 0 : index
    %7 = vector.load %arg4[%c0_7, %c0_8] : memref<16x32xf32, #tpu.memory_space<vmem>>, vector<16x32xf32>
    %cst_9 = arith.constant dense<0.000000e+00> : vector<64x32xf32>
    %8 = tpu.matmul %0, %7, %cst_9 {dimension_numbers = #tpu.dot_dimension_numbers<[1], [0], [0], [1], [0, 0, 1, 1], [], []>} : vector<64x16xf32>, vector<16x32xf32>, vector<64x32xf32> -> vector<64x32xf32>
    %c0_10 = arith.constant 0 : index
    %c0_11 = arith.constant 0 : index
    %9 = vector.load %arg13[%c0_10, %c0_11] : memref<1x32xf32, #tpu.memory_space<vmem>>, vector<1x32xf32>
    %10 = vector.broadcast %9 : vector<1x32xf32> to vector<64x32xf32>
    %11 = arith.addf %8, %10 : vector<64x32xf32>
    %c0_12 = arith.constant 0 : index
    %c0_13 = arith.constant 0 : index
    %12 = vector.load %arg31[%c0_12, %c0_13] : memref<64x32xf32, #tpu.memory_space<vmem>>, vector<64x32xf32>
    tpu.vector_store %arg31[%c0_12, %c0_13], %11 {strides = array<i32>} : memref<64x32xf32, #tpu.memory_space<vmem>>, vector<64x32xf32>,
    %c0_14 = arith.constant 0 : index
    %c0_15 = arith.constant 0 : index
    %13 = vector.load %arg5[%c0_14, %c0_15] : memref<16x32xf32, #tpu.memory_space<vmem>>, vector<16x32xf32>
    %cst_16 = arith.constant dense<0.000000e+00> : vector<64x32xf32>
    %14 = tpu.matmul %0, %13, %cst_16 {dimension_numbers = #tpu.dot_dimension_numbers<[1], [0], [0], [1], [0, 0, 1, 1], [], []>} : vector<64x16xf32>, vector<16x32xf32>, vector<64x32xf32> -> vector<64x32xf32>
    %c0_17 = arith.constant 0 : index
    %c0_18 = arith.constant 0 : index
    %15 = vector.load %arg14[%c0_17, %c0_18] : memref<1x32xf32, #tpu.memory_space<vmem>>, vector<1x32xf32>
    %16 = vector.broadcast %15 : vector<1x32xf32> to vector<64x32xf32>
    %17 = arith.addf %14, %16 : vector<64x32xf32>
    %c0_19 = arith.constant 0 : index
    %c0_20 = arith.constant 0 : index
    %18 = vector.load %arg32[%c0_19, %c0_20] : memref<64x32xf32, #tpu.memory_space<vmem>>, vector<64x32xf32>
    tpu.vector_store %arg32[%c0_19, %c0_20], %17 {strides = array<i32>} : memref<64x32xf32, #tpu.memory_space<vmem>>, vector<64x32xf32>,
    %c0_21 = arith.constant 0 : index
    %c0_22 = arith.constant 0 : index
    %19 = vector.load %arg1[%c0_21, %c0_22] : memref<8x32xf32, #tpu.memory_space<vmem>>, vector<8x32xf32>
    %c0_23 = arith.constant 0 : index
    %c0_24 = arith.constant 0 : index
    %20 = vector.load %arg6[%c0_23, %c0_24] : memref<32x32xf32, #tpu.memory_space<vmem>>, vector<32x32xf32>
    %cst_25 = arith.constant dense<0.000000e+00> : vector<8x32xf32>
    %21 = tpu.matmul %19, %20, %cst_25 {dimension_numbers = #tpu.dot_dimension_numbers<[1], [0], [0], [1], [0, 0, 1, 1], [], []>} : vector<8x32xf32>, vector<32x32xf32>, vector<8x32xf32> -> vector<8x32xf32>
    %c0_26 = arith.constant 0 : index
    %c0_27 = arith.constant 0 : index
    %22 = vector.load %arg7[%c0_26, %c0_27] : memref<32x32xf32, #tpu.memory_space<vmem>>, vector<32x32xf32>
    %cst_28 = arith.constant dense<0.000000e+00> : vector<8x32xf32>
    %23 = tpu.matmul %19, %22, %cst_28 {dimension_numbers = #tpu.dot_dimension_numbers<[1], [0], [0], [1], [0, 0, 1, 1], [], []>} : vector<8x32xf32>, vector<32x32xf32>, vector<8x32xf32> -> vector<8x32xf32>
    %c0_29 = arith.constant 0 : index
    %c0_30 = arith.constant 0 : index
    %24 = vector.load %arg8[%c0_29, %c0_30] : memref<32x32xf32, #tpu.memory_space<vmem>>, vector<32x32xf32>
    %cst_31 = arith.constant dense<0.000000e+00> : vector<8x32xf32>
    %25 = tpu.matmul %19, %24, %cst_31 {dimension_numbers = #tpu.dot_dimension_numbers<[1], [0], [0], [1], [0, 0, 1, 1], [], []>} : vector<8x32xf32>, vector<32x32xf32>, vector<8x32xf32> -> vector<8x32xf32>
    %c0_32 = arith.constant 0 : index
    %c0_33 = arith.constant 0 : index
    %26 = vector.load %arg9[%c0_32, %c0_33] : memref<32x32xf32, #tpu.memory_space<vmem>>, vector<32x32xf32>
    %c0_34 = arith.constant 0 : index
    %c0_35 = arith.constant 0 : index
    %27 = vector.load %arg10[%c0_34, %c0_35] : memref<32x32xf32, #tpu.memory_space<vmem>>, vector<32x32xf32>
    %c0_36 = arith.constant 0 : index
    %c0_37 = arith.constant 0 : index
    %28 = vector.load %arg11[%c0_36, %c0_37] : memref<32x32xf32, #tpu.memory_space<vmem>>, vector<32x32xf32>
    %c0_38 = arith.constant 0 : index
    %c0_39 = arith.constant 0 : index
    %29 = vector.load %arg15[%c0_38, %c0_39] : memref<1x32xf32, #tpu.memory_space<vmem>>, vector<1x32xf32>
    %30 = vector.shape_cast %29 : vector<1x32xf32> to vector<1x32xf32>
    %31 = vector.broadcast %30 : vector<1x32xf32> to vector<8x32xf32>
    %c0_40 = arith.constant 0 : index
    %c0_41 = arith.constant 0 : index
    %c0_42 = arith.constant 0 : index
    %32 = vector.load %arg2[%c0_40, %c0_41, %c0_42] : memref<2x8x32xf32, #tpu.memory_space<vmem>>, vector<1x8x32xf32>
    %33 = vector.shape_cast %32 : vector<1x8x32xf32> to vector<8x32xf32>
    %c0_i32 = arith.constant 0 : i32
    %c8_i32 = arith.constant 8 : i32
    %34 = arith.muli %c0_i32, %c8_i32 : i32
    %35 = tpu.assume_multiple %34, 8 : i32
    %36 = arith.index_cast %35 : i32 to index
    %c0_43 = arith.constant 0 : index
    %37 = vector.load %arg30[%36, %c0_43] : memref<64x32xf32, #tpu.memory_space<vmem>>, vector<8x32xf32>
    %38 = arith.index_cast %35 : i32 to index
    %c0_44 = arith.constant 0 : index
    %39 = vector.load %arg31[%38, %c0_44] : memref<64x32xf32, #tpu.memory_space<vmem>>, vector<8x32xf32>
    %40 = arith.index_cast %35 : i32 to index
    %c0_45 = arith.constant 0 : index
    %41 = vector.load %arg32[%40, %c0_45] : memref<64x32xf32, #tpu.memory_space<vmem>>, vector<8x32xf32>
    %42 = arith.addf %37, %21 : vector<8x32xf32>
    %43 = arith.addf %39, %23 : vector<8x32xf32>
    %44 = arith.addf %41, %25 : vector<8x32xf32>
    %cst_46 = arith.constant dense<0.000000e+00> : vector<8x32xf32>
    %45 = tpu.matmul %33, %26, %cst_46 {dimension_numbers = #tpu.dot_dimension_numbers<[1], [0], [0], [1], [0, 0, 1, 1], [], []>} : vector<8x32xf32>, vector<32x32xf32>, vector<8x32xf32> -> vector<8x32xf32>
    %cst_47 = arith.constant dense<0.000000e+00> : vector<8x32xf32>
    %46 = tpu.matmul %33, %27, %cst_47 {dimension_numbers = #tpu.dot_dimension_numbers<[1], [0], [0], [1], [0, 0, 1, 1], [], []>} : vector<8x32xf32>, vector<32x32xf32>, vector<8x32xf32> -> vector<8x32xf32>
    %cst_48 = arith.constant dense<0.000000e+00> : vector<8x32xf32>
    %47 = tpu.matmul %33, %28, %cst_48 {dimension_numbers = #tpu.dot_dimension_numbers<[1], [0], [0], [1], [0, 0, 1, 1], [], []>} : vector<8x32xf32>, vector<32x32xf32>, vector<8x32xf32> -> vector<8x32xf32>
    %48 = arith.addf %47, %31 : vector<8x32xf32>
    %49 = arith.addf %42, %45 : vector<8x32xf32>
    %50 = arith.negf %49 : vector<8x32xf32>
    %51 = math.exp %50 : vector<8x32xf32>
    %cst_49 = arith.constant 1.000000e+00 : f32
    %52 = vector.broadcast %cst_49 : f32 to vector<8x32xf32>
    %53 = arith.addf %52, %51 : vector<8x32xf32>
    %54 = arith.divf %52, %53 : vector<8x32xf32>
    %55 = arith.addf %43, %46 : vector<8x32xf32>
    %56 = arith.negf %55 : vector<8x32xf32>
    %57 = math.exp %56 : vector<8x32xf32>
    %cst_50 = arith.constant 1.000000e+00 : f32
    %58 = vector.broadcast %cst_50 : f32 to vector<8x32xf32>
    %59 = arith.addf %58, %57 : vector<8x32xf32>
    %60 = arith.divf %58, %59 : vector<8x32xf32>
    %61 = arith.mulf %54, %48 : vector<8x32xf32>
    %62 = arith.addf %44, %61 : vector<8x32xf32>
    %63 = math.tanh %62 : vector<8x32xf32>
    %cst_51 = arith.constant 1.000000e+00 : f32
    %64 = vector.broadcast %cst_51 : f32 to vector<8x32xf32>
    %65 = arith.subf %64, %60 : vector<8x32xf32>
    %66 = arith.mulf %65, %63 : vector<8x32xf32>
    %67 = arith.mulf %60, %33 : vector<8x32xf32>
    %68 = arith.addf %66, %67 : vector<8x32xf32>
    %69 = arith.index_cast %35 : i32 to index
    %c0_52 = arith.constant 0 : index
    %70 = vector.load %arg33[%69, %c0_52] : memref<64x32xf32, #tpu.memory_space<vmem>>, vector<8x32xf32>
    tpu.vector_store %arg33[%69, %c0_52], %68 {strides = array<i32>} : memref<64x32xf32, #tpu.memory_space<vmem>>, vector<8x32xf32>,
    %c1_i32 = arith.constant 1 : i32
    %c8_i32_53 = arith.constant 8 : i32
    %71 = arith.muli %c1_i32, %c8_i32_53 : i32
    %72 = tpu.assume_multiple %71, 8 : i32
    %73 = arith.index_cast %72 : i32 to index
    %c0_54 = arith.constant 0 : index
    %74 = vector.load %arg30[%73, %c0_54] : memref<64x32xf32, #tpu.memory_space<vmem>>, vector<8x32xf32>
    %75 = arith.index_cast %72 : i32 to index
    %c0_55 = arith.constant 0 : index
    %76 = vector.load %arg31[%75, %c0_55] : memref<64x32xf32, #tpu.memory_space<vmem>>, vector<8x32xf32>
    %77 = arith.index_cast %72 : i32 to index
    %c0_56 = arith.constant 0 : index
    %78 = vector.load %arg32[%77, %c0_56] : memref<64x32xf32, #tpu.memory_space<vmem>>, vector<8x32xf32>
    %79 = arith.addf %74, %21 : vector<8x32xf32>
    %80 = arith.addf %76, %23 : vector<8x32xf32>
    %81 = arith.addf %78, %25 : vector<8x32xf32>
    %cst_57 = arith.constant dense<0.000000e+00> : vector<8x32xf32>
    %82 = tpu.matmul %68, %26, %cst_57 {dimension_numbers = #tpu.dot_dimension_numbers<[1], [0], [0], [1], [0, 0, 1, 1], [], []>} : vector<8x32xf32>, vector<32x32xf32>, vector<8x32xf32> -> vector<8x32xf32>
    %cst_58 = arith.constant dense<0.000000e+00> : vector<8x32xf32>
    %83 = tpu.matmul %68, %27, %cst_58 {dimension_numbers = #tpu.dot_dimension_numbers<[1], [0], [0], [1], [0, 0, 1, 1], [], []>} : vector<8x32xf32>, vector<32x32xf32>, vector<8x32xf32> -> vector<8x32xf32>
    %cst_59 = arith.constant dense<0.000000e+00> : vector<8x32xf32>
    %84 = tpu.matmul %68, %28, %cst_59 {dimension_numbers = #tpu.dot_dimension_numbers<[1], [0], [0], [1], [0, 0, 1, 1], [], []>} : vector<8x32xf32>, vector<32x32xf32>, vector<8x32xf32> -> vector<8x32xf32>
    %85 = arith.addf %84, %31 : vector<8x32xf32>
    %86 = arith.addf %79, %82 : vector<8x32xf32>
    %87 = arith.negf %86 : vector<8x32xf32>
    %88 = math.exp %87 : vector<8x32xf32>
    %cst_60 = arith.constant 1.000000e+00 : f32
    %89 = vector.broadcast %cst_60 : f32 to vector<8x32xf32>
    %90 = arith.addf %89, %88 : vector<8x32xf32>
    %91 = arith.divf %89, %90 : vector<8x32xf32>
    %92 = arith.addf %80, %83 : vector<8x32xf32>
    %93 = arith.negf %92 : vector<8x32xf32>
    %94 = math.exp %93 : vector<8x32xf32>
    %cst_61 = arith.constant 1.000000e+00 : f32
    %95 = vector.broadcast %cst_61 : f32 to vector<8x32xf32>
    %96 = arith.addf %95, %94 : vector<8x32xf32>
    %97 = arith.divf %95, %96 : vector<8x32xf32>
    %98 = arith.mulf %91, %85 : vector<8x32xf32>
    %99 = arith.addf %81, %98 : vector<8x32xf32>
    %100 = math.tanh %99 : vector<8x32xf32>
    %cst_62 = arith.constant 1.000000e+00 : f32
    %101 = vector.broadcast %cst_62 : f32 to vector<8x32xf32>
    %102 = arith.subf %101, %97 : vector<8x32xf32>
    %103 = arith.mulf %102, %100 : vector<8x32xf32>
    %104 = arith.mulf %97, %68 : vector<8x32xf32>
    %105 = arith.addf %103, %104 : vector<8x32xf32>
    %106 = arith.index_cast %72 : i32 to index
    %c0_63 = arith.constant 0 : index
    %107 = vector.load %arg33[%106, %c0_63] : memref<64x32xf32, #tpu.memory_space<vmem>>, vector<8x32xf32>
    tpu.vector_store %arg33[%106, %c0_63], %105 {strides = array<i32>} : memref<64x32xf32, #tpu.memory_space<vmem>>, vector<8x32xf32>,
    %c2_i32 = arith.constant 2 : i32
    %c8_i32_64 = arith.constant 8 : i32
    %108 = arith.muli %c2_i32, %c8_i32_64 : i32
    %109 = tpu.assume_multiple %108, 8 : i32
    %110 = arith.index_cast %109 : i32 to index
    %c0_65 = arith.constant 0 : index
    %111 = vector.load %arg30[%110, %c0_65] : memref<64x32xf32, #tpu.memory_space<vmem>>, vector<8x32xf32>
    %112 = arith.index_cast %109 : i32 to index
    %c0_66 = arith.constant 0 : index
    %113 = vector.load %arg31[%112, %c0_66] : memref<64x32xf32, #tpu.memory_space<vmem>>, vector<8x32xf32>
    %114 = arith.index_cast %109 : i32 to index
    %c0_67 = arith.constant 0 : index
    %115 = vector.load %arg32[%114, %c0_67] : memref<64x32xf32, #tpu.memory_space<vmem>>, vector<8x32xf32>
    %116 = arith.addf %111, %21 : vector<8x32xf32>
    %117 = arith.addf %113, %23 : vector<8x32xf32>
    %118 = arith.addf %115, %25 : vector<8x32xf32>
    %cst_68 = arith.constant dense<0.000000e+00> : vector<8x32xf32>
    %119 = tpu.matmul %105, %26, %cst_68 {dimension_numbers = #tpu.dot_dimension_numbers<[1], [0], [0], [1], [0, 0, 1, 1], [], []>} : vector<8x32xf32>, vector<32x32xf32>, vector<8x32xf32> -> vector<8x32xf32>
    %cst_69 = arith.constant dense<0.000000e+00> : vector<8x32xf32>
    %120 = tpu.matmul %105, %27, %cst_69 {dimension_numbers = #tpu.dot_dimension_numbers<[1], [0], [0], [1], [0, 0, 1, 1], [], []>} : vector<8x32xf32>, vector<32x32xf32>, vector<8x32xf32> -> vector<8x32xf32>
    %cst_70 = arith.constant dense<0.000000e+00> : vector<8x32xf32>
    %121 = tpu.matmul %105, %28, %cst_70 {dimension_numbers = #tpu.dot_dimension_numbers<[1], [0], [0], [1], [0, 0, 1, 1], [], []>} : vector<8x32xf32>, vector<32x32xf32>, vector<8x32xf32> -> vector<8x32xf32>
    %122 = arith.addf %121, %31 : vector<8x32xf32>
    %123 = arith.addf %116, %119 : vector<8x32xf32>
    %124 = arith.negf %123 : vector<8x32xf32>
    %125 = math.exp %124 : vector<8x32xf32>
    %cst_71 = arith.constant 1.000000e+00 : f32
    %126 = vector.broadcast %cst_71 : f32 to vector<8x32xf32>
    %127 = arith.addf %126, %125 : vector<8x32xf32>
    %128 = arith.divf %126, %127 : vector<8x32xf32>
    %129 = arith.addf %117, %120 : vector<8x32xf32>
    %130 = arith.negf %129 : vector<8x32xf32>
    %131 = math.exp %130 : vector<8x32xf32>
    %cst_72 = arith.constant 1.000000e+00 : f32
    %132 = vector.broadcast %cst_72 : f32 to vector<8x32xf32>
    %133 = arith.addf %132, %131 : vector<8x32xf32>
    %134 = arith.divf %132, %133 : vector<8x32xf32>
    %135 = arith.mulf %128, %122 : vector<8x32xf32>
    %136 = arith.addf %118, %135 : vector<8x32xf32>
    %137 = math.tanh %136 : vector<8x32xf32>
    %cst_73 = arith.constant 1.000000e+00 : f32
    %138 = vector.broadcast %cst_73 : f32 to vector<8x32xf32>
    %139 = arith.subf %138, %134 : vector<8x32xf32>
    %140 = arith.mulf %139, %137 : vector<8x32xf32>
    %141 = arith.mulf %134, %105 : vector<8x32xf32>
    %142 = arith.addf %140, %141 : vector<8x32xf32>
    %143 = arith.index_cast %109 : i32 to index
    %c0_74 = arith.constant 0 : index
    %144 = vector.load %arg33[%143, %c0_74] : memref<64x32xf32, #tpu.memory_space<vmem>>, vector<8x32xf32>
    tpu.vector_store %arg33[%143, %c0_74], %142 {strides = array<i32>} : memref<64x32xf32, #tpu.memory_space<vmem>>, vector<8x32xf32>,
    %c3_i32 = arith.constant 3 : i32
    %c8_i32_75 = arith.constant 8 : i32
    %145 = arith.muli %c3_i32, %c8_i32_75 : i32
    %146 = tpu.assume_multiple %145, 8 : i32
    %147 = arith.index_cast %146 : i32 to index
    %c0_76 = arith.constant 0 : index
    %148 = vector.load %arg30[%147, %c0_76] : memref<64x32xf32, #tpu.memory_space<vmem>>, vector<8x32xf32>
    %149 = arith.index_cast %146 : i32 to index
    %c0_77 = arith.constant 0 : index
    %150 = vector.load %arg31[%149, %c0_77] : memref<64x32xf32, #tpu.memory_space<vmem>>, vector<8x32xf32>
    %151 = arith.index_cast %146 : i32 to index
    %c0_78 = arith.constant 0 : index
    %152 = vector.load %arg32[%151, %c0_78] : memref<64x32xf32, #tpu.memory_space<vmem>>, vector<8x32xf32>
    %153 = arith.addf %148, %21 : vector<8x32xf32>
    %154 = arith.addf %150, %23 : vector<8x32xf32>
    %155 = arith.addf %152, %25 : vector<8x32xf32>
    %cst_79 = arith.constant dense<0.000000e+00> : vector<8x32xf32>
    %156 = tpu.matmul %142, %26, %cst_79 {dimension_numbers = #tpu.dot_dimension_numbers<[1], [0], [0], [1], [0, 0, 1, 1], [], []>} : vector<8x32xf32>, vector<32x32xf32>, vector<8x32xf32> -> vector<8x32xf32>
    %cst_80 = arith.constant dense<0.000000e+00> : vector<8x32xf32>
    %157 = tpu.matmul %142, %27, %cst_80 {dimension_numbers = #tpu.dot_dimension_numbers<[1], [0], [0], [1], [0, 0, 1, 1], [], []>} : vector<8x32xf32>, vector<32x32xf32>, vector<8x32xf32> -> vector<8x32xf32>
    %cst_81 = arith.constant dense<0.000000e+00> : vector<8x32xf32>
    %158 = tpu.matmul %142, %28, %cst_81 {dimension_numbers = #tpu.dot_dimension_numbers<[1], [0], [0], [1], [0, 0, 1, 1], [], []>} : vector<8x32xf32>, vector<32x32xf32>, vector<8x32xf32> -> vector<8x32xf32>
    %159 = arith.addf %158, %31 : vector<8x32xf32>
    %160 = arith.addf %153, %156 : vector<8x32xf32>
    %161 = arith.negf %160 : vector<8x32xf32>
    %162 = math.exp %161 : vector<8x32xf32>
    %cst_82 = arith.constant 1.000000e+00 : f32
    %163 = vector.broadcast %cst_82 : f32 to vector<8x32xf32>
    %164 = arith.addf %163, %162 : vector<8x32xf32>
    %165 = arith.divf %163, %164 : vector<8x32xf32>
    %166 = arith.addf %154, %157 : vector<8x32xf32>
    %167 = arith.negf %166 : vector<8x32xf32>
    %168 = math.exp %167 : vector<8x32xf32>
    %cst_83 = arith.constant 1.000000e+00 : f32
    %169 = vector.broadcast %cst_83 : f32 to vector<8x32xf32>
    %170 = arith.addf %169, %168 : vector<8x32xf32>
    %171 = arith.divf %169, %170 : vector<8x32xf32>
    %172 = arith.mulf %165, %159 : vector<8x32xf32>
    %173 = arith.addf %155, %172 : vector<8x32xf32>
    %174 = math.tanh %173 : vector<8x32xf32>
    %cst_84 = arith.constant 1.000000e+00 : f32
    %175 = vector.broadcast %cst_84 : f32 to vector<8x32xf32>
    %176 = arith.subf %175, %171 : vector<8x32xf32>
    %177 = arith.mulf %176, %174 : vector<8x32xf32>
    %178 = arith.mulf %171, %142 : vector<8x32xf32>
    %179 = arith.addf %177, %178 : vector<8x32xf32>
    %180 = arith.index_cast %146 : i32 to index
    %c0_85 = arith.constant 0 : index
    %181 = vector.load %arg33[%180, %c0_85] : memref<64x32xf32, #tpu.memory_space<vmem>>, vector<8x32xf32>
    tpu.vector_store %arg33[%180, %c0_85], %179 {strides = array<i32>} : memref<64x32xf32, #tpu.memory_space<vmem>>, vector<8x32xf32>,
    %c4_i32 = arith.constant 4 : i32
    %c8_i32_86 = arith.constant 8 : i32
    %182 = arith.muli %c4_i32, %c8_i32_86 : i32
    %183 = tpu.assume_multiple %182, 8 : i32
    %184 = arith.index_cast %183 : i32 to index
    %c0_87 = arith.constant 0 : index
    %185 = vector.load %arg30[%184, %c0_87] : memref<64x32xf32, #tpu.memory_space<vmem>>, vector<8x32xf32>
    %186 = arith.index_cast %183 : i32 to index
    %c0_88 = arith.constant 0 : index
    %187 = vector.load %arg31[%186, %c0_88] : memref<64x32xf32, #tpu.memory_space<vmem>>, vector<8x32xf32>
    %188 = arith.index_cast %183 : i32 to index
    %c0_89 = arith.constant 0 : index
    %189 = vector.load %arg32[%188, %c0_89] : memref<64x32xf32, #tpu.memory_space<vmem>>, vector<8x32xf32>
    %190 = arith.addf %185, %21 : vector<8x32xf32>
    %191 = arith.addf %187, %23 : vector<8x32xf32>
    %192 = arith.addf %189, %25 : vector<8x32xf32>
    %cst_90 = arith.constant dense<0.000000e+00> : vector<8x32xf32>
    %193 = tpu.matmul %179, %26, %cst_90 {dimension_numbers = #tpu.dot_dimension_numbers<[1], [0], [0], [1], [0, 0, 1, 1], [], []>} : vector<8x32xf32>, vector<32x32xf32>, vector<8x32xf32> -> vector<8x32xf32>
    %cst_91 = arith.constant dense<0.000000e+00> : vector<8x32xf32>
    %194 = tpu.matmul %179, %27, %cst_91 {dimension_numbers = #tpu.dot_dimension_numbers<[1], [0], [0], [1], [0, 0, 1, 1], [], []>} : vector<8x32xf32>, vector<32x32xf32>, vector<8x32xf32> -> vector<8x32xf32>
    %cst_92 = arith.constant dense<0.000000e+00> : vector<8x32xf32>
    %195 = tpu.matmul %179, %28, %cst_92 {dimension_numbers = #tpu.dot_dimension_numbers<[1], [0], [0], [1], [0, 0, 1, 1], [], []>} : vector<8x32xf32>, vector<32x32xf32>, vector<8x32xf32> -> vector<8x32xf32>
    %196 = arith.addf %195, %31 : vector<8x32xf32>
    %197 = arith.addf %190, %193 : vector<8x32xf32>
    %198 = arith.negf %197 : vector<8x32xf32>
    %199 = math.exp %198 : vector<8x32xf32>
    %cst_93 = arith.constant 1.000000e+00 : f32
    %200 = vector.broadcast %cst_93 : f32 to vector<8x32xf32>
    %201 = arith.addf %200, %199 : vector<8x32xf32>
    %202 = arith.divf %200, %201 : vector<8x32xf32>
    %203 = arith.addf %191, %194 : vector<8x32xf32>
    %204 = arith.negf %203 : vector<8x32xf32>
    %205 = math.exp %204 : vector<8x32xf32>
    %cst_94 = arith.constant 1.000000e+00 : f32
    %206 = vector.broadcast %cst_94 : f32 to vector<8x32xf32>
    %207 = arith.addf %206, %205 : vector<8x32xf32>
    %208 = arith.divf %206, %207 : vector<8x32xf32>
    %209 = arith.mulf %202, %196 : vector<8x32xf32>
    %210 = arith.addf %192, %209 : vector<8x32xf32>
    %211 = math.tanh %210 : vector<8x32xf32>
    %cst_95 = arith.constant 1.000000e+00 : f32
    %212 = vector.broadcast %cst_95 : f32 to vector<8x32xf32>
    %213 = arith.subf %212, %208 : vector<8x32xf32>
    %214 = arith.mulf %213, %211 : vector<8x32xf32>
    %215 = arith.mulf %208, %179 : vector<8x32xf32>
    %216 = arith.addf %214, %215 : vector<8x32xf32>
    %217 = arith.index_cast %183 : i32 to index
    %c0_96 = arith.constant 0 : index
    %218 = vector.load %arg33[%217, %c0_96] : memref<64x32xf32, #tpu.memory_space<vmem>>, vector<8x32xf32>
    tpu.vector_store %arg33[%217, %c0_96], %216 {strides = array<i32>} : memref<64x32xf32, #tpu.memory_space<vmem>>, vector<8x32xf32>,
    %c5_i32 = arith.constant 5 : i32
    %c8_i32_97 = arith.constant 8 : i32
    %219 = arith.muli %c5_i32, %c8_i32_97 : i32
    %220 = tpu.assume_multiple %219, 8 : i32
    %221 = arith.index_cast %220 : i32 to index
    %c0_98 = arith.constant 0 : index
    %222 = vector.load %arg30[%221, %c0_98] : memref<64x32xf32, #tpu.memory_space<vmem>>, vector<8x32xf32>
    %223 = arith.index_cast %220 : i32 to index
    %c0_99 = arith.constant 0 : index
    %224 = vector.load %arg31[%223, %c0_99] : memref<64x32xf32, #tpu.memory_space<vmem>>, vector<8x32xf32>
    %225 = arith.index_cast %220 : i32 to index
    %c0_100 = arith.constant 0 : index
    %226 = vector.load %arg32[%225, %c0_100] : memref<64x32xf32, #tpu.memory_space<vmem>>, vector<8x32xf32>
    %227 = arith.addf %222, %21 : vector<8x32xf32>
    %228 = arith.addf %224, %23 : vector<8x32xf32>
    %229 = arith.addf %226, %25 : vector<8x32xf32>
    %cst_101 = arith.constant dense<0.000000e+00> : vector<8x32xf32>
    %230 = tpu.matmul %216, %26, %cst_101 {dimension_numbers = #tpu.dot_dimension_numbers<[1], [0], [0], [1], [0, 0, 1, 1], [], []>} : vector<8x32xf32>, vector<32x32xf32>, vector<8x32xf32> -> vector<8x32xf32>
    %cst_102 = arith.constant dense<0.000000e+00> : vector<8x32xf32>
    %231 = tpu.matmul %216, %27, %cst_102 {dimension_numbers = #tpu.dot_dimension_numbers<[1], [0], [0], [1], [0, 0, 1, 1], [], []>} : vector<8x32xf32>, vector<32x32xf32>, vector<8x32xf32> -> vector<8x32xf32>
    %cst_103 = arith.constant dense<0.000000e+00> : vector<8x32xf32>
    %232 = tpu.matmul %216, %28, %cst_103 {dimension_numbers = #tpu.dot_dimension_numbers<[1], [0], [0], [1], [0, 0, 1, 1], [], []>} : vector<8x32xf32>, vector<32x32xf32>, vector<8x32xf32> -> vector<8x32xf32>
    %233 = arith.addf %232, %31 : vector<8x32xf32>
    %234 = arith.addf %227, %230 : vector<8x32xf32>
    %235 = arith.negf %234 : vector<8x32xf32>
    %236 = math.exp %235 : vector<8x32xf32>
    %cst_104 = arith.constant 1.000000e+00 : f32
    %237 = vector.broadcast %cst_104 : f32 to vector<8x32xf32>
    %238 = arith.addf %237, %236 : vector<8x32xf32>
    %239 = arith.divf %237, %238 : vector<8x32xf32>
    %240 = arith.addf %228, %231 : vector<8x32xf32>
    %241 = arith.negf %240 : vector<8x32xf32>
    %242 = math.exp %241 : vector<8x32xf32>
    %cst_105 = arith.constant 1.000000e+00 : f32
    %243 = vector.broadcast %cst_105 : f32 to vector<8x32xf32>
    %244 = arith.addf %243, %242 : vector<8x32xf32>
    %245 = arith.divf %243, %244 : vector<8x32xf32>
    %246 = arith.mulf %239, %233 : vector<8x32xf32>
    %247 = arith.addf %229, %246 : vector<8x32xf32>
    %248 = math.tanh %247 : vector<8x32xf32>
    %cst_106 = arith.constant 1.000000e+00 : f32
    %249 = vector.broadcast %cst_106 : f32 to vector<8x32xf32>
    %250 = arith.subf %249, %245 : vector<8x32xf32>
    %251 = arith.mulf %250, %248 : vector<8x32xf32>
    %252 = arith.mulf %245, %216 : vector<8x32xf32>
    %253 = arith.addf %251, %252 : vector<8x32xf32>
    %254 = arith.index_cast %220 : i32 to index
    %c0_107 = arith.constant 0 : index
    %255 = vector.load %arg33[%254, %c0_107] : memref<64x32xf32, #tpu.memory_space<vmem>>, vector<8x32xf32>
    tpu.vector_store %arg33[%254, %c0_107], %253 {strides = array<i32>} : memref<64x32xf32, #tpu.memory_space<vmem>>, vector<8x32xf32>,
    %c6_i32 = arith.constant 6 : i32
    %c8_i32_108 = arith.constant 8 : i32
    %256 = arith.muli %c6_i32, %c8_i32_108 : i32
    %257 = tpu.assume_multiple %256, 8 : i32
    %258 = arith.index_cast %257 : i32 to index
    %c0_109 = arith.constant 0 : index
    %259 = vector.load %arg30[%258, %c0_109] : memref<64x32xf32, #tpu.memory_space<vmem>>, vector<8x32xf32>
    %260 = arith.index_cast %257 : i32 to index
    %c0_110 = arith.constant 0 : index
    %261 = vector.load %arg31[%260, %c0_110] : memref<64x32xf32, #tpu.memory_space<vmem>>, vector<8x32xf32>
    %262 = arith.index_cast %257 : i32 to index
    %c0_111 = arith.constant 0 : index
    %263 = vector.load %arg32[%262, %c0_111] : memref<64x32xf32, #tpu.memory_space<vmem>>, vector<8x32xf32>
    %264 = arith.addf %259, %21 : vector<8x32xf32>
    %265 = arith.addf %261, %23 : vector<8x32xf32>
    %266 = arith.addf %263, %25 : vector<8x32xf32>
    %cst_112 = arith.constant dense<0.000000e+00> : vector<8x32xf32>
    %267 = tpu.matmul %253, %26, %cst_112 {dimension_numbers = #tpu.dot_dimension_numbers<[1], [0], [0], [1], [0, 0, 1, 1], [], []>} : vector<8x32xf32>, vector<32x32xf32>, vector<8x32xf32> -> vector<8x32xf32>
    %cst_113 = arith.constant dense<0.000000e+00> : vector<8x32xf32>
    %268 = tpu.matmul %253, %27, %cst_113 {dimension_numbers = #tpu.dot_dimension_numbers<[1], [0], [0], [1], [0, 0, 1, 1], [], []>} : vector<8x32xf32>, vector<32x32xf32>, vector<8x32xf32> -> vector<8x32xf32>
    %cst_114 = arith.constant dense<0.000000e+00> : vector<8x32xf32>
    %269 = tpu.matmul %253, %28, %cst_114 {dimension_numbers = #tpu.dot_dimension_numbers<[1], [0], [0], [1], [0, 0, 1, 1], [], []>} : vector<8x32xf32>, vector<32x32xf32>, vector<8x32xf32> -> vector<8x32xf32>
    %270 = arith.addf %269, %31 : vector<8x32xf32>
    %271 = arith.addf %264, %267 : vector<8x32xf32>
    %272 = arith.negf %271 : vector<8x32xf32>
    %273 = math.exp %272 : vector<8x32xf32>
    %cst_115 = arith.constant 1.000000e+00 : f32
    %274 = vector.broadcast %cst_115 : f32 to vector<8x32xf32>
    %275 = arith.addf %274, %273 : vector<8x32xf32>
    %276 = arith.divf %274, %275 : vector<8x32xf32>
    %277 = arith.addf %265, %268 : vector<8x32xf32>
    %278 = arith.negf %277 : vector<8x32xf32>
    %279 = math.exp %278 : vector<8x32xf32>
    %cst_116 = arith.constant 1.000000e+00 : f32
    %280 = vector.broadcast %cst_116 : f32 to vector<8x32xf32>
    %281 = arith.addf %280, %279 : vector<8x32xf32>
    %282 = arith.divf %280, %281 : vector<8x32xf32>
    %283 = arith.mulf %276, %270 : vector<8x32xf32>
    %284 = arith.addf %266, %283 : vector<8x32xf32>
    %285 = math.tanh %284 : vector<8x32xf32>
    %cst_117 = arith.constant 1.000000e+00 : f32
    %286 = vector.broadcast %cst_117 : f32 to vector<8x32xf32>
    %287 = arith.subf %286, %282 : vector<8x32xf32>
    %288 = arith.mulf %287, %285 : vector<8x32xf32>
    %289 = arith.mulf %282, %253 : vector<8x32xf32>
    %290 = arith.addf %288, %289 : vector<8x32xf32>
    %291 = arith.index_cast %257 : i32 to index
    %c0_118 = arith.constant 0 : index
    %292 = vector.load %arg33[%291, %c0_118] : memref<64x32xf32, #tpu.memory_space<vmem>>, vector<8x32xf32>
    tpu.vector_store %arg33[%291, %c0_118], %290 {strides = array<i32>} : memref<64x32xf32, #tpu.memory_space<vmem>>, vector<8x32xf32>,
    %c7_i32 = arith.constant 7 : i32
    %c8_i32_119 = arith.constant 8 : i32
    %293 = arith.muli %c7_i32, %c8_i32_119 : i32
    %294 = tpu.assume_multiple %293, 8 : i32
    %295 = arith.index_cast %294 : i32 to index
    %c0_120 = arith.constant 0 : index
    %296 = vector.load %arg30[%295, %c0_120] : memref<64x32xf32, #tpu.memory_space<vmem>>, vector<8x32xf32>
    %297 = arith.index_cast %294 : i32 to index
    %c0_121 = arith.constant 0 : index
    %298 = vector.load %arg31[%297, %c0_121] : memref<64x32xf32, #tpu.memory_space<vmem>>, vector<8x32xf32>
    %299 = arith.index_cast %294 : i32 to index
    %c0_122 = arith.constant 0 : index
    %300 = vector.load %arg32[%299, %c0_122] : memref<64x32xf32, #tpu.memory_space<vmem>>, vector<8x32xf32>
    %301 = arith.addf %296, %21 : vector<8x32xf32>
    %302 = arith.addf %298, %23 : vector<8x32xf32>
    %303 = arith.addf %300, %25 : vector<8x32xf32>
    %cst_123 = arith.constant dense<0.000000e+00> : vector<8x32xf32>
    %304 = tpu.matmul %290, %26, %cst_123 {dimension_numbers = #tpu.dot_dimension_numbers<[1], [0], [0], [1], [0, 0, 1, 1], [], []>} : vector<8x32xf32>, vector<32x32xf32>, vector<8x32xf32> -> vector<8x32xf32>
    %cst_124 = arith.constant dense<0.000000e+00> : vector<8x32xf32>
    %305 = tpu.matmul %290, %27, %cst_124 {dimension_numbers = #tpu.dot_dimension_numbers<[1], [0], [0], [1], [0, 0, 1, 1], [], []>} : vector<8x32xf32>, vector<32x32xf32>, vector<8x32xf32> -> vector<8x32xf32>
    %cst_125 = arith.constant dense<0.000000e+00> : vector<8x32xf32>
    %306 = tpu.matmul %290, %28, %cst_125 {dimension_numbers = #tpu.dot_dimension_numbers<[1], [0], [0], [1], [0, 0, 1, 1], [], []>} : vector<8x32xf32>, vector<32x32xf32>, vector<8x32xf32> -> vector<8x32xf32>
    %307 = arith.addf %306, %31 : vector<8x32xf32>
    %308 = arith.addf %301, %304 : vector<8x32xf32>
    %309 = arith.negf %308 : vector<8x32xf32>
    %310 = math.exp %309 : vector<8x32xf32>
    %cst_126 = arith.constant 1.000000e+00 : f32
    %311 = vector.broadcast %cst_126 : f32 to vector<8x32xf32>
    %312 = arith.addf %311, %310 : vector<8x32xf32>
    %313 = arith.divf %311, %312 : vector<8x32xf32>
    %314 = arith.addf %302, %305 : vector<8x32xf32>
    %315 = arith.negf %314 : vector<8x32xf32>
    %316 = math.exp %315 : vector<8x32xf32>
    %cst_127 = arith.constant 1.000000e+00 : f32
    %317 = vector.broadcast %cst_127 : f32 to vector<8x32xf32>
    %318 = arith.addf %317, %316 : vector<8x32xf32>
    %319 = arith.divf %317, %318 : vector<8x32xf32>
    %320 = arith.mulf %313, %307 : vector<8x32xf32>
    %321 = arith.addf %303, %320 : vector<8x32xf32>
    %322 = math.tanh %321 : vector<8x32xf32>
    %cst_128 = arith.constant 1.000000e+00 : f32
    %323 = vector.broadcast %cst_128 : f32 to vector<8x32xf32>
    %324 = arith.subf %323, %319 : vector<8x32xf32>
    %325 = arith.mulf %324, %322 : vector<8x32xf32>
    %326 = arith.mulf %319, %290 : vector<8x32xf32>
    %327 = arith.addf %325, %326 : vector<8x32xf32>
    %328 = arith.index_cast %294 : i32 to index
    %c0_129 = arith.constant 0 : index
    %329 = vector.load %arg33[%328, %c0_129] : memref<64x32xf32, #tpu.memory_space<vmem>>, vector<8x32xf32>
    tpu.vector_store %arg33[%328, %c0_129], %327 {strides = array<i32>} : memref<64x32xf32, #tpu.memory_space<vmem>>, vector<8x32xf32>,
    %c8_i32_130 = arith.constant 8 : i32
    %c0_131 = arith.constant 0 : index
    %c0_132 = arith.constant 0 : index
    %c0_133 = arith.constant 0 : index
    %330 = vector.load %arg29[%c0_131, %c0_132, %c0_133] : memref<2x8x32xf32, #tpu.memory_space<vmem>>, vector<1x8x32xf32>
    %331 = vector.shape_cast %330 : vector<1x8x32xf32> to vector<8x32xf32>
    %332 = vector.shape_cast %327 : vector<8x32xf32> to vector<1x8x32xf32>
    tpu.vector_store %arg29[%c0_131, %c0_132, %c0_133], %332 {strides = array<i32>} : memref<2x8x32xf32, #tpu.memory_space<vmem>>, vector<1x8x32xf32>,
    %c0_134 = arith.constant 0 : index
    %c0_135 = arith.constant 0 : index
    %333 = vector.load %arg33[%c0_134, %c0_135] : memref<64x32xf32, #tpu.memory_space<vmem>>, vector<64x32xf32>
    %c0_136 = arith.constant 0 : index
    %c0_137 = arith.constant 0 : index
    %334 = vector.load %arg16[%c0_136, %c0_137] : memref<32x32xf32, #tpu.memory_space<vmem>>, vector<32x32xf32>
    %cst_138 = arith.constant dense<0.000000e+00> : vector<64x32xf32>
    %335 = tpu.matmul %333, %334, %cst_138 {dimension_numbers = #tpu.dot_dimension_numbers<[1], [0], [0], [1], [0, 0, 1, 1], [], []>} : vector<64x32xf32>, vector<32x32xf32>, vector<64x32xf32> -> vector<64x32xf32>
    %c0_139 = arith.constant 0 : index
    %c0_140 = arith.constant 0 : index
    %336 = vector.load %arg22[%c0_139, %c0_140] : memref<1x32xf32, #tpu.memory_space<vmem>>, vector<1x32xf32>
    %337 = vector.broadcast %336 : vector<1x32xf32> to vector<64x32xf32>
    %338 = arith.addf %335, %337 : vector<64x32xf32>
    %c0_141 = arith.constant 0 : index
    %c0_142 = arith.constant 0 : index
    %339 = vector.load %arg30[%c0_141, %c0_142] : memref<64x32xf32, #tpu.memory_space<vmem>>, vector<64x32xf32>
    tpu.vector_store %arg30[%c0_141, %c0_142], %338 {strides = array<i32>} : memref<64x32xf32, #tpu.memory_space<vmem>>, vector<64x32xf32>,
    %c0_143 = arith.constant 0 : index
    %c0_144 = arith.constant 0 : index
    %340 = vector.load %arg17[%c0_143, %c0_144] : memref<32x32xf32, #tpu.memory_space<vmem>>, vector<32x32xf32>
    %cst_145 = arith.constant dense<0.000000e+00> : vector<64x32xf32>
    %341 = tpu.matmul %333, %340, %cst_145 {dimension_numbers = #tpu.dot_dimension_numbers<[1], [0], [0], [1], [0, 0, 1, 1], [], []>} : vector<64x32xf32>, vector<32x32xf32>, vector<64x32xf32> -> vector<64x32xf32>
    %c0_146 = arith.constant 0 : index
    %c0_147 = arith.constant 0 : index
    %342 = vector.load %arg23[%c0_146, %c0_147] : memref<1x32xf32, #tpu.memory_space<vmem>>, vector<1x32xf32>
    %343 = vector.broadcast %342 : vector<1x32xf32> to vector<64x32xf32>
    %344 = arith.addf %341, %343 : vector<64x32xf32>
    %c0_148 = arith.constant 0 : index
    %c0_149 = arith.constant 0 : index
    %345 = vector.load %arg31[%c0_148, %c0_149] : memref<64x32xf32, #tpu.memory_space<vmem>>, vector<64x32xf32>
    tpu.vector_store %arg31[%c0_148, %c0_149], %344 {strides = array<i32>} : memref<64x32xf32, #tpu.memory_space<vmem>>, vector<64x32xf32>,
    %c0_150 = arith.constant 0 : index
    %c0_151 = arith.constant 0 : index
    %346 = vector.load %arg18[%c0_150, %c0_151] : memref<32x32xf32, #tpu.memory_space<vmem>>, vector<32x32xf32>
    %cst_152 = arith.constant dense<0.000000e+00> : vector<64x32xf32>
    %347 = tpu.matmul %333, %346, %cst_152 {dimension_numbers = #tpu.dot_dimension_numbers<[1], [0], [0], [1], [0, 0, 1, 1], [], []>} : vector<64x32xf32>, vector<32x32xf32>, vector<64x32xf32> -> vector<64x32xf32>
    %c0_153 = arith.constant 0 : index
    %c0_154 = arith.constant 0 : index
    %348 = vector.load %arg24[%c0_153, %c0_154] : memref<1x32xf32, #tpu.memory_space<vmem>>, vector<1x32xf32>
    %349 = vector.broadcast %348 : vector<1x32xf32> to vector<64x32xf32>
    %350 = arith.addf %347, %349 : vector<64x32xf32>
    %c0_155 = arith.constant 0 : index
    %c0_156 = arith.constant 0 : index
    %351 = vector.load %arg32[%c0_155, %c0_156] : memref<64x32xf32, #tpu.memory_space<vmem>>, vector<64x32xf32>
    tpu.vector_store %arg32[%c0_155, %c0_156], %350 {strides = array<i32>} : memref<64x32xf32, #tpu.memory_space<vmem>>, vector<64x32xf32>,
    %c0_157 = arith.constant 0 : index
    %c0_158 = arith.constant 0 : index
    %352 = vector.load %arg19[%c0_157, %c0_158] : memref<32x32xf32, #tpu.memory_space<vmem>>, vector<32x32xf32>
    %c0_159 = arith.constant 0 : index
    %c0_160 = arith.constant 0 : index
    %353 = vector.load %arg20[%c0_159, %c0_160] : memref<32x32xf32, #tpu.memory_space<vmem>>, vector<32x32xf32>
    %c0_161 = arith.constant 0 : index
    %c0_162 = arith.constant 0 : index
    %354 = vector.load %arg21[%c0_161, %c0_162] : memref<32x32xf32, #tpu.memory_space<vmem>>, vector<32x32xf32>
    %c0_163 = arith.constant 0 : index
    %c0_164 = arith.constant 0 : index
    %355 = vector.load %arg25[%c0_163, %c0_164] : memref<1x32xf32, #tpu.memory_space<vmem>>, vector<1x32xf32>
    %356 = vector.shape_cast %355 : vector<1x32xf32> to vector<1x32xf32>
    %357 = vector.broadcast %356 : vector<1x32xf32> to vector<8x32xf32>
    %c1 = arith.constant 1 : index
    %c0_165 = arith.constant 0 : index
    %c0_166 = arith.constant 0 : index
    %358 = vector.load %arg2[%c1, %c0_165, %c0_166] : memref<2x8x32xf32, #tpu.memory_space<vmem>>, vector<1x8x32xf32>
    %359 = vector.shape_cast %358 : vector<1x8x32xf32> to vector<8x32xf32>
    %c0_i32_167 = arith.constant 0 : i32
    %c8_i32_168 = arith.constant 8 : i32
    %360 = arith.muli %c0_i32_167, %c8_i32_168 : i32
    %361 = tpu.assume_multiple %360, 8 : i32
    %362 = arith.index_cast %361 : i32 to index
    %c0_169 = arith.constant 0 : index
    %363 = vector.load %arg30[%362, %c0_169] : memref<64x32xf32, #tpu.memory_space<vmem>>, vector<8x32xf32>
    %364 = arith.index_cast %361 : i32 to index
    %c0_170 = arith.constant 0 : index
    %365 = vector.load %arg31[%364, %c0_170] : memref<64x32xf32, #tpu.memory_space<vmem>>, vector<8x32xf32>
    %366 = arith.index_cast %361 : i32 to index
    %c0_171 = arith.constant 0 : index
    %367 = vector.load %arg32[%366, %c0_171] : memref<64x32xf32, #tpu.memory_space<vmem>>, vector<8x32xf32>
    %cst_172 = arith.constant dense<0.000000e+00> : vector<8x32xf32>
    %368 = tpu.matmul %359, %352, %cst_172 {dimension_numbers = #tpu.dot_dimension_numbers<[1], [0], [0], [1], [0, 0, 1, 1], [], []>} : vector<8x32xf32>, vector<32x32xf32>, vector<8x32xf32> -> vector<8x32xf32>
    %cst_173 = arith.constant dense<0.000000e+00> : vector<8x32xf32>
    %369 = tpu.matmul %359, %353, %cst_173 {dimension_numbers = #tpu.dot_dimension_numbers<[1], [0], [0], [1], [0, 0, 1, 1], [], []>} : vector<8x32xf32>, vector<32x32xf32>, vector<8x32xf32> -> vector<8x32xf32>
    %cst_174 = arith.constant dense<0.000000e+00> : vector<8x32xf32>
    %370 = tpu.matmul %359, %354, %cst_174 {dimension_numbers = #tpu.dot_dimension_numbers<[1], [0], [0], [1], [0, 0, 1, 1], [], []>} : vector<8x32xf32>, vector<32x32xf32>, vector<8x32xf32> -> vector<8x32xf32>
    %371 = arith.addf %370, %357 : vector<8x32xf32>
    %372 = arith.addf %363, %368 : vector<8x32xf32>
    %373 = arith.negf %372 : vector<8x32xf32>
    %374 = math.exp %373 : vector<8x32xf32>
    %cst_175 = arith.constant 1.000000e+00 : f32
    %375 = vector.broadcast %cst_175 : f32 to vector<8x32xf32>
    %376 = arith.addf %375, %374 : vector<8x32xf32>
    %377 = arith.divf %375, %376 : vector<8x32xf32>
    %378 = arith.addf %365, %369 : vector<8x32xf32>
    %379 = arith.negf %378 : vector<8x32xf32>
    %380 = math.exp %379 : vector<8x32xf32>
    %cst_176 = arith.constant 1.000000e+00 : f32
    %381 = vector.broadcast %cst_176 : f32 to vector<8x32xf32>
    %382 = arith.addf %381, %380 : vector<8x32xf32>
    %383 = arith.divf %381, %382 : vector<8x32xf32>
    %384 = arith.mulf %377, %371 : vector<8x32xf32>
    %385 = arith.addf %367, %384 : vector<8x32xf32>
    %386 = math.tanh %385 : vector<8x32xf32>
    %cst_177 = arith.constant 1.000000e+00 : f32
    %387 = vector.broadcast %cst_177 : f32 to vector<8x32xf32>
    %388 = arith.subf %387, %383 : vector<8x32xf32>
    %389 = arith.mulf %388, %386 : vector<8x32xf32>
    %390 = arith.mulf %383, %359 : vector<8x32xf32>
    %391 = arith.addf %389, %390 : vector<8x32xf32>
    %392 = arith.index_cast %361 : i32 to index
    %c0_178 = arith.constant 0 : index
    %393 = vector.load %arg33[%392, %c0_178] : memref<64x32xf32, #tpu.memory_space<vmem>>, vector<8x32xf32>
    tpu.vector_store %arg33[%392, %c0_178], %391 {strides = array<i32>} : memref<64x32xf32, #tpu.memory_space<vmem>>, vector<8x32xf32>,
    %c1_i32_179 = arith.constant 1 : i32
    %c8_i32_180 = arith.constant 8 : i32
    %394 = arith.muli %c1_i32_179, %c8_i32_180 : i32
    %395 = tpu.assume_multiple %394, 8 : i32
    %396 = arith.index_cast %395 : i32 to index
    %c0_181 = arith.constant 0 : index
    %397 = vector.load %arg30[%396, %c0_181] : memref<64x32xf32, #tpu.memory_space<vmem>>, vector<8x32xf32>
    %398 = arith.index_cast %395 : i32 to index
    %c0_182 = arith.constant 0 : index
    %399 = vector.load %arg31[%398, %c0_182] : memref<64x32xf32, #tpu.memory_space<vmem>>, vector<8x32xf32>
    %400 = arith.index_cast %395 : i32 to index
    %c0_183 = arith.constant 0 : index
    %401 = vector.load %arg32[%400, %c0_183] : memref<64x32xf32, #tpu.memory_space<vmem>>, vector<8x32xf32>
    %cst_184 = arith.constant dense<0.000000e+00> : vector<8x32xf32>
    %402 = tpu.matmul %391, %352, %cst_184 {dimension_numbers = #tpu.dot_dimension_numbers<[1], [0], [0], [1], [0, 0, 1, 1], [], []>} : vector<8x32xf32>, vector<32x32xf32>, vector<8x32xf32> -> vector<8x32xf32>
    %cst_185 = arith.constant dense<0.000000e+00> : vector<8x32xf32>
    %403 = tpu.matmul %391, %353, %cst_185 {dimension_numbers = #tpu.dot_dimension_numbers<[1], [0], [0], [1], [0, 0, 1, 1], [], []>} : vector<8x32xf32>, vector<32x32xf32>, vector<8x32xf32> -> vector<8x32xf32>
    %cst_186 = arith.constant dense<0.000000e+00> : vector<8x32xf32>
    %404 = tpu.matmul %391, %354, %cst_186 {dimension_numbers = #tpu.dot_dimension_numbers<[1], [0], [0], [1], [0, 0, 1, 1], [], []>} : vector<8x32xf32>, vector<32x32xf32>, vector<8x32xf32> -> vector<8x32xf32>
    %405 = arith.addf %404, %357 : vector<8x32xf32>
    %406 = arith.addf %397, %402 : vector<8x32xf32>
    %407 = arith.negf %406 : vector<8x32xf32>
    %408 = math.exp %407 : vector<8x32xf32>
    %cst_187 = arith.constant 1.000000e+00 : f32
    %409 = vector.broadcast %cst_187 : f32 to vector<8x32xf32>
    %410 = arith.addf %409, %408 : vector<8x32xf32>
    %411 = arith.divf %409, %410 : vector<8x32xf32>
    %412 = arith.addf %399, %403 : vector<8x32xf32>
    %413 = arith.negf %412 : vector<8x32xf32>
    %414 = math.exp %413 : vector<8x32xf32>
    %cst_188 = arith.constant 1.000000e+00 : f32
    %415 = vector.broadcast %cst_188 : f32 to vector<8x32xf32>
    %416 = arith.addf %415, %414 : vector<8x32xf32>
    %417 = arith.divf %415, %416 : vector<8x32xf32>
    %418 = arith.mulf %411, %405 : vector<8x32xf32>
    %419 = arith.addf %401, %418 : vector<8x32xf32>
    %420 = math.tanh %419 : vector<8x32xf32>
    %cst_189 = arith.constant 1.000000e+00 : f32
    %421 = vector.broadcast %cst_189 : f32 to vector<8x32xf32>
    %422 = arith.subf %421, %417 : vector<8x32xf32>
    %423 = arith.mulf %422, %420 : vector<8x32xf32>
    %424 = arith.mulf %417, %391 : vector<8x32xf32>
    %425 = arith.addf %423, %424 : vector<8x32xf32>
    %426 = arith.index_cast %395 : i32 to index
    %c0_190 = arith.constant 0 : index
    %427 = vector.load %arg33[%426, %c0_190] : memref<64x32xf32, #tpu.memory_space<vmem>>, vector<8x32xf32>
    tpu.vector_store %arg33[%426, %c0_190], %425 {strides = array<i32>} : memref<64x32xf32, #tpu.memory_space<vmem>>, vector<8x32xf32>,
    %c2_i32_191 = arith.constant 2 : i32
    %c8_i32_192 = arith.constant 8 : i32
    %428 = arith.muli %c2_i32_191, %c8_i32_192 : i32
    %429 = tpu.assume_multiple %428, 8 : i32
    %430 = arith.index_cast %429 : i32 to index
    %c0_193 = arith.constant 0 : index
    %431 = vector.load %arg30[%430, %c0_193] : memref<64x32xf32, #tpu.memory_space<vmem>>, vector<8x32xf32>
    %432 = arith.index_cast %429 : i32 to index
    %c0_194 = arith.constant 0 : index
    %433 = vector.load %arg31[%432, %c0_194] : memref<64x32xf32, #tpu.memory_space<vmem>>, vector<8x32xf32>
    %434 = arith.index_cast %429 : i32 to index
    %c0_195 = arith.constant 0 : index
    %435 = vector.load %arg32[%434, %c0_195] : memref<64x32xf32, #tpu.memory_space<vmem>>, vector<8x32xf32>
    %cst_196 = arith.constant dense<0.000000e+00> : vector<8x32xf32>
    %436 = tpu.matmul %425, %352, %cst_196 {dimension_numbers = #tpu.dot_dimension_numbers<[1], [0], [0], [1], [0, 0, 1, 1], [], []>} : vector<8x32xf32>, vector<32x32xf32>, vector<8x32xf32> -> vector<8x32xf32>
    %cst_197 = arith.constant dense<0.000000e+00> : vector<8x32xf32>
    %437 = tpu.matmul %425, %353, %cst_197 {dimension_numbers = #tpu.dot_dimension_numbers<[1], [0], [0], [1], [0, 0, 1, 1], [], []>} : vector<8x32xf32>, vector<32x32xf32>, vector<8x32xf32> -> vector<8x32xf32>
    %cst_198 = arith.constant dense<0.000000e+00> : vector<8x32xf32>
    %438 = tpu.matmul %425, %354, %cst_198 {dimension_numbers = #tpu.dot_dimension_numbers<[1], [0], [0], [1], [0, 0, 1, 1], [], []>} : vector<8x32xf32>, vector<32x32xf32>, vector<8x32xf32> -> vector<8x32xf32>
    %439 = arith.addf %438, %357 : vector<8x32xf32>
    %440 = arith.addf %431, %436 : vector<8x32xf32>
    %441 = arith.negf %440 : vector<8x32xf32>
    %442 = math.exp %441 : vector<8x32xf32>
    %cst_199 = arith.constant 1.000000e+00 : f32
    %443 = vector.broadcast %cst_199 : f32 to vector<8x32xf32>
    %444 = arith.addf %443, %442 : vector<8x32xf32>
    %445 = arith.divf %443, %444 : vector<8x32xf32>
    %446 = arith.addf %433, %437 : vector<8x32xf32>
    %447 = arith.negf %446 : vector<8x32xf32>
    %448 = math.exp %447 : vector<8x32xf32>
    %cst_200 = arith.constant 1.000000e+00 : f32
    %449 = vector.broadcast %cst_200 : f32 to vector<8x32xf32>
    %450 = arith.addf %449, %448 : vector<8x32xf32>
    %451 = arith.divf %449, %450 : vector<8x32xf32>
    %452 = arith.mulf %445, %439 : vector<8x32xf32>
    %453 = arith.addf %435, %452 : vector<8x32xf32>
    %454 = math.tanh %453 : vector<8x32xf32>
    %cst_201 = arith.constant 1.000000e+00 : f32
    %455 = vector.broadcast %cst_201 : f32 to vector<8x32xf32>
    %456 = arith.subf %455, %451 : vector<8x32xf32>
    %457 = arith.mulf %456, %454 : vector<8x32xf32>
    %458 = arith.mulf %451, %425 : vector<8x32xf32>
    %459 = arith.addf %457, %458 : vector<8x32xf32>
    %460 = arith.index_cast %429 : i32 to index
    %c0_202 = arith.constant 0 : index
    %461 = vector.load %arg33[%460, %c0_202] : memref<64x32xf32, #tpu.memory_space<vmem>>, vector<8x32xf32>
    tpu.vector_store %arg33[%460, %c0_202], %459 {strides = array<i32>} : memref<64x32xf32, #tpu.memory_space<vmem>>, vector<8x32xf32>,
    %c3_i32_203 = arith.constant 3 : i32
    %c8_i32_204 = arith.constant 8 : i32
    %462 = arith.muli %c3_i32_203, %c8_i32_204 : i32
    %463 = tpu.assume_multiple %462, 8 : i32
    %464 = arith.index_cast %463 : i32 to index
    %c0_205 = arith.constant 0 : index
    %465 = vector.load %arg30[%464, %c0_205] : memref<64x32xf32, #tpu.memory_space<vmem>>, vector<8x32xf32>
    %466 = arith.index_cast %463 : i32 to index
    %c0_206 = arith.constant 0 : index
    %467 = vector.load %arg31[%466, %c0_206] : memref<64x32xf32, #tpu.memory_space<vmem>>, vector<8x32xf32>
    %468 = arith.index_cast %463 : i32 to index
    %c0_207 = arith.constant 0 : index
    %469 = vector.load %arg32[%468, %c0_207] : memref<64x32xf32, #tpu.memory_space<vmem>>, vector<8x32xf32>
    %cst_208 = arith.constant dense<0.000000e+00> : vector<8x32xf32>
    %470 = tpu.matmul %459, %352, %cst_208 {dimension_numbers = #tpu.dot_dimension_numbers<[1], [0], [0], [1], [0, 0, 1, 1], [], []>} : vector<8x32xf32>, vector<32x32xf32>, vector<8x32xf32> -> vector<8x32xf32>
    %cst_209 = arith.constant dense<0.000000e+00> : vector<8x32xf32>
    %471 = tpu.matmul %459, %353, %cst_209 {dimension_numbers = #tpu.dot_dimension_numbers<[1], [0], [0], [1], [0, 0, 1, 1], [], []>} : vector<8x32xf32>, vector<32x32xf32>, vector<8x32xf32> -> vector<8x32xf32>
    %cst_210 = arith.constant dense<0.000000e+00> : vector<8x32xf32>
    %472 = tpu.matmul %459, %354, %cst_210 {dimension_numbers = #tpu.dot_dimension_numbers<[1], [0], [0], [1], [0, 0, 1, 1], [], []>} : vector<8x32xf32>, vector<32x32xf32>, vector<8x32xf32> -> vector<8x32xf32>
    %473 = arith.addf %472, %357 : vector<8x32xf32>
    %474 = arith.addf %465, %470 : vector<8x32xf32>
    %475 = arith.negf %474 : vector<8x32xf32>
    %476 = math.exp %475 : vector<8x32xf32>
    %cst_211 = arith.constant 1.000000e+00 : f32
    %477 = vector.broadcast %cst_211 : f32 to vector<8x32xf32>
    %478 = arith.addf %477, %476 : vector<8x32xf32>
    %479 = arith.divf %477, %478 : vector<8x32xf32>
    %480 = arith.addf %467, %471 : vector<8x32xf32>
    %481 = arith.negf %480 : vector<8x32xf32>
    %482 = math.exp %481 : vector<8x32xf32>
    %cst_212 = arith.constant 1.000000e+00 : f32
    %483 = vector.broadcast %cst_212 : f32 to vector<8x32xf32>
    %484 = arith.addf %483, %482 : vector<8x32xf32>
    %485 = arith.divf %483, %484 : vector<8x32xf32>
    %486 = arith.mulf %479, %473 : vector<8x32xf32>
    %487 = arith.addf %469, %486 : vector<8x32xf32>
    %488 = math.tanh %487 : vector<8x32xf32>
    %cst_213 = arith.constant 1.000000e+00 : f32
    %489 = vector.broadcast %cst_213 : f32 to vector<8x32xf32>
    %490 = arith.subf %489, %485 : vector<8x32xf32>
    %491 = arith.mulf %490, %488 : vector<8x32xf32>
    %492 = arith.mulf %485, %459 : vector<8x32xf32>
    %493 = arith.addf %491, %492 : vector<8x32xf32>
    %494 = arith.index_cast %463 : i32 to index
    %c0_214 = arith.constant 0 : index
    %495 = vector.load %arg33[%494, %c0_214] : memref<64x32xf32, #tpu.memory_space<vmem>>, vector<8x32xf32>
    tpu.vector_store %arg33[%494, %c0_214], %493 {strides = array<i32>} : memref<64x32xf32, #tpu.memory_space<vmem>>, vector<8x32xf32>,
    %c4_i32_215 = arith.constant 4 : i32
    %c8_i32_216 = arith.constant 8 : i32
    %496 = arith.muli %c4_i32_215, %c8_i32_216 : i32
    %497 = tpu.assume_multiple %496, 8 : i32
    %498 = arith.index_cast %497 : i32 to index
    %c0_217 = arith.constant 0 : index
    %499 = vector.load %arg30[%498, %c0_217] : memref<64x32xf32, #tpu.memory_space<vmem>>, vector<8x32xf32>
    %500 = arith.index_cast %497 : i32 to index
    %c0_218 = arith.constant 0 : index
    %501 = vector.load %arg31[%500, %c0_218] : memref<64x32xf32, #tpu.memory_space<vmem>>, vector<8x32xf32>
    %502 = arith.index_cast %497 : i32 to index
    %c0_219 = arith.constant 0 : index
    %503 = vector.load %arg32[%502, %c0_219] : memref<64x32xf32, #tpu.memory_space<vmem>>, vector<8x32xf32>
    %cst_220 = arith.constant dense<0.000000e+00> : vector<8x32xf32>
    %504 = tpu.matmul %493, %352, %cst_220 {dimension_numbers = #tpu.dot_dimension_numbers<[1], [0], [0], [1], [0, 0, 1, 1], [], []>} : vector<8x32xf32>, vector<32x32xf32>, vector<8x32xf32> -> vector<8x32xf32>
    %cst_221 = arith.constant dense<0.000000e+00> : vector<8x32xf32>
    %505 = tpu.matmul %493, %353, %cst_221 {dimension_numbers = #tpu.dot_dimension_numbers<[1], [0], [0], [1], [0, 0, 1, 1], [], []>} : vector<8x32xf32>, vector<32x32xf32>, vector<8x32xf32> -> vector<8x32xf32>
    %cst_222 = arith.constant dense<0.000000e+00> : vector<8x32xf32>
    %506 = tpu.matmul %493, %354, %cst_222 {dimension_numbers = #tpu.dot_dimension_numbers<[1], [0], [0], [1], [0, 0, 1, 1], [], []>} : vector<8x32xf32>, vector<32x32xf32>, vector<8x32xf32> -> vector<8x32xf32>
    %507 = arith.addf %506, %357 : vector<8x32xf32>
    %508 = arith.addf %499, %504 : vector<8x32xf32>
    %509 = arith.negf %508 : vector<8x32xf32>
    %510 = math.exp %509 : vector<8x32xf32>
    %cst_223 = arith.constant 1.000000e+00 : f32
    %511 = vector.broadcast %cst_223 : f32 to vector<8x32xf32>
    %512 = arith.addf %511, %510 : vector<8x32xf32>
    %513 = arith.divf %511, %512 : vector<8x32xf32>
    %514 = arith.addf %501, %505 : vector<8x32xf32>
    %515 = arith.negf %514 : vector<8x32xf32>
    %516 = math.exp %515 : vector<8x32xf32>
    %cst_224 = arith.constant 1.000000e+00 : f32
    %517 = vector.broadcast %cst_224 : f32 to vector<8x32xf32>
    %518 = arith.addf %517, %516 : vector<8x32xf32>
    %519 = arith.divf %517, %518 : vector<8x32xf32>
    %520 = arith.mulf %513, %507 : vector<8x32xf32>
    %521 = arith.addf %503, %520 : vector<8x32xf32>
    %522 = math.tanh %521 : vector<8x32xf32>
    %cst_225 = arith.constant 1.000000e+00 : f32
    %523 = vector.broadcast %cst_225 : f32 to vector<8x32xf32>
    %524 = arith.subf %523, %519 : vector<8x32xf32>
    %525 = arith.mulf %524, %522 : vector<8x32xf32>
    %526 = arith.mulf %519, %493 : vector<8x32xf32>
    %527 = arith.addf %525, %526 : vector<8x32xf32>
    %528 = arith.index_cast %497 : i32 to index
    %c0_226 = arith.constant 0 : index
    %529 = vector.load %arg33[%528, %c0_226] : memref<64x32xf32, #tpu.memory_space<vmem>>, vector<8x32xf32>
    tpu.vector_store %arg33[%528, %c0_226], %527 {strides = array<i32>} : memref<64x32xf32, #tpu.memory_space<vmem>>, vector<8x32xf32>,
    %c5_i32_227 = arith.constant 5 : i32
    %c8_i32_228 = arith.constant 8 : i32
    %530 = arith.muli %c5_i32_227, %c8_i32_228 : i32
    %531 = tpu.assume_multiple %530, 8 : i32
    %532 = arith.index_cast %531 : i32 to index
    %c0_229 = arith.constant 0 : index
    %533 = vector.load %arg30[%532, %c0_229] : memref<64x32xf32, #tpu.memory_space<vmem>>, vector<8x32xf32>
    %534 = arith.index_cast %531 : i32 to index
    %c0_230 = arith.constant 0 : index
    %535 = vector.load %arg31[%534, %c0_230] : memref<64x32xf32, #tpu.memory_space<vmem>>, vector<8x32xf32>
    %536 = arith.index_cast %531 : i32 to index
    %c0_231 = arith.constant 0 : index
    %537 = vector.load %arg32[%536, %c0_231] : memref<64x32xf32, #tpu.memory_space<vmem>>, vector<8x32xf32>
    %cst_232 = arith.constant dense<0.000000e+00> : vector<8x32xf32>
    %538 = tpu.matmul %527, %352, %cst_232 {dimension_numbers = #tpu.dot_dimension_numbers<[1], [0], [0], [1], [0, 0, 1, 1], [], []>} : vector<8x32xf32>, vector<32x32xf32>, vector<8x32xf32> -> vector<8x32xf32>
    %cst_233 = arith.constant dense<0.000000e+00> : vector<8x32xf32>
    %539 = tpu.matmul %527, %353, %cst_233 {dimension_numbers = #tpu.dot_dimension_numbers<[1], [0], [0], [1], [0, 0, 1, 1], [], []>} : vector<8x32xf32>, vector<32x32xf32>, vector<8x32xf32> -> vector<8x32xf32>
    %cst_234 = arith.constant dense<0.000000e+00> : vector<8x32xf32>
    %540 = tpu.matmul %527, %354, %cst_234 {dimension_numbers = #tpu.dot_dimension_numbers<[1], [0], [0], [1], [0, 0, 1, 1], [], []>} : vector<8x32xf32>, vector<32x32xf32>, vector<8x32xf32> -> vector<8x32xf32>
    %541 = arith.addf %540, %357 : vector<8x32xf32>
    %542 = arith.addf %533, %538 : vector<8x32xf32>
    %543 = arith.negf %542 : vector<8x32xf32>
    %544 = math.exp %543 : vector<8x32xf32>
    %cst_235 = arith.constant 1.000000e+00 : f32
    %545 = vector.broadcast %cst_235 : f32 to vector<8x32xf32>
    %546 = arith.addf %545, %544 : vector<8x32xf32>
    %547 = arith.divf %545, %546 : vector<8x32xf32>
    %548 = arith.addf %535, %539 : vector<8x32xf32>
    %549 = arith.negf %548 : vector<8x32xf32>
    %550 = math.exp %549 : vector<8x32xf32>
    %cst_236 = arith.constant 1.000000e+00 : f32
    %551 = vector.broadcast %cst_236 : f32 to vector<8x32xf32>
    %552 = arith.addf %551, %550 : vector<8x32xf32>
    %553 = arith.divf %551, %552 : vector<8x32xf32>
    %554 = arith.mulf %547, %541 : vector<8x32xf32>
    %555 = arith.addf %537, %554 : vector<8x32xf32>
    %556 = math.tanh %555 : vector<8x32xf32>
    %cst_237 = arith.constant 1.000000e+00 : f32
    %557 = vector.broadcast %cst_237 : f32 to vector<8x32xf32>
    %558 = arith.subf %557, %553 : vector<8x32xf32>
    %559 = arith.mulf %558, %556 : vector<8x32xf32>
    %560 = arith.mulf %553, %527 : vector<8x32xf32>
    %561 = arith.addf %559, %560 : vector<8x32xf32>
    %562 = arith.index_cast %531 : i32 to index
    %c0_238 = arith.constant 0 : index
    %563 = vector.load %arg33[%562, %c0_238] : memref<64x32xf32, #tpu.memory_space<vmem>>, vector<8x32xf32>
    tpu.vector_store %arg33[%562, %c0_238], %561 {strides = array<i32>} : memref<64x32xf32, #tpu.memory_space<vmem>>, vector<8x32xf32>,
    %c6_i32_239 = arith.constant 6 : i32
    %c8_i32_240 = arith.constant 8 : i32
    %564 = arith.muli %c6_i32_239, %c8_i32_240 : i32
    %565 = tpu.assume_multiple %564, 8 : i32
    %566 = arith.index_cast %565 : i32 to index
    %c0_241 = arith.constant 0 : index
    %567 = vector.load %arg30[%566, %c0_241] : memref<64x32xf32, #tpu.memory_space<vmem>>, vector<8x32xf32>
    %568 = arith.index_cast %565 : i32 to index
    %c0_242 = arith.constant 0 : index
    %569 = vector.load %arg31[%568, %c0_242] : memref<64x32xf32, #tpu.memory_space<vmem>>, vector<8x32xf32>
    %570 = arith.index_cast %565 : i32 to index
    %c0_243 = arith.constant 0 : index
    %571 = vector.load %arg32[%570, %c0_243] : memref<64x32xf32, #tpu.memory_space<vmem>>, vector<8x32xf32>
    %cst_244 = arith.constant dense<0.000000e+00> : vector<8x32xf32>
    %572 = tpu.matmul %561, %352, %cst_244 {dimension_numbers = #tpu.dot_dimension_numbers<[1], [0], [0], [1], [0, 0, 1, 1], [], []>} : vector<8x32xf32>, vector<32x32xf32>, vector<8x32xf32> -> vector<8x32xf32>
    %cst_245 = arith.constant dense<0.000000e+00> : vector<8x32xf32>
    %573 = tpu.matmul %561, %353, %cst_245 {dimension_numbers = #tpu.dot_dimension_numbers<[1], [0], [0], [1], [0, 0, 1, 1], [], []>} : vector<8x32xf32>, vector<32x32xf32>, vector<8x32xf32> -> vector<8x32xf32>
    %cst_246 = arith.constant dense<0.000000e+00> : vector<8x32xf32>
    %574 = tpu.matmul %561, %354, %cst_246 {dimension_numbers = #tpu.dot_dimension_numbers<[1], [0], [0], [1], [0, 0, 1, 1], [], []>} : vector<8x32xf32>, vector<32x32xf32>, vector<8x32xf32> -> vector<8x32xf32>
    %575 = arith.addf %574, %357 : vector<8x32xf32>
    %576 = arith.addf %567, %572 : vector<8x32xf32>
    %577 = arith.negf %576 : vector<8x32xf32>
    %578 = math.exp %577 : vector<8x32xf32>
    %cst_247 = arith.constant 1.000000e+00 : f32
    %579 = vector.broadcast %cst_247 : f32 to vector<8x32xf32>
    %580 = arith.addf %579, %578 : vector<8x32xf32>
    %581 = arith.divf %579, %580 : vector<8x32xf32>
    %582 = arith.addf %569, %573 : vector<8x32xf32>
    %583 = arith.negf %582 : vector<8x32xf32>
    %584 = math.exp %583 : vector<8x32xf32>
    %cst_248 = arith.constant 1.000000e+00 : f32
    %585 = vector.broadcast %cst_248 : f32 to vector<8x32xf32>
    %586 = arith.addf %585, %584 : vector<8x32xf32>
    %587 = arith.divf %585, %586 : vector<8x32xf32>
    %588 = arith.mulf %581, %575 : vector<8x32xf32>
    %589 = arith.addf %571, %588 : vector<8x32xf32>
    %590 = math.tanh %589 : vector<8x32xf32>
    %cst_249 = arith.constant 1.000000e+00 : f32
    %591 = vector.broadcast %cst_249 : f32 to vector<8x32xf32>
    %592 = arith.subf %591, %587 : vector<8x32xf32>
    %593 = arith.mulf %592, %590 : vector<8x32xf32>
    %594 = arith.mulf %587, %561 : vector<8x32xf32>
    %595 = arith.addf %593, %594 : vector<8x32xf32>
    %596 = arith.index_cast %565 : i32 to index
    %c0_250 = arith.constant 0 : index
    %597 = vector.load %arg33[%596, %c0_250] : memref<64x32xf32, #tpu.memory_space<vmem>>, vector<8x32xf32>
    tpu.vector_store %arg33[%596, %c0_250], %595 {strides = array<i32>} : memref<64x32xf32, #tpu.memory_space<vmem>>, vector<8x32xf32>,
    %c7_i32_251 = arith.constant 7 : i32
    %c8_i32_252 = arith.constant 8 : i32
    %598 = arith.muli %c7_i32_251, %c8_i32_252 : i32
    %599 = tpu.assume_multiple %598, 8 : i32
    %600 = arith.index_cast %599 : i32 to index
    %c0_253 = arith.constant 0 : index
    %601 = vector.load %arg30[%600, %c0_253] : memref<64x32xf32, #tpu.memory_space<vmem>>, vector<8x32xf32>
    %602 = arith.index_cast %599 : i32 to index
    %c0_254 = arith.constant 0 : index
    %603 = vector.load %arg31[%602, %c0_254] : memref<64x32xf32, #tpu.memory_space<vmem>>, vector<8x32xf32>
    %604 = arith.index_cast %599 : i32 to index
    %c0_255 = arith.constant 0 : index
    %605 = vector.load %arg32[%604, %c0_255] : memref<64x32xf32, #tpu.memory_space<vmem>>, vector<8x32xf32>
    %cst_256 = arith.constant dense<0.000000e+00> : vector<8x32xf32>
    %606 = tpu.matmul %595, %352, %cst_256 {dimension_numbers = #tpu.dot_dimension_numbers<[1], [0], [0], [1], [0, 0, 1, 1], [], []>} : vector<8x32xf32>, vector<32x32xf32>, vector<8x32xf32> -> vector<8x32xf32>
    %cst_257 = arith.constant dense<0.000000e+00> : vector<8x32xf32>
    %607 = tpu.matmul %595, %353, %cst_257 {dimension_numbers = #tpu.dot_dimension_numbers<[1], [0], [0], [1], [0, 0, 1, 1], [], []>} : vector<8x32xf32>, vector<32x32xf32>, vector<8x32xf32> -> vector<8x32xf32>
    %cst_258 = arith.constant dense<0.000000e+00> : vector<8x32xf32>
    %608 = tpu.matmul %595, %354, %cst_258 {dimension_numbers = #tpu.dot_dimension_numbers<[1], [0], [0], [1], [0, 0, 1, 1], [], []>} : vector<8x32xf32>, vector<32x32xf32>, vector<8x32xf32> -> vector<8x32xf32>
    %609 = arith.addf %608, %357 : vector<8x32xf32>
    %610 = arith.addf %601, %606 : vector<8x32xf32>
    %611 = arith.negf %610 : vector<8x32xf32>
    %612 = math.exp %611 : vector<8x32xf32>
    %cst_259 = arith.constant 1.000000e+00 : f32
    %613 = vector.broadcast %cst_259 : f32 to vector<8x32xf32>
    %614 = arith.addf %613, %612 : vector<8x32xf32>
    %615 = arith.divf %613, %614 : vector<8x32xf32>
    %616 = arith.addf %603, %607 : vector<8x32xf32>
    %617 = arith.negf %616 : vector<8x32xf32>
    %618 = math.exp %617 : vector<8x32xf32>
    %cst_260 = arith.constant 1.000000e+00 : f32
    %619 = vector.broadcast %cst_260 : f32 to vector<8x32xf32>
    %620 = arith.addf %619, %618 : vector<8x32xf32>
    %621 = arith.divf %619, %620 : vector<8x32xf32>
    %622 = arith.mulf %615, %609 : vector<8x32xf32>
    %623 = arith.addf %605, %622 : vector<8x32xf32>
    %624 = math.tanh %623 : vector<8x32xf32>
    %cst_261 = arith.constant 1.000000e+00 : f32
    %625 = vector.broadcast %cst_261 : f32 to vector<8x32xf32>
    %626 = arith.subf %625, %621 : vector<8x32xf32>
    %627 = arith.mulf %626, %624 : vector<8x32xf32>
    %628 = arith.mulf %621, %595 : vector<8x32xf32>
    %629 = arith.addf %627, %628 : vector<8x32xf32>
    %630 = arith.index_cast %599 : i32 to index
    %c0_262 = arith.constant 0 : index
    %631 = vector.load %arg33[%630, %c0_262] : memref<64x32xf32, #tpu.memory_space<vmem>>, vector<8x32xf32>
    tpu.vector_store %arg33[%630, %c0_262], %629 {strides = array<i32>} : memref<64x32xf32, #tpu.memory_space<vmem>>, vector<8x32xf32>,
    %c8_i32_263 = arith.constant 8 : i32
    %c1_264 = arith.constant 1 : index
    %c0_265 = arith.constant 0 : index
    %c0_266 = arith.constant 0 : index
    %632 = vector.load %arg29[%c1_264, %c0_265, %c0_266] : memref<2x8x32xf32, #tpu.memory_space<vmem>>, vector<1x8x32xf32>
    %633 = vector.shape_cast %632 : vector<1x8x32xf32> to vector<8x32xf32>
    %634 = vector.shape_cast %629 : vector<8x32xf32> to vector<1x8x32xf32>
    tpu.vector_store %arg29[%c1_264, %c0_265, %c0_266], %634 {strides = array<i32>} : memref<2x8x32xf32, #tpu.memory_space<vmem>>, vector<1x8x32xf32>,
    %c0_267 = arith.constant 0 : index
    %c0_268 = arith.constant 0 : index
    %635 = vector.load %arg33[%c0_267, %c0_268] : memref<64x32xf32, #tpu.memory_space<vmem>>, vector<64x32xf32>
    %c0_269 = arith.constant 0 : index
    %c0_270 = arith.constant 0 : index
    %636 = vector.load %arg26[%c0_269, %c0_270] : memref<32x32xf32, #tpu.memory_space<vmem>>, vector<32x32xf32>
    %cst_271 = arith.constant dense<0.000000e+00> : vector<64x32xf32>
    %637 = tpu.matmul %635, %636, %cst_271 {dimension_numbers = #tpu.dot_dimension_numbers<[1], [0], [0], [1], [0, 0, 1, 1], [], []>} : vector<64x32xf32>, vector<32x32xf32>, vector<64x32xf32> -> vector<64x32xf32>
    %c0_272 = arith.constant 0 : index
    %c0_273 = arith.constant 0 : index
    %638 = vector.load %arg27[%c0_272, %c0_273] : memref<1x32xf32, #tpu.memory_space<vmem>>, vector<1x32xf32>
    %639 = vector.broadcast %638 : vector<1x32xf32> to vector<64x32xf32>
    %640 = arith.addf %637, %639 : vector<64x32xf32>
    %c0_274 = arith.constant 0 : index
    %c0_275 = arith.constant 0 : index
    %641 = vector.load %arg28[%c0_274, %c0_275] : memref<64x32xf32, #tpu.memory_space<vmem>>, vector<64x32xf32>
    tpu.vector_store %arg28[%c0_274, %c0_275], %640 {strides = array<i32>} : memref<64x32xf32, #tpu.memory_space<vmem>>, vector<64x32xf32>,
    return
  }
}

</mosaic_0001>

<bundles_post_ra>
// kernel: tpu_custom_call.1
= control target key start
LH: loop header
LB: loop body
LE: loop exit
PB: predicated region body
PF: predicated region fallthrough
CT: control target
= control target key end

     0   :  { %s7568_s6 = smov 1   ;;  %s7569_s10 = smov 2   ;;  %s8610_s0 = inlined_call_operand.smem [shape: u32[30], index: -1, kind: input, shape index: {}] }
   0x1   :  { %s7626_s5 = sld [smem:[%s8610_s0]]   ;;  %s7570_s14 = smov 3  }
   0x2   :  { %s7631_s9 = sld [smem:[%s8610_s0 + %s7568_s6]]   ;;  %s7571_s18 = smov 4  }
   0x3   :  { %s7636_s13 = sld [smem:[%s8610_s0 + %s7569_s10]]   ;;  %s7572_s22 = smov 5  }
   0x4   :  { %s7641_s17 = sld [smem:[%s8610_s0 + %s7570_s14]]   ;;  %s7573_s26 = smov 6  }
   0x5   :  { %s7646_s21 = sld [smem:[%s8610_s0 + %s7571_s18]]   ;;  %s7574_s30 = smov 7  }
   0x6   :  { %s7651_s25 = sld [smem:[%s8610_s0 + %s7572_s22]]   ;;  %s7575_s4 = smov 8  }
   0x7   :  { %8617 = sst [smem:[#allocation40_spill]] %s7626_s5  ;;  %s7576_s10 = smov 9  }
   0x8   :  { %s7656_s29 = sld [smem:[%s8610_s0 + %s7573_s26]]   ;;  %s7577_s15 = smov 10  }
   0x9   :  { %s7661_s3 = sld [smem:[%s8610_s0 + %s7574_s30]]   ;;  %s7578_s20 = smov 11  }
   0xa   :  { %s7666_s8 = sld [smem:[%s8610_s0 + %s7575_s4]]   ;;  %s7579_s26 = smov 12  }
   0xb   :  { %s7671_s14 = sld [smem:[%s8610_s0 + %s7576_s10]]   ;;  %s7580_s1 = smov 13  }
   0xc   :  { %s7676_s19 = sld [smem:[%s8610_s0 + %s7577_s15]]   ;;  %s7581_s7 = smov 14  }
   0xd   :  { %s7681_s24 = sld [smem:[%s8610_s0 + %s7578_s20]]   ;;  %s7582_s15 = smov 15  }
   0xe   :  { %8618 = sst [smem:[#allocation41_spill]] %s7656_s29  ;;  %s7583_s22 = smov 16  }
   0xf   :  { %8619 = sst [smem:[#allocation42_spill]] %s7661_s3  ;;  %s7584_s28 = smov 17  }
  0x10   :  { %8620 = sst [smem:[#allocation43_spill]] %s7666_s8 }
  0x11   :  { %s7686_s30 = sld [smem:[%s8610_s0 + %s7579_s26]]  }
  0x12   :  { %s7691_s6 = sld [smem:[%s8610_s0 + %s7580_s1]]  }
  0x13   :  { %s7696_s12 = sld [smem:[%s8610_s0 + %s7581_s7]]   ;;  %s7585_s7 = smov 18  }
  0x14   :  { %s7701_s20 = sld [smem:[%s8610_s0 + %s7582_s15]]   ;;  %s7586_s15 = smov 19  }
  0x15   :  { %s7706_s27 = sld [smem:[%s8610_s0 + %s7583_s22]]   ;;  %s7587_s22 = smov 20  }
  0x16   :  { %s7711_s4 = sld [smem:[%s8610_s0 + %s7584_s28]]   ;;  %s7588_s28 = smov 21  }
  0x17   :  { %8621 = sst [smem:[#allocation44_spill]] %s7686_s30 }
  0x18   :  { %s7731_s30 = sld [smem:[%s8610_s0 + %s7588_s28]]   ;;  %s7592_s28 = smov 25  }
  0x19   :  { %8622 = sst [smem:[#allocation45_spill]] %s7696_s12 }
  0x1a   :  { %8623 = sst [smem:[#allocation46_spill]] %s7701_s20 }
  0x1b   :  { %8624 = sst [smem:[#allocation47_spill]] %s7706_s27 }
  0x1c   :  { %s7716_s12 = sld [smem:[%s8610_s0 + %s7585_s7]]   ;;  %s7589_s7 = smov 22  }
  0x1d   :  { %s7721_s20 = sld [smem:[%s8610_s0 + %s7586_s15]]   ;;  %s7590_s15 = smov 23  }
  0x1e   :  { %s7726_s27 = sld [smem:[%s8610_s0 + %s7587_s22]]   ;;  %s7591_s22 = smov 24  }
  0x1f   :  { %s7736_s8 = sld [smem:[%s8610_s0 + %s7589_s7]]   ;;  %s7593_s7 = smov 26  }
  0x20   :  { %s7741_s3 = sld [smem:[%s8610_s0 + %s7590_s15]]   ;;  %s7594_s15 = smov 27  }
  0x21   :  { %s7746_s29 = sld [smem:[%s8610_s0 + %s7591_s22]]   ;;  %s7595_s22 = smov 28  }
  0x22   :  { %s7751_s5 = sld [smem:[%s8610_s0 + %s7592_s28]]   ;;  %s7596_s28 = smov 29  }
  0x25   :  { %8625 = sst [smem:[#allocation48_spill]] %s7736_s8 }
  0x26   :  { %8626 = sst [smem:[#allocation49_spill]] %s7741_s3 }
  0x27   :  { %8627 = sst [smem:[#allocation50_spill]] %s7746_s29 }
  0x28   :  { %8628 = sst [smem:[#allocation51_spill]] %s7751_s5 }
  0x29   :  { %s7756_s8 = sld [smem:[%s8610_s0 + %s7593_s7]]  }
  0x2a   :  { %s7761_s3 = sld [smem:[%s8610_s0 + %s7594_s15]]  }
  0x2b   :  { %s7766_s29 = sld [smem:[%s8610_s0 + %s7595_s22]]  }
  0x2c   :  { %s7771_s5 = sld [smem:[%s8610_s0 + %s7596_s28]]  }
  0x2d   :  { %65 = vsyncpa [#allocation7], 0 }
  0x2e   :  { %66 = vsyncpa [#allocation10], 0 }
  0x2f   :  { %67 = vsyncpa [#allocation13], 0 }
  0x30   :  { %68 = vsyncpa [#allocation16], 0 }
  0x31   :  { %69 = vsyncpa [#allocation19], 0 }
  0x32   :  { %70 = vsyncpa [#allocation22], 0 }
  0x33   :  { %71 = vsyncpa [#allocation25], 0 }
  0x34   :  { %72 = vsyncpa [#allocation28], 0 }
  0x35   :  { %73 = vsyncpa [#allocation8], 0  ;;  %s7597_s7 = smov [#allocation9]   ;;  %s7198_s11 = scalar_lea.hbm %s7636_s13, 256 }
  0x36   :  { %s91_s10 = sshll.u32 %s7597_s7, 4  ;;  %p7199_p0 = scmp.ne.s32.totalorder %s7636_s13, %s7198_s11  ;;  %s92_s10 = int_to_ptr.vmem [resolvable:$true] %s91_s10 }
  0x37   :  { %p7202_p1 = scmp.lt.u32.totalorder %s7198_s11, %s7636_s13 }
  0x39   :  { %p7204_p2 = pnand %p7202_p1, %p7199_p0 }
  0x3b   :  { %7207 = shalt.err (!%p7204_p2)
}
  0x3c   :  { %s7208_s0 = scalar_lea.vmem %s92_s10, 256  ;;  %p7213_p4 = scmp.lt.s32.totalorder %s92_s10, %s92_s10 }
  0x3d   :  { %p7209_p3 = scmp.ne.s32.totalorder %s92_s10, %s7208_s0  ;;  %p7214_p5 = scmp.lt.s32.totalorder %s7208_s0, %s7208_s0 }
  0x3f   :  { %p7215_p6 = por %p7214_p5, %p7213_p4 }
  0x41   :  { %p7216_p7 = pnand %p7215_p6, %p7209_p3 }
  0x43   :  { %7219 = shalt.err (!%p7216_p7)
}
  0x44   :  { %s7598_s15 = smov 128   ;;  %s7599_s16 = smov 8  }
  0x45   :  { %97 = dma.hbm_to_vmem [thread:$0]  %s7636_s13, 256, %s92_s10, [#allocation10], %s7598_s15, %s7598_s15, %s7599_s16  }
  0x46   :  { %s7600_s18 = smov [#allocation12]   ;;  %s7601_s23 = smov [#allocation15]  }
  0x47   :  { %s115_s22 = sshll.u32 %s7600_s18, 4  ;;  %s145_s26 = sshll.u32 %s7601_s23, 4  ;;  %s116_s22 = int_to_ptr.vmem [resolvable:$true] %s115_s22  ;;  %s146_s26 = int_to_ptr.vmem [resolvable:$true] %s145_s26 }
  0x48   :  { %s7220_s28 = scalar_lea.hbm %s7646_s21, 256 }
  0x49   :  { %p7221_p8 = scmp.ne.s32.totalorder %s7646_s21, %s7220_s28  ;;  %p7224_p9 = scmp.lt.u32.totalorder %s7220_s28, %s7646_s21 }
  0x4b   :  { %p7226_p10 = pnand %p7224_p9, %p7221_p8 }
  0x4d   :  { %7229 = shalt.err (!%p7226_p10)
}
  0x4e   :  { %s7230_s1 = scalar_lea.vmem %s116_s22, 256  ;;  %p7235_p12 = scmp.lt.s32.totalorder %s116_s22, %s116_s22 }
  0x4f   :  { %p7231_p11 = scmp.ne.s32.totalorder %s116_s22, %s7230_s1  ;;  %p7236_p13 = scmp.lt.s32.totalorder %s7230_s1, %s7230_s1 }
  0x51   :  { %p7237_p0 = por %p7236_p13, %p7235_p12 }
  0x53   :  { %p7238_p1 = pnand %p7237_p0, %p7231_p11 }
  0x55   :  { %7241 = shalt.err (!%p7238_p1)
}
  0x56   :  { %121 = dma.hbm_to_vmem [thread:$0]  %s7646_s21, 256, %s116_s22, [#allocation13], %s7598_s15, %s7598_s15, %s7599_s16  }
  0x57   :  { %s7242_s13 = scalar_lea.hbm %s7671_s14, 512 }
  0x58   :  { %p7243_p2 = scmp.ne.s32.totalorder %s7671_s14, %s7242_s13  ;;  %p7246_p3 = scmp.lt.u32.totalorder %s7242_s13, %s7671_s14 }
  0x5a   :  { %p7248_p4 = pnand %p7246_p3, %p7243_p2 }
  0x5c   :  { %7251 = shalt.err (!%p7248_p4)
}
  0x5d   :  { %s7252_s2 = scalar_lea.vmem %s146_s26, 512  ;;  %p7257_p6 = scmp.lt.s32.totalorder %s146_s26, %s146_s26 }
  0x5e   :  { %p7253_p5 = scmp.ne.s32.totalorder %s146_s26, %s7252_s2  ;;  %p7258_p7 = scmp.lt.s32.totalorder %s7252_s2, %s7252_s2 }
  0x60   :  { %p7259_p8 = por %p7258_p7, %p7257_p6 }
  0x62   :  { %p7260_p9 = pnand %p7259_p8, %p7253_p5 }
  0x64   :  { %7263 = shalt.err (!%p7260_p9)
}
  0x65   :  { %151 = dma.hbm_to_vmem [thread:$0]  %s7671_s14, 512, %s146_s26, [#allocation16], %s7598_s15, %s7598_s15, %s7599_s16  }
  0x66   :  { %s7602_s21 = smov [#allocation18]   ;;  %s7603_s10 = smov [#allocation21]  }
  0x67   :  { %s169_s7 = sshll.u32 %s7602_s21, 4  ;;  %s199_s11 = sshll.u32 %s7603_s10, 4  ;;  %s170_s7 = int_to_ptr.vmem [resolvable:$true] %s169_s7  ;;  %s200_s11 = int_to_ptr.vmem [resolvable:$true] %s199_s11 }
  0x68   :  { %s7264_s0 = scalar_lea.hbm %s7681_s24, 512 }
  0x69   :  { %p7265_p10 = scmp.ne.s32.totalorder %s7681_s24, %s7264_s0  ;;  %p7268_p11 = scmp.lt.u32.totalorder %s7264_s0, %s7681_s24 }
  0x6b   :  { %p7270_p12 = pnand %p7268_p11, %p7265_p10 }
  0x6d   :  { %7273 = shalt.err (!%p7270_p12)
}
  0x6e   :  { %s7274_s18 = scalar_lea.vmem %s170_s7, 512  ;;  %p7279_p0 = scmp.lt.s32.totalorder %s170_s7, %s170_s7 }
  0x6f   :  { %p7275_p13 = scmp.ne.s32.totalorder %s170_s7, %s7274_s18  ;;  %p7280_p1 = scmp.lt.s32.totalorder %s7274_s18, %s7274_s18 }
  0x71   :  { %p7281_p2 = por %p7280_p1, %p7279_p0 }
  0x73   :  { %p7282_p3 = pnand %p7281_p2, %p7275_p13 }
  0x75   :  { %7285 = shalt.err (!%p7282_p3)
}
  0x76   :  { %175 = dma.hbm_to_vmem [thread:$0]  %s7681_s24, 512, %s170_s7, [#allocation19], %s7598_s15, %s7598_s15, %s7599_s16  }
  0x77   :  { %s7286_s14 = scalar_lea.hbm %s7711_s4, 512 }
  0x78   :  { %p7287_p4 = scmp.ne.s32.totalorder %s7711_s4, %s7286_s14  ;;  %p7290_p5 = scmp.lt.u32.totalorder %s7286_s14, %s7711_s4 }
  0x7a   :  { %p7292_p6 = pnand %p7290_p5, %p7287_p4 }
  0x7c   :  { %7295 = shalt.err (!%p7292_p6)
}
  0x7d   :  { %s7296_s22 = scalar_lea.vmem %s200_s11, 512  ;;  %p7301_p8 = scmp.lt.s32.totalorder %s200_s11, %s200_s11 }
  0x7e   :  { %p7297_p7 = scmp.ne.s32.totalorder %s200_s11, %s7296_s22  ;;  %p7302_p9 = scmp.lt.s32.totalorder %s7296_s22, %s7296_s22 }
  0x80   :  { %p7303_p10 = por %p7302_p9, %p7301_p8 }
  0x82   :  { %p7304_p11 = pnand %p7303_p10, %p7297_p7 }
  0x84   :  { %7307 = shalt.err (!%p7304_p11)
}
  0x85   :  { %205 = dma.hbm_to_vmem [thread:$0]  %s7711_s4, 512, %s200_s11, [#allocation22], %s7598_s15, %s7598_s15, %s7599_s16  }
  0x86   :  { %s7604_s24 = smov [#allocation24]   ;;  %s7605_s26 = smov [#allocation27]  }
  0x87   :  { %s223_s23 = sshll.u32 %s7604_s24, 4  ;;  %s247_s28 = sshll.u32 %s7605_s26, 4  ;;  %s224_s23 = int_to_ptr.vmem [resolvable:$true] %s223_s23  ;;  %s248_s28 = int_to_ptr.vmem [resolvable:$true] %s247_s28 }
  0x88   :  { %s7308_s1 = scalar_lea.hbm %s7721_s20, 512 }
  0x89   :  { %p7309_p12 = scmp.ne.s32.totalorder %s7721_s20, %s7308_s1  ;;  %p7312_p13 = scmp.lt.u32.totalorder %s7308_s1, %s7721_s20 }
  0x8b   :  { %p7314_p0 = pnand %p7312_p13, %p7309_p12 }
  0x8d   :  { %7317 = shalt.err (!%p7314_p0)
}
  0x8e   :  { %s7318_s13 = scalar_lea.vmem %s224_s23, 512  ;;  %p7323_p2 = scmp.lt.s32.totalorder %s224_s23, %s224_s23 }
  0x8f   :  { %p7319_p1 = scmp.ne.s32.totalorder %s224_s23, %s7318_s13  ;;  %p7324_p3 = scmp.lt.s32.totalorder %s7318_s13, %s7318_s13 }
  0x91   :  { %p7325_p4 = por %p7324_p3, %p7323_p2 }
  0x93   :  { %p7326_p5 = pnand %p7325_p4, %p7319_p1 }
  0x95   :  { %7329 = shalt.err (!%p7326_p5)
}
  0x96   :  { %229 = dma.hbm_to_vmem [thread:$0]  %s7721_s20, 512, %s224_s23, [#allocation25], %s7598_s15, %s7598_s15, %s7599_s16  }
  0x97   :  { %s7330_s4 = scalar_lea.hbm %s7731_s30, 512 }
  0x98   :  { %p7331_p6 = scmp.ne.s32.totalorder %s7731_s30, %s7330_s4  ;;  %p7334_p7 = scmp.lt.u32.totalorder %s7330_s4, %s7731_s30 }
  0x9a   :  { %p7336_p8 = pnand %p7334_p7, %p7331_p6 }
  0x9c   :  { %7339 = shalt.err (!%p7336_p8)
}
  0x9d   :  { %s7340_s2 = scalar_lea.vmem %s248_s28, 512  ;;  %p7345_p10 = scmp.lt.s32.totalorder %s248_s28, %s248_s28 }
  0x9e   :  { %p7341_p9 = scmp.ne.s32.totalorder %s248_s28, %s7340_s2  ;;  %p7346_p11 = scmp.lt.s32.totalorder %s7340_s2, %s7340_s2 }
  0xa0   :  { %p7347_p12 = por %p7346_p11, %p7345_p10 }
  0xa2   :  { %p7348_p13 = pnand %p7347_p12, %p7341_p9 }
  0xa4   :  { %7351 = shalt.err (!%p7348_p13)
}
  0xa5   :  { %253 = dma.hbm_to_vmem [thread:$0]  %s7731_s30, 512, %s248_s28, [#allocation28], %s7598_s15, %s7598_s15, %s7599_s16  }
  0xa6   :  { %s7606_s20 = smov [#allocation6]   ;;  %s7607_s7 = smov [#allocation11]  }
  0xa7   :  { %s82_s21 = sshll.u32 %s7606_s20, 4  ;;  %s103_s10 = sshll.u32 %s7607_s7, 4  ;;  %s83_s21 = int_to_ptr.vmem [resolvable:$true] %s82_s21  ;;  %s104_s10 = int_to_ptr.vmem [resolvable:$true] %s103_s10 }
  0xa8   :  { %s7352_s11 = scalar_lea.hbm %s7631_s9, 128 }
  0xa9   :  { %p7353_p0 = scmp.ne.s32.totalorder %s7631_s9, %s7352_s11  ;;  %p7356_p1 = scmp.lt.u32.totalorder %s7352_s11, %s7631_s9 }
  0xab   :  { %p7358_p2 = pnand %p7356_p1, %p7353_p0 }
  0xad   :  { %7361 = shalt.err (!%p7358_p2)
}
  0xae   :  { %s7362_s0 = scalar_lea.vmem %s83_s21, 128  ;;  %p7367_p4 = scmp.lt.s32.totalorder %s83_s21, %s83_s21 }
  0xaf   :  { %p7363_p3 = scmp.ne.s32.totalorder %s83_s21, %s7362_s0  ;;  %p7368_p5 = scmp.lt.s32.totalorder %s7362_s0, %s7362_s0 }
  0xb1   :  { %p7369_p6 = por %p7368_p5, %p7367_p4 }
  0xb3   :  { %p7370_p7 = pnand %p7369_p6, %p7363_p3 }
  0xb5   :  { %7373 = shalt.err (!%p7370_p7)
}
  0xb6   :  { %85 = dma.hbm_to_vmem [thread:$0]  %s7631_s9, 128, %s83_s21, [#allocation7]  }
  0xb7   :  { %s7374_s30 = scalar_lea.hbm %s7641_s17, 256 }
  0xb8   :  { %p7375_p8 = scmp.ne.s32.totalorder %s7641_s17, %s7374_s30  ;;  %p7378_p9 = scmp.lt.u32.totalorder %s7374_s30, %s7641_s17 }
  0xba   :  { %p7380_p10 = pnand %p7378_p9, %p7375_p8 }
  0xbc   :  { %7383 = shalt.err (!%p7380_p10)
}
  0xbd   :  { %s7384_s18 = scalar_lea.vmem %s104_s10, 256  ;;  %p7389_p12 = scmp.lt.s32.totalorder %s104_s10, %s104_s10 }
  0xbe   :  { %p7385_p11 = scmp.ne.s32.totalorder %s104_s10, %s7384_s18  ;;  %p7390_p13 = scmp.lt.s32.totalorder %s7384_s18, %s7384_s18 }
  0xc0   :  { %p7391_p0 = por %p7390_p13, %p7389_p12 }
  0xc2   :  { %p7392_p1 = pnand %p7391_p0, %p7385_p11 }
  0xc4   :  { %7395 = shalt.err (!%p7392_p1)
}
  0xc5   :  { %109 = dma.hbm_to_vmem [thread:$0]  %s7641_s17, 256, %s104_s10, [#allocation10], %s7598_s15, %s7598_s15, %s7599_s16  }
  0xc6   :  { %s7608_s9 = smov [#allocation14]   ;;  %s7609_s22 = smov [#allocation17]  }
  0xc7   :  { %s127_s14 = sshll.u32 %s7608_s9, 4  ;;  %s157_s24 = sshll.u32 %s7609_s22, 4  ;;  %s128_s14 = int_to_ptr.vmem [resolvable:$true] %s127_s14  ;;  %s158_s24 = int_to_ptr.vmem [resolvable:$true] %s157_s24 }
  0xc8   :  { %s7396_s23 = scalar_lea.hbm %s7651_s25, 256 }
  0xc9   :  { %p7397_p2 = scmp.ne.s32.totalorder %s7651_s25, %s7396_s23  ;;  %p7400_p3 = scmp.lt.u32.totalorder %s7396_s23, %s7651_s25 }
  0xcb   :  { %p7402_p4 = pnand %p7400_p3, %p7397_p2 }
  0xcd   :  { %7405 = shalt.err (!%p7402_p4)
}
  0xce   :  { %s7406_s26 = scalar_lea.vmem %s128_s14, 256  ;;  %p7411_p6 = scmp.lt.s32.totalorder %s128_s14, %s128_s14 }
  0xcf   :  { %p7407_p5 = scmp.ne.s32.totalorder %s128_s14, %s7406_s26  ;;  %p7412_p7 = scmp.lt.s32.totalorder %s7406_s26, %s7406_s26 }
  0xd1   :  { %p7413_p8 = por %p7412_p7, %p7411_p6 }
  0xd3   :  { %p7414_p9 = pnand %p7413_p8, %p7407_p5 }
  0xd5   :  { %7417 = shalt.err (!%p7414_p9)
}
  0xd6   :  { %133 = dma.hbm_to_vmem [thread:$0]  %s7651_s25, 256, %s128_s14, [#allocation13], %s7598_s15, %s7598_s15, %s7599_s16  }
  0xd7   :  { %s7418_s17 = scalar_lea.hbm %s7676_s19, 512 }
  0xd8   :  { %p7419_p10 = scmp.ne.s32.totalorder %s7676_s19, %s7418_s17  ;;  %p7422_p11 = scmp.lt.u32.totalorder %s7418_s17, %s7676_s19 }
  0xda   :  { %p7424_p12 = pnand %p7422_p11, %p7419_p10 }
  0xdc   :  { %7427 = shalt.err (!%p7424_p12)
}
  0xdd   :  { %s7428_s28 = scalar_lea.vmem %s158_s24, 512  ;;  %p7433_p0 = scmp.lt.s32.totalorder %s158_s24, %s158_s24 }
  0xde   :  { %p7429_p13 = scmp.ne.s32.totalorder %s158_s24, %s7428_s28  ;;  %p7434_p1 = scmp.lt.s32.totalorder %s7428_s28, %s7428_s28 }
  0xe0   :  { %p7435_p2 = por %p7434_p1, %p7433_p0 }
  0xe2   :  { %p7436_p3 = pnand %p7435_p2, %p7429_p13 }
  0xe4   :  { %7439 = shalt.err (!%p7436_p3)
}
  0xe5   :  { %163 = dma.hbm_to_vmem [thread:$0]  %s7676_s19, 512, %s158_s24, [#allocation16], %s7598_s15, %s7598_s15, %s7599_s16  }
  0xe6   :  { %s7610_s25 = smov [#allocation20]   ;;  %s7611_s13 = smov [#allocation23]  }
  0xe7   :  { %s184_s1 = sshll.u32 %s7610_s25, 4  ;;  %s211_s4 = sshll.u32 %s7611_s13, 4  ;;  %s185_s1 = int_to_ptr.vmem [resolvable:$true] %s184_s1  ;;  %s212_s4 = int_to_ptr.vmem [resolvable:$true] %s211_s4 }
  0xe8   :  { %s7440_s2 = scalar_lea.hbm %s7691_s6, 16 }
  0xe9   :  { %p7441_p4 = scmp.ne.s32.totalorder %s7691_s6, %s7440_s2  ;;  %p7444_p5 = scmp.lt.u32.totalorder %s7440_s2, %s7691_s6 }
  0xeb   :  { %p7446_p6 = pnand %p7444_p5, %p7441_p4 }
  0xed   :  { %7449 = shalt.err (!%p7446_p6)
}
  0xee   :  { %s7450_s20 = scalar_lea.vmem %s185_s1, 16  ;;  %s7454_s21 = scalar_lea.vmem %s185_s1, 32 }
  0xef   :  { %p7451_p7 = scmp.ne.s32.totalorder %s185_s1, %s7450_s20  ;;  %p7455_p8 = scmp.lt.s32.totalorder %s185_s1, %s185_s1 }
  0xf0   :  { %p7456_p9 = scmp.lt.s32.totalorder %s7454_s21, %s7450_s20 }
  0xf2   :  { %p7457_p10 = por %p7456_p9, %p7455_p8 }
  0xf4   :  { %p7458_p11 = pnand %p7457_p10, %p7451_p7 }
  0xf6   :  { %7461 = shalt.err (!%p7458_p11)
}
  0xf7   :  { %187 = dma.hbm_to_vmem [thread:$0]  %s7691_s6, 16, %s185_s1, [#allocation19]  }
  0xf8   :  { %s7462_s19 = scalar_lea.hbm %s7716_s12, 512 }
  0xf9   :  { %p7463_p12 = scmp.ne.s32.totalorder %s7716_s12, %s7462_s19  ;;  %p7466_p13 = scmp.lt.u32.totalorder %s7462_s19, %s7716_s12 }
  0xfb   :  { %p7468_p0 = pnand %p7466_p13, %p7463_p12 }
  0xfd   :  { %7471 = shalt.err (!%p7468_p0)
}
  0xfe   :  { %s7472_s7 = scalar_lea.vmem %s212_s4, 512  ;;  %p7477_p2 = scmp.lt.s32.totalorder %s212_s4, %s212_s4 }
  0xff   :  { %p7473_p1 = scmp.ne.s32.totalorder %s212_s4, %s7472_s7  ;;  %p7478_p3 = scmp.lt.s32.totalorder %s7472_s7, %s7472_s7 }
 0x101   :  { %p7479_p4 = por %p7478_p3, %p7477_p2 }
 0x103   :  { %p7480_p5 = pnand %p7479_p4, %p7473_p1 }
 0x105   :  { %7483 = shalt.err (!%p7480_p5)
}
 0x106   :  { %217 = dma.hbm_to_vmem [thread:$0]  %s7716_s12, 512, %s212_s4, [#allocation22], %s7598_s15, %s7598_s15, %s7599_s16  }
 0x107   :  { %s7612_s6 = smov [#allocation26]   ;;  %s7613_s11 = smov [#allocation29]  }
 0x108   :  { %s235_s10 = sshll.u32 %s7612_s6, 4  ;;  %s260_s0 = sshll.u32 %s7613_s11, 4  ;;  %s236_s10 = int_to_ptr.vmem [resolvable:$true] %s235_s10  ;;  %s261_s0 = int_to_ptr.vmem [resolvable:$true] %s260_s0 }
 0x109   :  { %s7484_s30 = scalar_lea.hbm %s7726_s27, 512 }
 0x10a   :  { %p7485_p6 = scmp.ne.s32.totalorder %s7726_s27, %s7484_s30  ;;  %p7488_p7 = scmp.lt.u32.totalorder %s7484_s30, %s7726_s27 }
 0x10c   :  { %p7490_p8 = pnand %p7488_p7, %p7485_p6 }
 0x10e   :  { %7493 = shalt.err (!%p7490_p8)
}
 0x10f   :  { %s7494_s18 = scalar_lea.vmem %s236_s10, 512  ;;  %p7499_p10 = scmp.lt.s32.totalorder %s236_s10, %s236_s10 }
 0x110   :  { %p7495_p9 = scmp.ne.s32.totalorder %s236_s10, %s7494_s18  ;;  %p7500_p11 = scmp.lt.s32.totalorder %s7494_s18, %s7494_s18 }
 0x112   :  { %p7501_p12 = por %p7500_p11, %p7499_p10 }
 0x114   :  { %p7502_p13 = pnand %p7501_p12, %p7495_p9 }
 0x116   :  { %7505 = shalt.err (!%p7502_p13)
}
 0x117   :  { %s8629_s12 = sld [smem:[#allocation48_spill]] }
 0x118   :  { %241 = dma.hbm_to_vmem [thread:$0]  %s7726_s27, 512, %s236_s10, [#allocation25], %s7598_s15, %s7598_s15, %s7599_s16  }
 0x11d   :  { %s7506_s9 = scalar_lea.hbm %s8629_s12, 16 }
 0x11e   :  { %p7507_p0 = scmp.ne.s32.totalorder %s8629_s12, %s7506_s9  ;;  %p7510_p1 = scmp.lt.u32.totalorder %s7506_s9, %s8629_s12 }
 0x120   :  { %p7512_p2 = pnand %p7510_p1, %p7507_p0 }
 0x122   :  { %7515 = shalt.err (!%p7512_p2)
}
 0x123   :  { %s7516_s14 = scalar_lea.vmem %s261_s0, 16  ;;  %s7520_s22 = scalar_lea.vmem %s261_s0, 32 }
 0x124   :  { %p7517_p3 = scmp.ne.s32.totalorder %s261_s0, %s7516_s14  ;;  %p7521_p4 = scmp.lt.s32.totalorder %s261_s0, %s261_s0 }
 0x125   :  { %p7522_p5 = scmp.lt.s32.totalorder %s7520_s22, %s7516_s14 }
 0x127   :  { %p7523_p6 = por %p7522_p5, %p7521_p4 }
 0x129   :  { %p7524_p7 = pnand %p7523_p6, %p7517_p3 }
 0x12b   :  { %7527 = shalt.err (!%p7524_p7)
}
 0x12c   :  { %263 = dma.hbm_to_vmem [thread:$0]  %s8629_s12, 16, %s261_s0, [#allocation28]  }
 0x12d   :  { %7550 = dma.done.wait [#allocation7], 128  }
 0x12e   :  { %7551 = vsyncadd [#allocation7], 4294967168 }
 0x12f   :  { %7552 = dma.done.wait [#allocation10], 512  }
 0x130   :  { %7553 = vsyncadd [#allocation10], 4294966784 }
 0x131   :  { %7554 = dma.done.wait [#allocation13], 512  }
 0x132   :  { %7555 = vsyncadd [#allocation13], 4294966784 }
 0x133   :  { %7556 = dma.done.wait [#allocation16], 1024  }
 0x134   :  { %7557 = vsyncadd [#allocation16], 4294966272 }
 0x135   :  { %7558 = dma.done.wait [#allocation19], 528  }
 0x136   :  { %7559 = vsyncadd [#allocation19], 4294966768 }
 0x137   :  { %7560 = dma.done.wait [#allocation22], 1024  }
 0x138   :  { %7561 = vsyncadd [#allocation22], 4294966272 }
 0x139   :  { %7562 = dma.done.wait [#allocation25], 1024  }
 0x13a   :  { %7563 = vsyncadd [#allocation25], 4294966272 }
 0x13b   :  { %7564 = dma.done.wait [#allocation28], 528  }
 0x13c   :  { %7565 = vsyncadd [#allocation28], 4294966768  ;;  %s8630_s27 = sld [smem:[#allocation40_spill]]  ;;  %s8631_s24 = sld [smem:[#allocation41_spill]]  ;;  %vm336_vm0 = vcmask 130048   ;;  %v327_v0 = vld [vmem:[#allocation11] sm:$0xff] }
 0x13d   :  { %v328_v1 = vld [vmem:[#allocation11 + $0x8] sm:$0xff]  ;;  %v475_v2 = vld [vmem:[#allocation12] sm:$0xff]  ;;  %v476_v4 = vld [vmem:[#allocation12 + $0x8] sm:$0xff]  ;;  %v7614_v13 = vmov 0.0|0.0   ;;  %s8632_s23 = sld [smem:[#allocation42_spill]]  ;;  %vm7615_vm1 = vmmov 0  }
 0x13e   :  { %v6636_v3 = vpack.c.bf16 %v328_v1, %v327_v0  ;;  %v6640_v6 = vpack.c.bf16 %v476_v4, %v475_v2  ;;  %v597_v18 = vld [vmem:[#allocation14] sm:$0xff]  ;;  %v598_v19 = vld [vmem:[#allocation14 + $0x8] sm:$0xff]  ;;  %v7616_v26 = vmov 0.0   ;;  %vm466_vm2 = vcmask 261120   ;;  %s8633_s26 = sld [smem:[#allocation43_spill]]  ;;  %v945_v32 = vld [vmem:[#allocation15] sm:$0xff] }
 0x13f   :  { %v6644_v21 = vpack.c.bf16 %v598_v19, %v597_v18  ;;  %v7921_v27 = vld [vmem:[#allocation6] sm:$0xff]  ;;  %v946_v33 = vld [vmem:[#allocation15 + $0x8] sm:$0xff]  ;;  %v947_v35 = vld [vmem:[#allocation15 + $0x10] sm:$0xff]  ;;  %s8634_s17 = sld [smem:[#allocation44_spill]]  ;;  %s8635_s28 = sld [smem:[#allocation45_spill]] }
 0x140   :  { %6637 = vmatprep.subr.bf16.mxu0 %v6636_v3  ;;  %6986 = vmatprep.subr.bf16.mxu1 %v6640_v6  ;;  %v7939_v34 = vpack.c.bf16 %v946_v33, %v945_v32  ;;  %v948_v36 = vld [vmem:[#allocation15 + $0x18] sm:$0xff]  ;;  %v953_v40 = vld [vmem:[#allocation18] sm:$0xff]  ;;  %v954_v41 = vld [vmem:[#allocation18 + $0x8] sm:$0xff]  ;;  %s8636_s25 = sld [smem:[#allocation46_spill]]  ;;  %s8637_s1 = sld [smem:[#allocation47_spill]] }
 0x141   :  { %6639 = vmatpush3.bf16.msra.mxu0 %v6636_v3  ;;  %6987 = vmatpush3.bf16.msra.mxu1 %v6640_v6  ;;  %v7949_v37 = vpack.c.bf16 %v948_v36, %v947_v35  ;;  %v7962_v43 = vld [vmem:[#allocation9] sm:$0xff]  ;;  %v7967_v46 = vpack.c.bf16 %v954_v41, %v953_v40  ;;  %v955_v47 = vld [vmem:[#allocation18 + $0x10] sm:$0xff]  ;;  %v956_v48 = vld [vmem:[#allocation18 + $0x18] sm:$0xff]  ;;  %s8638_s13 = sld [smem:[#allocation49_spill]]  ;;  %s8639_s4 = sld [smem:[#allocation50_spill]] }
 0x142   :  { %v7870_v5 = vld [vmem:[%s8630_s27] sm:$0xff]  ;;  %v721_v9 = vld [vmem:[%s8631_s24 + $0x8] sm:$0xff]  ;;  %6641 = vmatprep.subr.bf16.mxu0 %v6640_v6  ;;  %6648 = vmatprep.subr.bf16.mxu1 %v7614_v13  ;;  %v7889_v14 = vld [vmem:[%s8630_s27 + $0x10] sm:$0xff]  ;;  %v7977_v50 = vpack.c.bf16 %v956_v48, %v955_v47  ;;  %s8640_s2 = sld [smem:[#allocation51_spill]] }
 0x143   :  { %5951 = vmatprep.mubr.msk.f32.mxu0 %vm336_vm0, %v7870_v5  ;;  %v7875_v7 = vld [vmem:[%s8630_s27 + $0x20] sm:$0xff]  ;;  %v7882_v10 = vld [vmem:[%s8630_s27 + $0x8] sm:$0xff]  ;;  %v722_v15 = vld [vmem:[%s8631_s24 + $0x10] sm:$0xff] }
 0x144   :  { %v720_v8 = vld [vmem:[%s8631_s24] sm:$0xff]  ;;  %5973 = vmatprep.mubr.msk.f32.mxu1 %vm336_vm0, %v7875_v7  ;;  %v7885_v11 = vld [vmem:[%s8630_s27 + $0x28] sm:$0xff]  ;;  %v723_v16 = vld [vmem:[%s8631_s24 + $0x18] sm:$0xff]  ;;  %5952 = vmatmul.mubr.msk.f32.vlgmr.msra.gmra.mrb[0].mxu0 %vm336_vm0, %v7882_v10 }
 0x145   :  { %v6649_v12 = vpack.c.bf16 %v721_v9, %v720_v8  ;;  %v7896_v17 = vld [vmem:[%s8630_s27 + $0x30] sm:$0xff]  ;;  %6643 = vmatpush3.bf16.msra.mxu0 %v6640_v6  ;;  %5974 = vmatmul.mubr.msk.f32.vlgmr.msra.gmra.mrb[0].mxu1 %vm336_vm0, %v7885_v11  ;;  %v7901_v20 = vld [vmem:[%s8630_s27 + $0x18] sm:$0xff]  ;;  %v6652_v23 = vpack.c.bf16 %v723_v16, %v722_v15  ;;  %v797_v24 = vld [vmem:[%s8632_s23] sm:$0xff] }
 0x146   :  { %5954 = vmatprep.mubr.msk.f32.mxu0 %vm336_vm0, %v7889_v14  ;;  %v7906_v22 = vld [vmem:[%s8630_s27 + $0x38] sm:$0xff]  ;;  %5976 = vmatprep.mubr.msk.f32.mxu1 %vm336_vm0, %v7896_v17  ;;  %v798_v25 = vld [vmem:[%s8632_s23 + $0x8] sm:$0xff]  ;;  %v799_v29 = vld [vmem:[%s8632_s23 + $0x10] sm:$0xff] }
 0x147   :  { %6650 = vmatpush3.bf16.msra.mxu1 %v6649_v12  ;;  %6645 = vmatprep.subr.bf16.mxu0 %v6644_v21  ;;  %v6655_v28 = vpack.c.bf16 %v798_v25, %v797_v24  ;;  %v800_v30 = vld [vmem:[%s8632_s23 + $0x18] sm:$0xff]  ;;  %v871_v38 = vld [vmem:[%s8633_s26] sm:$0xff]  ;;  %v872_v39 = vld [vmem:[%s8633_s26 + $0x8] sm:$0xff] }
 0x148   :  { %6651 = vmatprep.subr.bf16.mxu1 %v7614_v13  ;;  %5955 = vmatmul.mubr.msk.f32.gmra.mrb[2].mxu0 %vm336_vm0, %v7901_v20  ;;  %v6658_v31 = vpack.c.bf16 %v800_v30, %v799_v29  ;;  %v6661_v42 = vpack.c.bf16 %v872_v39, %v871_v38  ;;  %v873_v44 = vld [vmem:[%s8633_s26 + $0x10] sm:$0xff]  ;;  %v874_v45 = vld [vmem:[%s8633_s26 + $0x18] sm:$0xff]  ;;  %v949_v51 = vld [vmem:[#allocation17] sm:$0xff] }
 0x149   :  { %5977 = vmatmul.mubr.msk.f32.gmra.mrb[2].mxu1 %vm336_vm0, %v7906_v22  ;;  %5957 = vmatprep.mubr.msk.f32.mxu0 %vm336_vm0, %v7875_v7  ;;  %v6664_v49 = vpack.c.bf16 %v874_v45, %v873_v44  ;;  %v950_v52 = vld [vmem:[#allocation17 + $0x8] sm:$0xff]  ;;  %v951_v54 = vld [vmem:[#allocation17 + $0x10] sm:$0xff]  ;;  %v952_v55 = vld [vmem:[#allocation17 + $0x18] sm:$0xff] }
 0x14a   :  { %6003 = vmatprep.mubr.msk.f32.mxu1 %vm7615_vm1, %v7616_v26  ;;  %v7993_v53 = vpack.c.bf16 %v950_v52, %v949_v51  ;;  %v8005_v56 = vpack.c.bf16 %v952_v55, %v951_v54  ;;  %v5466_v57 = vld [vmem:[%s8634_s17] ss:$0 sm:$0xff]  ;;  %v5475_v58 = vld [vmem:[#allocation20] ss:$0 sm:$0xff] }
 0x14b   :  { %6653 = vmatpush3.bf16.msra.mxu1 %v6652_v23  ;;  %v5484_v35 = vld [vmem:[%s8635_s28] ss:$0 sm:$0xff] }
 0x14c   :  { %6654 = vmatprep.subr.bf16.mxu1 %v7614_v13  ;;  %5958 = vmatmul.mubr.msk.f32.gmra.mrb[4].mxu0 %vm336_vm0, %v7885_v11 }
 0x14d   :  { %5960 = vmatprep.mubr.msk.f32.mxu0 %vm336_vm0, %v7896_v17 }
 0x14e   :  { %6004 = vmatmul.mubr.msk.f32.vlgmr.msra.gmra.mrb[4].mxu1 %vm466_vm2, %v7921_v27 }
 0x14f   :  { %6656 = vmatpush3.bf16.msra.mxu1 %v6655_v28  ;;  %6014 = vmatprep.mubr.msk.f32.mxu1 %vm7615_vm1, %v7616_v26 }
 0x150   :  { %6657 = vmatprep.subr.bf16.mxu1 %v7614_v13  ;;  %5961 = vmatmul.mubr.msk.f32.gmra.mrb[6].mxu0 %vm336_vm0, %v7906_v22 }
 0x151   :  { %5967 = vmatprep.mubr.msk.f32.mxu0 %vm336_vm0, %v7870_v5 }
 0x153   :  { %6659 = vmatpush3.bf16.msra.mxu1 %v6658_v31 }
 0x154   :  { %6666 = vmatprep.subr.bf16.mxu1 %v7614_v13  ;;  %5968 = vmatmul.mubr.msk.f32.vlgmr.msra.gmra.mrb[8].mxu0 %vm336_vm0, %v7882_v10 }
 0x155   :  { %6647 = vmatpush3.bf16.msra.mxu0 %v6644_v21  ;;  %5970 = vmatprep.mubr.msk.f32.mxu0 %vm336_vm0, %v7889_v14 }
 0x156   :  { %6015 = vmatmul.mubr.msk.f32.vlgmr.msra.gmra.mrb[6].mxu1 %vm466_vm2, %v7921_v27  ;;  %6660 = vmatprep.subr.bf16.mxu0 %v7614_v13 }
 0x157   :  { %6668 = vmatpush3.bf16.msra.mxu1 %v7939_v34  ;;  %6036 = vmatprep.mubr.msk.f32.mxu1 %vm7615_vm1, %v7616_v26 }
 0x158   :  { %6669 = vmatprep.subr.bf16.mxu1 %v7614_v13  ;;  %5971 = vmatmul.mubr.msk.f32.gmra.mrb[10].mxu0 %vm336_vm0, %v7901_v20 }
 0x159   :  { %5983 = vmatprep.mubr.msk.f32.mxu0 %vm336_vm0, %v7870_v5 }
 0x15b   :  { %6671 = vmatpush3.bf16.msra.mxu1 %v7949_v37 }
 0x15c   :  { %6678 = vmatprep.subr.bf16.mxu1 %v7614_v13  ;;  %5984 = vmatmul.mubr.msk.f32.vlgmr.msra.gmra.mrb[12].mxu0 %vm336_vm0, %v7882_v10 }
 0x15d   :  { %6662 = vmatpush3.bf16.msra.mxu0 %v6661_v42  ;;  %5986 = vmatprep.mubr.msk.f32.mxu0 %vm336_vm0, %v7889_v14 }
 0x15e   :  { %6037 = vmatmul.mubr.msk.f32.vlgmr.msra.gmra.mrb[8].mxu1 %vm466_vm2, %v7962_v43  ;;  %6663 = vmatprep.subr.bf16.mxu0 %v7614_v13 }
 0x15f   :  { %6680 = vmatpush3.bf16.msra.mxu1 %v7967_v46  ;;  %6058 = vmatprep.mubr.msk.f32.mxu1 %vm7615_vm1, %v7616_v26 }
 0x160   :  { %5987 = vmatmul.mubr.msk.f32.gmra.mrb[14].mxu0 %vm336_vm0, %v7901_v20  ;;  %6681 = vmatprep.subr.bf16.mxu1 %v7614_v13 }
 0x161   :  { %5989 = vmatprep.mubr.msk.f32.mxu0 %vm336_vm0, %v7875_v7  ;;  %6665 = vmatpush3.bf16.msra.mxu0 %v6664_v49 }
 0x162   :  { %6672 = vmatprep.subr.bf16.mxu0 %v7614_v13 }
 0x163   :  { %6683 = vmatpush3.bf16.msra.mxu1 %v7977_v50 }
 0x164   :  { %5990 = vmatmul.mubr.msk.f32.gmra.mrb[16].mxu0 %vm336_vm0, %v7885_v11  ;;  %6690 = vmatprep.subr.bf16.mxu1 %v7614_v13 }
 0x165   :  { %5992 = vmatprep.mubr.msk.f32.mxu0 %vm336_vm0, %v7896_v17 }
 0x166   :  { %6059 = vmatmul.mubr.msk.f32.vlgmr.msra.gmra.mrb[10].mxu1 %vm466_vm2, %v7962_v43 }
 0x167   :  { %6692 = vmatpush3.bf16.msra.mxu1 %v7993_v53  ;;  %6080 = vmatprep.mubr.msk.f32.mxu1 %vm7615_vm1, %v7616_v26 }
 0x168   :  { %5993 = vmatmul.mubr.msk.f32.gmra.mrb[18].mxu0 %vm336_vm0, %v7906_v22  ;;  %6693 = vmatprep.subr.bf16.mxu1 %v7614_v13 }
 0x169   :  { %6025 = vmatprep.mubr.msk.f32.mxu0 %vm7615_vm1, %v7616_v26 }
 0x16b   :  { %6695 = vmatpush3.bf16.msra.mxu1 %v8005_v56 }
 0x16c   :  { %6026 = vmatmul.mubr.msk.f32.vlgmr.msra.gmra.mrb[20].mxu0 %vm466_vm2, %v7921_v27  ;;  %6702 = vmatprep.subr.bf16.mxu1 %v7614_v13 }
 0x16d   :  { %6674 = vmatpush3.bf16.msra.mxu0 %v7993_v53  ;;  %6047 = vmatprep.mubr.msk.f32.mxu0 %vm7615_vm1, %v7616_v26 }
 0x16e   :  { %6675 = vmatprep.subr.bf16.mxu0 %v7614_v13 }
 0x171   :  { %6677 = vmatpush3.bf16.msra.mxu0 %v8005_v56 }
 0x172   :  { %6684 = vmatprep.subr.bf16.mxu0 %v7614_v13 }
 0x174   :  { %6048 = vmatmul.mubr.msk.f32.vlgmr.msra.gmra.mrb[22].mxu0 %vm466_vm2, %v7962_v43 }
 0x175   :  { %6686 = vmatpush3.bf16.msra.mxu0 %v7939_v34  ;;  %6069 = vmatprep.mubr.msk.f32.mxu0 %vm7615_vm1, %v7616_v26 }
 0x176   :  { %6687 = vmatprep.subr.bf16.mxu0 %v7614_v13 }
 0x179   :  { %6689 = vmatpush3.bf16.msra.mxu0 %v7949_v37 }
 0x17a   :  { %6696 = vmatprep.subr.bf16.mxu0 %v7614_v13 }
 0x217   :  { %v5953_v59 = vpop.f32.mrb[0].mxu0 }
 0x218   :  { %v433_v60 = vadd.f32 %v5953_v59, %v5466_v57  ;;  %v427_v61 = vpop.f32.mrb[1].mxu0  ;;  %v5975_v62 = vpop.f32.mrb[0].mxu1 }
 0x219   :  { %v428_v63 = vadd.f32 %v5466_v57, %v427_v61  ;;  %v576_v0 = vadd.f32 %v5975_v62, %v5475_v58  ;;  %v570_v1 = vpop.f32.mrb[1].mxu1 }
 0x21a   :  { %468 = vst.msk [vmem:[#allocation2 + $0x8] sm:$0xff] %vm466_vm2, %v433_v60  ;;  %v571_v2 = vadd.f32 %v5475_v58, %v570_v1 }
 0x21b   :  { %467 = vst.msk [vmem:[#allocation2] sm:$0xff] %vm466_vm2, %v428_v63  ;;  %v5956_v3 = vpop.f32.mrb[2].mxu0  ;;  %594 = vst.msk [vmem:[#allocation3 + $0x28] sm:$0xff] %vm466_vm2, %v576_v0 }
 0x21c   :  { %v443_v4 = vadd.f32 %v5956_v3, %v5466_v57  ;;  %v437_v5 = vpop.f32.mrb[3].mxu0  ;;  %593 = vst.msk [vmem:[#allocation3 + $0x20] sm:$0xff] %vm466_vm2, %v571_v2  ;;  %v5978_v6 = vpop.f32.mrb[2].mxu1 }
 0x21d   :  { %v438_v7 = vadd.f32 %v5466_v57, %v437_v5  ;;  %v586_v8 = vadd.f32 %v5978_v6, %v5475_v58  ;;  %v580_v9 = vpop.f32.mrb[3].mxu1 }
 0x21e   :  { %470 = vst.msk [vmem:[#allocation2 + $0x18] sm:$0xff] %vm466_vm2, %v443_v4  ;;  %v581_v10 = vadd.f32 %v5475_v58, %v580_v9 }
 0x21f   :  { %469 = vst.msk [vmem:[#allocation2 + $0x10] sm:$0xff] %vm466_vm2, %v438_v7  ;;  %v5959_v11 = vpop.f32.mrb[4].mxu0  ;;  %596 = vst.msk [vmem:[#allocation3 + $0x38] sm:$0xff] %vm466_vm2, %v586_v8  ;;  %v8060_v7 = vld [vmem:[%s8636_s25] ss:$0 sm:$0xff] }
 0x220   :  { %v453_v12 = vadd.f32 %v5959_v11, %v5466_v57  ;;  %v447_v14 = vpop.f32.mrb[5].mxu0  ;;  %595 = vst.msk [vmem:[#allocation3 + $0x30] sm:$0xff] %vm466_vm2, %v581_v10 }
 0x221   :  { %v8034_v15 = vpop.f32.mrb[4].mxu1  ;;  %v448_v16 = vadd.f32 %v5466_v57, %v447_v14 }
 0x222   :  { %v6005_v17 = vpop.f32.mrb[5].mxu1  ;;  %472 = vst.msk [vmem:[#allocation2 + $0x28] sm:$0xff] %vm466_vm2, %v453_v12  ;;  %v965_v32 = vld [vmem:[#allocation2] sm:$0xff] }
 0x223   :  { %471 = vst.msk [vmem:[#allocation2 + $0x20] sm:$0xff] %vm466_vm2, %v448_v16  ;;  %v5962_v18 = vpop.f32.mrb[6].mxu0  ;;  %v968_v38 = vadd.f32 %v965_v32, %v8034_v15 }
 0x224   :  { %v463_v19 = vadd.f32 %v5962_v18, %v5466_v57  ;;  %v457_v20 = vpop.f32.mrb[7].mxu0 }
 0x225   :  { %v458_v21 = vadd.f32 %v5466_v57, %v457_v20 }
 0x226   :  { %474 = vst.msk [vmem:[#allocation2 + $0x38] sm:$0xff] %vm466_vm2, %v463_v19 }
 0x227   :  { %473 = vst.msk [vmem:[#allocation2 + $0x30] sm:$0xff] %vm466_vm2, %v458_v21  ;;  %v5969_v22 = vpop.f32.mrb[8].mxu0 }
 0x228   :  { %v556_v23 = vadd.f32 %v5969_v22, %v5475_v58  ;;  %v550_v24 = vpop.f32.mrb[9].mxu0 }
 0x229   :  { %v8040_v25 = vpop.f32.mrb[6].mxu1  ;;  %v551_v27 = vadd.f32 %v5475_v58, %v550_v24 }
 0x22a   :  { %v6016_v28 = vpop.f32.mrb[7].mxu1  ;;  %590 = vst.msk [vmem:[#allocation3 + $0x8] sm:$0xff] %vm466_vm2, %v556_v23 }
 0x22b   :  { %589 = vst.msk [vmem:[#allocation3] sm:$0xff] %vm466_vm2, %v551_v27  ;;  %v5972_v29 = vpop.f32.mrb[10].mxu0 }
 0x22c   :  { %v566_v30 = vadd.f32 %v5972_v29, %v5475_v58  ;;  %v560_v31 = vpop.f32.mrb[11].mxu0 }
 0x22d   :  { %v561_v33 = vadd.f32 %v5475_v58, %v560_v31 }
 0x22e   :  { %592 = vst.msk [vmem:[#allocation3 + $0x18] sm:$0xff] %vm466_vm2, %v566_v30 }
 0x22f   :  { %591 = vst.msk [vmem:[#allocation3 + $0x10] sm:$0xff] %vm466_vm2, %v561_v33  ;;  %v5985_v36 = vpop.f32.mrb[12].mxu0 }
 0x230   :  { %v678_v39 = vadd.f32 %v5985_v36, %v5484_v35  ;;  %v672_v41 = vpop.f32.mrb[13].mxu0 }
 0x231   :  { %v1040_v40 = vpop.f32.mrb[8].mxu1  ;;  %v673_v44 = vadd.f32 %v5484_v35, %v672_v41  ;;  %v1209_v30 = vld [vmem:[#allocation3 + $0x8] sm:$0xff] }
 0x232   :  { %v1184_v42 = vadd.f32 %v1040_v40, %v968_v38  ;;  %v6038_v45 = vpop.f32.mrb[9].mxu1  ;;  %712 = vst.msk [vmem:[#allocation4 + $0x8] sm:$0xff] %vm466_vm2, %v678_v39  ;;  %v966_v5 = vld [vmem:[#allocation3] sm:$0xff]  ;;  %v1213_v32 = vadd.f32 %v1209_v30, %v8040_v25 }
 0x233   :  { %711 = vst.msk [vmem:[#allocation4] sm:$0xff] %vm466_vm2, %v673_v44  ;;  %v5988_v48 = vpop.f32.mrb[14].mxu0  ;;  %v969_v6 = vadd.f32 %v966_v5, %v8040_v25 }
 0x234   :  { %v5500_v47 = vmul.f32 -1.442695, %v1184_v42  ;;  %v688_v49 = vadd.f32 %v5988_v48, %v5484_v35  ;;  %v682_v51 = vpop.f32.mrb[15].mxu0 }
 0x235   :  { %v683_v52 = vadd.f32 %v5484_v35, %v682_v51 }
 0x236   :  { %7038 = vpow2.f32 %v5500_v47  ;;  %714 = vst.msk [vmem:[#allocation4 + $0x18] sm:$0xff] %vm466_vm2, %v688_v49 }
 0x237   :  { %713 = vst.msk [vmem:[#allocation4 + $0x10] sm:$0xff] %vm466_vm2, %v683_v52  ;;  %v5991_v54 = vpop.f32.mrb[16].mxu0 }
 0x238   :  { %v698_v55 = vadd.f32 %v5991_v54, %v5484_v35  ;;  %v692_v57 = vpop.f32.mrb[17].mxu0 }
 0x239   :  { %v693_v58 = vadd.f32 %v5484_v35, %v692_v57  ;;  %v1180_v59 = vpop.f32.mrb[10].mxu1 }
 0x23a   :  { %716 = vst.msk [vmem:[#allocation4 + $0x28] sm:$0xff] %vm466_vm2, %v698_v55  ;;  %v6060_v60 = vpop.f32.mrb[11].mxu1  ;;  %v1181_v11 = vadd.f32 %v8060_v7, %v1180_v59  ;;  %v967_v16 = vld [vmem:[#allocation4] sm:$0xff]  ;;  %v1211_v55 = vld [vmem:[#allocation4 + $0x8] sm:$0xff] }
 0x23b   :  { %715 = vst.msk [vmem:[#allocation4 + $0x20] sm:$0xff] %vm466_vm2, %v693_v58  ;;  %v5994_v61 = vpop.f32.mrb[18].mxu0 }
 0x23c   :  { %v708_v62 = vadd.f32 %v5994_v61, %v5484_v35  ;;  %v702_v63 = vpop.f32.mrb[19].mxu0 }
 0x23d   :  { %v703_v0 = vadd.f32 %v5484_v35, %v702_v63 }
 0x23e   :  { %718 = vst.msk [vmem:[#allocation4 + $0x38] sm:$0xff] %vm466_vm2, %v708_v62 }
 0x23f   :  { %717 = vst.msk [vmem:[#allocation4 + $0x30] sm:$0xff] %vm466_vm2, %v703_v0  ;;  %v8056_v2 = vpop.f32.mrb[20].mxu0 }
 0x240   :  { %v7039_v1 = vpop.eup %7038  ;;  %v6027_v4 = vpop.f32.mrb[21].mxu0  ;;  %v970_v17 = vadd.f32 %v967_v16, %v8056_v2  ;;  %v1214_v57 = vadd.f32 %v1211_v55, %v8056_v2 }
 0x241   :  { %v1188_v3 = vadd.f32 1.0, %v7039_v1  ;;  %v1454_v4 = vld [vmem:[#allocation3 + $0x10] sm:$0xff] }
 0x243   :  { %7040 = vrcp.f32 %v1188_v3  ;;  %v1452_v3 = vld [vmem:[#allocation2 + $0x10] sm:$0xff] }
 0x244   :  { %v1457_v5 = vadd.f32 %v1452_v3, %v8034_v15 }
 0x247   :  { %v1110_v8 = vpop.f32.mrb[22].mxu0 }
 0x248   :  { %v1191_v9 = vadd.f32 %v1110_v8, %v969_v6  ;;  %v6049_v10 = vpop.f32.mrb[23].mxu0  ;;  %v1458_v6 = vadd.f32 %v1454_v4, %v8040_v25 }
 0x24a   :  { %v5501_v12 = vmul.f32 -1.442695, %v1191_v9 }
 0x24c   :  { %7042 = vpow2.f32 %v5501_v12 }
 0x24d   :  { %v7041_v14 = vpop.eup %7040 }
 0x24e   :  { %v1198_v18 = vmul.f32 %v7041_v14, %v1181_v11 }
 0x250   :  { %v1199_v19 = vadd.f32 %v1198_v18, %v970_v17 }
 0x256   :  { %v7043_v20 = vpop.eup %7042 }
 0x257   :  { %v1195_v21 = vadd.f32 1.0, %v7043_v20 }
 0x259   :  { %7044 = vrcp.f32 %v1195_v21 }
 0x25a   :  { %7046 = vtanh.f32 %v1199_v19 }
 0x263   :  { %v7045_v22 = vpop.eup %7044 }
 0x264   :  { %v1201_v23 = vsub.f32 1.0, %v7045_v22  ;;  %v7047_v24 = vpop.eup %7046  ;;  %v1203_v28 = vmul.f32 %v7045_v22, %v7962_v43  ;;  %v1207_v43 = vld [vmem:[#allocation2 + $0x8] sm:$0xff] }
 0x265   :  { %v1212_v31 = vadd.f32 %v1207_v43, %v8034_v15 }
 0x266   :  { %v1202_v27 = vmul.f32 %v7047_v24, %v1201_v23  ;;  %v1456_v24 = vld [vmem:[#allocation4 + $0x10] sm:$0xff] }
 0x268   :  { %v1204_v29 = vadd.f32 %v1203_v28, %v1202_v27 }
 0x26a   :  { %1205 = vst.msk [vmem:[#allocation5] sm:$0xff] %vm466_vm2, %v1204_v29  ;;  %6070 = vmatmul.mubr.msk.f32.vlgmr.msra.gmra.mrb[24].mxu0 %vm466_vm2, %v1204_v29  ;;  %6081 = vmatmul.mubr.msk.f32.vlgmr.msra.gmra.mrb[12].mxu1 %vm466_vm2, %v1204_v29 }
 0x26b   :  { %6698 = vmatpush3.bf16.msra.mxu0 %v7967_v46  ;;  %6091 = vmatprep.mubr.msk.f32.mxu0 %vm7615_vm1, %v7616_v26 }
 0x26c   :  { %6699 = vmatprep.subr.bf16.mxu0 %v7614_v13  ;;  %6704 = vmatpush3.bf16.msra.mxu1 %v7939_v34 }
 0x26d   :  { %6705 = vmatprep.subr.bf16.mxu1 %v7614_v13  ;;  %6102 = vmatprep.mubr.msk.f32.mxu1 %vm7615_vm1, %v7616_v26 }
 0x26f   :  { %6701 = vmatpush3.bf16.msra.mxu0 %v7977_v50 }
 0x270   :  { %6708 = vmatprep.subr.bf16.mxu0 %v7614_v13  ;;  %6707 = vmatpush3.bf16.msra.mxu1 %v7949_v37 }
 0x271   :  { %6714 = vmatprep.subr.bf16.mxu1 %v7614_v13 }
 0x272   :  { %6092 = vmatmul.mubr.msk.f32.vlgmr.msra.gmra.mrb[26].mxu0 %vm466_vm2, %v1204_v29 }
 0x273   :  { %6710 = vmatpush3.bf16.msra.mxu0 %v7993_v53  ;;  %6113 = vmatprep.mubr.msk.f32.mxu0 %vm7615_vm1, %v7616_v26 }
 0x274   :  { %6711 = vmatprep.subr.bf16.mxu0 %v7614_v13 }
 0x277   :  { %6713 = vmatpush3.bf16.msra.mxu0 %v8005_v56 }
 0x278   :  { %6720 = vmatprep.subr.bf16.mxu0 %v7614_v13 }
 0x33d   :  { %v1284_v33 = vpop.f32.mrb[24].mxu0  ;;  %v1354_v35 = vpop.f32.mrb[12].mxu1 }
 0x33e   :  { %v1428_v36 = vadd.f32 %v1284_v33, %v1212_v31  ;;  %v1435_v38 = vadd.f32 %v1354_v35, %v1213_v32  ;;  %v6071_v39 = vpop.f32.mrb[25].mxu0  ;;  %v6082_v40 = vpop.f32.mrb[13].mxu1 }
 0x33f   :  { %v1697_v39 = vld [vmem:[#allocation2 + $0x18] sm:$0xff] }
 0x340   :  { %v5505_v41 = vmul.f32 -1.442695, %v1428_v36  ;;  %v5506_v42 = vmul.f32 -1.442695, %v1435_v38  ;;  %v1699_v40 = vld [vmem:[#allocation3 + $0x18] sm:$0xff] }
 0x342   :  { %7048 = vpow2.f32 %v5505_v41  ;;  %v1702_v41 = vadd.f32 %v1697_v39, %v8034_v15 }
 0x343   :  { %7050 = vpow2.f32 %v5506_v42  ;;  %v1703_v42 = vadd.f32 %v1699_v40, %v8040_v25 }
 0x345   :  { %v1424_v44 = vpop.f32.mrb[26].mxu0 }
 0x346   :  { %v6093_v45 = vpop.f32.mrb[27].mxu0  ;;  %v1425_v52 = vadd.f32 %v8060_v7, %v1424_v44 }
 0x34c   :  { %v7049_v47 = vpop.eup %7048 }
 0x34d   :  { %v1432_v48 = vadd.f32 1.0, %v7049_v47  ;;  %v7051_v49 = vpop.eup %7050 }
 0x34e   :  { %v1439_v51 = vadd.f32 1.0, %v7051_v49 }
 0x34f   :  { %7052 = vrcp.f32 %v1432_v48 }
 0x350   :  { %7054 = vrcp.f32 %v1439_v51 }
 0x359   :  { %v7053_v54 = vpop.eup %7052 }
 0x35a   :  { %v1442_v58 = vmul.f32 %v7053_v54, %v1425_v52  ;;  %v7055_v60 = vpop.eup %7054 }
 0x35b   :  { %v1445_v61 = vsub.f32 1.0, %v7055_v60  ;;  %v1447_v0 = vmul.f32 %v7055_v60, %v1204_v29  ;;  %v1459_v29 = vadd.f32 %v1456_v24, %v8056_v2 }
 0x35c   :  { %v1443_v59 = vadd.f32 %v1442_v58, %v1214_v57 }
 0x35e   :  { %7056 = vtanh.f32 %v1443_v59 }
 0x368   :  { %v7057_v62 = vpop.eup %7056 }
 0x369   :  { %v1446_v63 = vmul.f32 %v7057_v62, %v1445_v61 }
 0x36b   :  { %v1448_v1 = vadd.f32 %v1447_v0, %v1446_v63  ;;  %v1701_v0 = vld [vmem:[#allocation4 + $0x18] sm:$0xff] }
 0x36d   :  { %1450 = vst.msk [vmem:[#allocation5 + $0x8] sm:$0xff] %vm466_vm2, %v1448_v1  ;;  %6103 = vmatmul.mubr.msk.f32.vlgmr.msra.gmra.mrb[14].mxu1 %vm466_vm2, %v1448_v1  ;;  %6114 = vmatmul.mubr.msk.f32.vlgmr.msra.gmra.mrb[28].mxu0 %vm466_vm2, %v1448_v1 }
 0x36e   :  { %6716 = vmatpush3.bf16.msra.mxu1 %v7967_v46  ;;  %6124 = vmatprep.mubr.msk.f32.mxu1 %vm7615_vm1, %v7616_v26 }
 0x36f   :  { %6717 = vmatprep.subr.bf16.mxu1 %v7614_v13  ;;  %6722 = vmatpush3.bf16.msra.mxu0 %v7939_v34 }
 0x370   :  { %6723 = vmatprep.subr.bf16.mxu0 %v7614_v13  ;;  %6135 = vmatprep.mubr.msk.f32.mxu0 %vm7615_vm1, %v7616_v26 }
 0x372   :  { %6719 = vmatpush3.bf16.msra.mxu1 %v7977_v50 }
 0x373   :  { %6726 = vmatprep.subr.bf16.mxu1 %v7614_v13  ;;  %6725 = vmatpush3.bf16.msra.mxu0 %v7949_v37 }
 0x374   :  { %6732 = vmatprep.subr.bf16.mxu0 %v7614_v13 }
 0x375   :  { %6125 = vmatmul.mubr.msk.f32.vlgmr.msra.gmra.mrb[16].mxu1 %vm466_vm2, %v1448_v1 }
 0x376   :  { %6728 = vmatpush3.bf16.msra.mxu1 %v7993_v53  ;;  %6146 = vmatprep.mubr.msk.f32.mxu1 %vm7615_vm1, %v7616_v26 }
 0x377   :  { %6729 = vmatprep.subr.bf16.mxu1 %v7614_v13 }
 0x37a   :  { %6731 = vmatpush3.bf16.msra.mxu1 %v8005_v56 }
 0x37b   :  { %6738 = vmatprep.subr.bf16.mxu1 %v7614_v13 }
 0x440   :  { %v1529_v8 = vpop.f32.mrb[14].mxu1  ;;  %v1599_v9 = vpop.f32.mrb[28].mxu0 }
 0x441   :  { %v1673_v10 = vadd.f32 %v1529_v8, %v1457_v5  ;;  %v1680_v11 = vadd.f32 %v1599_v9, %v1458_v6  ;;  %v6104_v12 = vpop.f32.mrb[15].mxu1  ;;  %v6115_v14 = vpop.f32.mrb[29].mxu0 }
 0x442   :  { %v1942_v12 = vld [vmem:[#allocation2 + $0x20] sm:$0xff] }
 0x443   :  { %v5510_v16 = vmul.f32 -1.442695, %v1673_v10  ;;  %v5511_v17 = vmul.f32 -1.442695, %v1680_v11  ;;  %v1944_v14 = vld [vmem:[#allocation3 + $0x20] sm:$0xff] }
 0x445   :  { %7058 = vpow2.f32 %v5510_v16  ;;  %v1947_v16 = vadd.f32 %v1942_v12, %v8034_v15 }
 0x446   :  { %7060 = vpow2.f32 %v5511_v17  ;;  %v1948_v17 = vadd.f32 %v1944_v14, %v8040_v25 }
 0x448   :  { %v1669_v18 = vpop.f32.mrb[16].mxu1 }
 0x449   :  { %v6126_v19 = vpop.f32.mrb[17].mxu1  ;;  %v1670_v27 = vadd.f32 %v8060_v7, %v1669_v18 }
 0x44f   :  { %v7059_v20 = vpop.eup %7058 }
 0x450   :  { %v1677_v21 = vadd.f32 1.0, %v7059_v20  ;;  %v7061_v22 = vpop.eup %7060 }
 0x451   :  { %v1684_v23 = vadd.f32 1.0, %v7061_v22 }
 0x452   :  { %7062 = vrcp.f32 %v1677_v21 }
 0x453   :  { %7064 = vrcp.f32 %v1684_v23 }
 0x45c   :  { %v7063_v28 = vpop.eup %7062 }
 0x45d   :  { %v1687_v43 = vmul.f32 %v7063_v28, %v1670_v27  ;;  %v7065_v31 = vpop.eup %7064 }
 0x45e   :  { %v1690_v32 = vsub.f32 1.0, %v7065_v31  ;;  %v1692_v36 = vmul.f32 %v7065_v31, %v1448_v1  ;;  %v1704_v1 = vadd.f32 %v1701_v0, %v8056_v2 }
 0x45f   :  { %v1688_v30 = vadd.f32 %v1687_v43, %v1459_v29 }
 0x461   :  { %7066 = vtanh.f32 %v1688_v30 }
 0x46b   :  { %v7067_v33 = vpop.eup %7066 }
 0x46c   :  { %v1691_v35 = vmul.f32 %v7067_v33, %v1690_v32  ;;  %v1946_v33 = vld [vmem:[#allocation4 + $0x20] sm:$0xff] }
 0x46e   :  { %v1693_v38 = vadd.f32 %v1692_v36, %v1691_v35 }
 0x470   :  { %1695 = vst.msk [vmem:[#allocation5 + $0x10] sm:$0xff] %vm466_vm2, %v1693_v38  ;;  %6136 = vmatmul.mubr.msk.f32.vlgmr.msra.gmra.mrb[30].mxu0 %vm466_vm2, %v1693_v38  ;;  %6147 = vmatmul.mubr.msk.f32.vlgmr.msra.gmra.mrb[18].mxu1 %vm466_vm2, %v1693_v38 }
 0x471   :  { %6734 = vmatpush3.bf16.msra.mxu0 %v7967_v46  ;;  %6157 = vmatprep.mubr.msk.f32.mxu0 %vm7615_vm1, %v7616_v26 }
 0x472   :  { %6735 = vmatprep.subr.bf16.mxu0 %v7614_v13  ;;  %6740 = vmatpush3.bf16.msra.mxu1 %v7939_v34 }
 0x473   :  { %6741 = vmatprep.subr.bf16.mxu1 %v7614_v13  ;;  %6168 = vmatprep.mubr.msk.f32.mxu1 %vm7615_vm1, %v7616_v26 }
 0x475   :  { %6737 = vmatpush3.bf16.msra.mxu0 %v7977_v50 }
 0x476   :  { %6744 = vmatprep.subr.bf16.mxu0 %v7614_v13  ;;  %6743 = vmatpush3.bf16.msra.mxu1 %v7949_v37 }
 0x477   :  { %6750 = vmatprep.subr.bf16.mxu1 %v7614_v13 }
 0x478   :  { %6158 = vmatmul.mubr.msk.f32.vlgmr.msra.gmra.mrb[32].mxu0 %vm466_vm2, %v1693_v38 }
 0x479   :  { %6746 = vmatpush3.bf16.msra.mxu0 %v7993_v53  ;;  %6179 = vmatprep.mubr.msk.f32.mxu0 %vm7615_vm1, %v7616_v26 }
 0x47a   :  { %6747 = vmatprep.subr.bf16.mxu0 %v7614_v13 }
 0x47d   :  { %6749 = vmatpush3.bf16.msra.mxu0 %v8005_v56 }
 0x47e   :  { %6756 = vmatprep.subr.bf16.mxu0 %v7614_v13 }
 0x543   :  { %v1774_v44 = vpop.f32.mrb[30].mxu0  ;;  %v1844_v45 = vpop.f32.mrb[18].mxu1 }
 0x544   :  { %v1918_v47 = vadd.f32 %v1774_v44, %v1702_v41  ;;  %v1925_v48 = vadd.f32 %v1844_v45, %v1703_v42  ;;  %v6137_v49 = vpop.f32.mrb[31].mxu0  ;;  %v6148_v51 = vpop.f32.mrb[19].mxu1 }
 0x545   :  { %v2187_v49 = vld [vmem:[#allocation2 + $0x28] sm:$0xff] }
 0x546   :  { %v5515_v52 = vmul.f32 -1.442695, %v1918_v47  ;;  %v5516_v54 = vmul.f32 -1.442695, %v1925_v48  ;;  %v2189_v51 = vld [vmem:[#allocation3 + $0x28] sm:$0xff] }
 0x548   :  { %7068 = vpow2.f32 %v5515_v52  ;;  %v2192_v52 = vadd.f32 %v2187_v49, %v8034_v15 }
 0x549   :  { %7070 = vpow2.f32 %v5516_v54  ;;  %v2193_v54 = vadd.f32 %v2189_v51, %v8040_v25 }
 0x54b   :  { %v1914_v55 = vpop.f32.mrb[32].mxu0 }
 0x54c   :  { %v6159_v57 = vpop.f32.mrb[33].mxu0  ;;  %v1915_v62 = vadd.f32 %v8060_v7, %v1914_v55 }
 0x552   :  { %v7069_v58 = vpop.eup %7068 }
 0x553   :  { %v1922_v59 = vadd.f32 1.0, %v7069_v58  ;;  %v7071_v60 = vpop.eup %7070 }
 0x554   :  { %v1929_v61 = vadd.f32 1.0, %v7071_v60 }
 0x555   :  { %7072 = vrcp.f32 %v1922_v59 }
 0x556   :  { %7074 = vrcp.f32 %v1929_v61 }
 0x55f   :  { %v7073_v63 = vpop.eup %7072 }
 0x560   :  { %v1932_v3 = vmul.f32 %v7073_v63, %v1915_v62  ;;  %v7075_v5 = vpop.eup %7074 }
 0x561   :  { %v1935_v6 = vsub.f32 1.0, %v7075_v5  ;;  %v1937_v10 = vmul.f32 %v7075_v5, %v1693_v38  ;;  %v1949_v38 = vadd.f32 %v1946_v33, %v8056_v2 }
 0x562   :  { %v1933_v4 = vadd.f32 %v1932_v3, %v1704_v1 }
 0x564   :  { %7076 = vtanh.f32 %v1933_v4 }
 0x56e   :  { %v7077_v8 = vpop.eup %7076 }
 0x56f   :  { %v1936_v9 = vmul.f32 %v7077_v8, %v1935_v6  ;;  %v2191_v8 = vld [vmem:[#allocation4 + $0x28] sm:$0xff] }
 0x571   :  { %v1938_v11 = vadd.f32 %v1937_v10, %v1936_v9 }
 0x573   :  { %1940 = vst.msk [vmem:[#allocation5 + $0x18] sm:$0xff] %vm466_vm2, %v1938_v11  ;;  %6169 = vmatmul.mubr.msk.f32.vlgmr.msra.gmra.mrb[20].mxu1 %vm466_vm2, %v1938_v11  ;;  %6180 = vmatmul.mubr.msk.f32.vlgmr.msra.gmra.mrb[34].mxu0 %vm466_vm2, %v1938_v11 }
 0x574   :  { %6752 = vmatpush3.bf16.msra.mxu1 %v7967_v46  ;;  %6190 = vmatprep.mubr.msk.f32.mxu1 %vm7615_vm1, %v7616_v26 }
 0x575   :  { %6753 = vmatprep.subr.bf16.mxu1 %v7614_v13  ;;  %6758 = vmatpush3.bf16.msra.mxu0 %v7939_v34 }
 0x576   :  { %6759 = vmatprep.subr.bf16.mxu0 %v7614_v13  ;;  %6201 = vmatprep.mubr.msk.f32.mxu0 %vm7615_vm1, %v7616_v26 }
 0x578   :  { %6755 = vmatpush3.bf16.msra.mxu1 %v7977_v50 }
 0x579   :  { %6762 = vmatprep.subr.bf16.mxu1 %v7614_v13  ;;  %6761 = vmatpush3.bf16.msra.mxu0 %v7949_v37 }
 0x57a   :  { %6768 = vmatprep.subr.bf16.mxu0 %v7614_v13 }
 0x57b   :  { %6191 = vmatmul.mubr.msk.f32.vlgmr.msra.gmra.mrb[22].mxu1 %vm466_vm2, %v1938_v11 }
 0x57c   :  { %6764 = vmatpush3.bf16.msra.mxu1 %v7993_v53  ;;  %6212 = vmatprep.mubr.msk.f32.mxu1 %vm7615_vm1, %v7616_v26 }
 0x57d   :  { %6765 = vmatprep.subr.bf16.mxu1 %v7614_v13 }
 0x580   :  { %6767 = vmatpush3.bf16.msra.mxu1 %v8005_v56 }
 0x581   :  { %6774 = vmatprep.subr.bf16.mxu1 %v7614_v13 }
 0x646   :  { %v2019_v18 = vpop.f32.mrb[20].mxu1  ;;  %v2089_v19 = vpop.f32.mrb[34].mxu0 }
 0x647   :  { %v2163_v20 = vadd.f32 %v2019_v18, %v1947_v16  ;;  %v2170_v21 = vadd.f32 %v2089_v19, %v1948_v17  ;;  %v6170_v22 = vpop.f32.mrb[21].mxu1  ;;  %v6181_v23 = vpop.f32.mrb[35].mxu0 }
 0x648   :  { %v2931_v22 = vld [vmem:[%s8637_s1 + $0x8] sm:$0xff] }
 0x649   :  { %v5520_v24 = vmul.f32 -1.442695, %v2163_v20  ;;  %v5521_v27 = vmul.f32 -1.442695, %v2170_v21 }
 0x64b   :  { %7078 = vpow2.f32 %v5520_v24  ;;  %v2432_v24 = vld [vmem:[#allocation2 + $0x30] sm:$0xff] }
 0x64c   :  { %7080 = vpow2.f32 %v5521_v27  ;;  %v2434_v27 = vld [vmem:[#allocation3 + $0x30] sm:$0xff] }
 0x64e   :  { %v2159_v28 = vpop.f32.mrb[22].mxu1 }
 0x64f   :  { %v6192_v29 = vpop.f32.mrb[23].mxu1  ;;  %v2160_v35 = vadd.f32 %v8060_v7, %v2159_v28  ;;  %v2438_v28 = vadd.f32 %v2434_v27, %v8040_v25  ;;  %v2679_v27 = vld [vmem:[#allocation3 + $0x38] sm:$0xff] }
 0x655   :  { %v7079_v43 = vpop.eup %7078 }
 0x656   :  { %v2167_v30 = vadd.f32 1.0, %v7079_v43  ;;  %v7081_v31 = vpop.eup %7080 }
 0x657   :  { %v2174_v32 = vadd.f32 1.0, %v7081_v31 }
 0x658   :  { %7082 = vrcp.f32 %v2167_v30 }
 0x659   :  { %7084 = vrcp.f32 %v2174_v32 }
 0x662   :  { %v7083_v36 = vpop.eup %7082 }
 0x663   :  { %v2177_v39 = vmul.f32 %v7083_v36, %v2160_v35  ;;  %v7085_v41 = vpop.eup %7084 }
 0x664   :  { %v2180_v42 = vsub.f32 1.0, %v7085_v41  ;;  %v2182_v47 = vmul.f32 %v7085_v41, %v1938_v11  ;;  %v2194_v11 = vadd.f32 %v2191_v8, %v8056_v2 }
 0x665   :  { %v2178_v40 = vadd.f32 %v2177_v39, %v1949_v38 }
 0x667   :  { %7086 = vtanh.f32 %v2178_v40 }
 0x671   :  { %v7087_v44 = vpop.eup %7086 }
 0x672   :  { %v2181_v45 = vmul.f32 %v7087_v44, %v2180_v42  ;;  %v2436_v42 = vld [vmem:[#allocation4 + $0x30] sm:$0xff] }
 0x674   :  { %v2183_v48 = vadd.f32 %v2182_v47, %v2181_v45  ;;  %v2439_v47 = vadd.f32 %v2436_v42, %v8056_v2 }
 0x676   :  { %2185 = vst.msk [vmem:[#allocation5 + $0x20] sm:$0xff] %vm466_vm2, %v2183_v48  ;;  %6202 = vmatmul.mubr.msk.f32.vlgmr.msra.gmra.mrb[36].mxu0 %vm466_vm2, %v2183_v48  ;;  %6213 = vmatmul.mubr.msk.f32.vlgmr.msra.gmra.mrb[24].mxu1 %vm466_vm2, %v2183_v48 }
 0x677   :  { %6770 = vmatpush3.bf16.msra.mxu0 %v7967_v46  ;;  %6223 = vmatprep.mubr.msk.f32.mxu0 %vm7615_vm1, %v7616_v26 }
 0x678   :  { %6771 = vmatprep.subr.bf16.mxu0 %v7614_v13  ;;  %6776 = vmatpush3.bf16.msra.mxu1 %v7939_v34 }
 0x679   :  { %6777 = vmatprep.subr.bf16.mxu1 %v7614_v13  ;;  %6234 = vmatprep.mubr.msk.f32.mxu1 %vm7615_vm1, %v7616_v26 }
 0x67b   :  { %6773 = vmatpush3.bf16.msra.mxu0 %v7977_v50 }
 0x67c   :  { %6780 = vmatprep.subr.bf16.mxu0 %v7614_v13  ;;  %6779 = vmatpush3.bf16.msra.mxu1 %v7949_v37 }
 0x67d   :  { %6786 = vmatprep.subr.bf16.mxu1 %v7614_v13  ;;  %v8257_v8 = vld [vmem:[#allocation5 + $0x20] sm:$0xff] }
 0x67e   :  { %6224 = vmatmul.mubr.msk.f32.vlgmr.msra.gmra.mrb[38].mxu0 %vm466_vm2, %v2183_v48 }
 0x67f   :  { %6782 = vmatpush3.bf16.msra.mxu0 %v7993_v53  ;;  %6245 = vmatprep.mubr.msk.f32.mxu0 %vm7615_vm1, %v7616_v26 }
 0x680   :  { %6783 = vmatprep.subr.bf16.mxu0 %v7614_v13 }
 0x683   :  { %6785 = vmatpush3.bf16.msra.mxu0 %v8005_v56 }
 0x684   :  { %6792 = vmatprep.subr.bf16.mxu0 %v7614_v13 }
 0x749   :  { %v2264_v55 = vpop.f32.mrb[36].mxu0  ;;  %v2334_v57 = vpop.f32.mrb[24].mxu1 }
 0x74a   :  { %v2408_v58 = vadd.f32 %v2264_v55, %v2192_v52  ;;  %v2415_v59 = vadd.f32 %v2334_v57, %v2193_v54  ;;  %v6203_v60 = vpop.f32.mrb[37].mxu0  ;;  %v6214_v61 = vpop.f32.mrb[25].mxu1 }
 0x74c   :  { %v5525_v62 = vmul.f32 -1.442695, %v2408_v58  ;;  %v5526_v63 = vmul.f32 -1.442695, %v2415_v59  ;;  %v2932_v58 = vld [vmem:[%s8637_s1 + $0x10] sm:$0xff]  ;;  %v2933_v59 = vld [vmem:[%s8637_s1 + $0x18] sm:$0xff] }
 0x74d   :  { %v6814_v61 = vpack.c.bf16 %v2933_v59, %v2932_v58 }
 0x74e   :  { %7088 = vpow2.f32 %v5525_v62  ;;  %v3078_v62 = vld [vmem:[#allocation21] sm:$0xff] }
 0x74f   :  { %7090 = vpow2.f32 %v5526_v63  ;;  %v3079_v63 = vld [vmem:[#allocation21 + $0x8] sm:$0xff] }
 0x751   :  { %v2404_v0 = vpop.f32.mrb[38].mxu0 }
 0x752   :  { %v6225_v1 = vpop.f32.mrb[39].mxu0  ;;  %v2405_v9 = vadd.f32 %v8060_v7, %v2404_v0  ;;  %v8233_v0 = vld [vmem:[#allocation5] sm:$0xff] }
 0x753   :  { %v6818_v1 = vpack.c.bf16 %v3079_v63, %v3078_v62 }
 0x758   :  { %v7089_v3 = vpop.eup %7088 }
 0x759   :  { %v2412_v4 = vadd.f32 1.0, %v7089_v3  ;;  %v7091_v5 = vpop.eup %7090  ;;  %v3080_v3 = vld [vmem:[#allocation21 + $0x10] sm:$0xff] }
 0x75a   :  { %v2419_v6 = vadd.f32 1.0, %v7091_v5  ;;  %v8241_v5 = vld [vmem:[#allocation5 + $0x8] sm:$0xff] }
 0x75b   :  { %7092 = vrcp.f32 %v2412_v4  ;;  %v3081_v4 = vld [vmem:[#allocation21 + $0x18] sm:$0xff] }
 0x75c   :  { %7094 = vrcp.f32 %v2419_v6  ;;  %v8247_v6 = vld [vmem:[#allocation5 + $0x10] sm:$0xff] }
 0x765   :  { %v7093_v10 = vpop.eup %7092 }
 0x766   :  { %v2422_v12 = vmul.f32 %v7093_v10, %v2405_v9  ;;  %v7095_v16 = vpop.eup %7094 }
 0x767   :  { %v2425_v17 = vsub.f32 1.0, %v7095_v16  ;;  %v2427_v20 = vmul.f32 %v7095_v16, %v2183_v48 }
 0x768   :  { %v2423_v14 = vadd.f32 %v2422_v12, %v2194_v11  ;;  %v3326_v11 = vld [vmem:[#allocation24] sm:$0xff]  ;;  %v3327_v12 = vld [vmem:[#allocation24 + $0x8] sm:$0xff] }
 0x769   :  { %v8282_v16 = vpack.c.bf16 %v3327_v12, %v3326_v11 }
 0x76a   :  { %7096 = vtanh.f32 %v2423_v14  ;;  %v3202_v14 = vld [vmem:[#allocation23] sm:$0xff] }
 0x774   :  { %v7097_v18 = vpop.eup %7096 }
 0x775   :  { %v2426_v19 = vmul.f32 %v7097_v18, %v2425_v17  ;;  %v3203_v17 = vld [vmem:[#allocation23 + $0x8] sm:$0xff]  ;;  %v3328_v18 = vld [vmem:[#allocation24 + $0x10] sm:$0xff] }
 0x777   :  { %v2428_v21 = vadd.f32 %v2427_v20, %v2426_v19  ;;  %v3329_v19 = vld [vmem:[#allocation24 + $0x18] sm:$0xff]  ;;  %v6826_v20 = vpack.c.bf16 %v3203_v17, %v3202_v14  ;;  %v2681_v17 = vld [vmem:[#allocation4 + $0x38] sm:$0xff] }
 0x779   :  { %2430 = vst.msk [vmem:[#allocation5 + $0x28] sm:$0xff] %vm466_vm2, %v2428_v21  ;;  %6235 = vmatmul.mubr.msk.f32.vlgmr.msra.gmra.mrb[26].mxu1 %vm466_vm2, %v2428_v21  ;;  %6246 = vmatmul.mubr.msk.f32.vlgmr.msra.gmra.mrb[40].mxu0 %vm466_vm2, %v2428_v21 }
 0x77a   :  { %6788 = vmatpush3.bf16.msra.mxu1 %v7967_v46  ;;  %6256 = vmatprep.mubr.msk.f32.mxu1 %vm7615_vm1, %v7616_v26 }
 0x77b   :  { %6789 = vmatprep.subr.bf16.mxu1 %v7614_v13  ;;  %6794 = vmatpush3.bf16.msra.mxu0 %v7939_v34  ;;  %v2930_v34 = vld [vmem:[%s8637_s1] sm:$0xff] }
 0x77c   :  { %6795 = vmatprep.subr.bf16.mxu0 %v7614_v13  ;;  %6267 = vmatprep.mubr.msk.f32.mxu0 %vm7615_vm1, %v7616_v26  ;;  %v6810_v23 = vpack.c.bf16 %v2931_v22, %v2930_v34  ;;  %v3204_v34 = vld [vmem:[#allocation23 + $0x10] sm:$0xff]  ;;  %v3205_v22 = vld [vmem:[#allocation23 + $0x18] sm:$0xff] }
 0x77e   :  { %6791 = vmatpush3.bf16.msra.mxu1 %v7977_v50 }
 0x77f   :  { %6798 = vmatprep.subr.bf16.mxu1 %v7614_v13  ;;  %6797 = vmatpush3.bf16.msra.mxu0 %v7949_v37  ;;  %v2437_v37 = vadd.f32 %v2432_v24, %v8034_v15  ;;  %v2677_v24 = vld [vmem:[#allocation2 + $0x38] sm:$0xff] }
 0x780   :  { %6804 = vmatprep.subr.bf16.mxu0 %v7614_v13  ;;  %v8262_v9 = vld [vmem:[#allocation5 + $0x28] sm:$0xff] }
 0x781   :  { %6257 = vmatmul.mubr.msk.f32.vlgmr.msra.gmra.mrb[28].mxu1 %vm466_vm2, %v2428_v21 }
 0x782   :  { %6800 = vmatpush3.bf16.msra.mxu1 %v7993_v53  ;;  %6278 = vmatprep.mubr.msk.f32.mxu1 %vm7615_vm1, %v7616_v26 }
 0x783   :  { %6801 = vmatprep.subr.bf16.mxu1 %v7614_v13 }
 0x786   :  { %6803 = vmatpush3.bf16.msra.mxu1 %v8005_v56 }
 0x787   :  { %6811 = vmatprep.subr.bf16.mxu1 %v6810_v23 }
 0x84c   :  { %v2509_v29 = vpop.f32.mrb[26].mxu1  ;;  %v2579_v43 = vpop.f32.mrb[40].mxu0 }
 0x84d   :  { %v2653_v53 = vadd.f32 %v2509_v29, %v2437_v37  ;;  %v2660_v30 = vadd.f32 %v2579_v43, %v2438_v28  ;;  %v6236_v31 = vpop.f32.mrb[27].mxu1  ;;  %v6247_v32 = vpop.f32.mrb[41].mxu0  ;;  %v2682_v37 = vadd.f32 %v2677_v24, %v8034_v15  ;;  %v2683_v28 = vadd.f32 %v2679_v27, %v8040_v25 }
 0x84f   :  { %v5530_v33 = vmul.f32 -1.442695, %v2653_v53  ;;  %v5531_v35 = vmul.f32 -1.442695, %v2660_v30 }
 0x851   :  { %7098 = vpow2.f32 %v5530_v33 }
 0x852   :  { %7100 = vpow2.f32 %v5531_v35  ;;  %v8293_v35 = vld [vmem:[#allocation29] ss:$0 sm:$0xff] }
 0x854   :  { %v2649_v56 = vpop.f32.mrb[28].mxu1 }
 0x855   :  { %v6258_v36 = vpop.f32.mrb[29].mxu1  ;;  %v2650_v44 = vadd.f32 %v8060_v7, %v2649_v56 }
 0x85b   :  { %v7099_v38 = vpop.eup %7098 }
 0x85c   :  { %v2657_v39 = vadd.f32 1.0, %v7099_v38  ;;  %v7101_v40 = vpop.eup %7100 }
 0x85d   :  { %v2664_v41 = vadd.f32 1.0, %v7101_v40 }
 0x85e   :  { %7102 = vrcp.f32 %v2657_v39 }
 0x85f   :  { %7104 = vrcp.f32 %v2664_v41 }
 0x868   :  { %v7103_v45 = vpop.eup %7102 }
 0x869   :  { %v2667_v48 = vmul.f32 %v7103_v45, %v2650_v44  ;;  %v7105_v51 = vpop.eup %7104 }
 0x86a   :  { %v2670_v52 = vsub.f32 1.0, %v7105_v51  ;;  %v2672_v57 = vmul.f32 %v7105_v51, %v2428_v21  ;;  %v8285_v21 = vpack.c.bf16 %v3329_v19, %v3328_v18 }
 0x86b   :  { %v2668_v49 = vadd.f32 %v2667_v48, %v2439_v47  ;;  %v8302_v47 = vld [vmem:[%s8638_s13] ss:$0 sm:$0xff] }
 0x86d   :  { %7106 = vtanh.f32 %v2668_v49 }
 0x877   :  { %v7107_v54 = vpop.eup %7106 }
 0x878   :  { %v2671_v55 = vmul.f32 %v7107_v54, %v2670_v52 }
 0x87a   :  { %v8224_v60 = vadd.f32 %v2672_v57, %v2671_v55 }
 0x87c   :  { %2675 = vst.msk [vmem:[#allocation5 + $0x30] sm:$0xff] %vm466_vm2, %v8224_v60  ;;  %6268 = vmatmul.mubr.msk.f32.vlgmr.msra.gmra.mrb[42].mxu0 %vm466_vm2, %v8224_v60  ;;  %6279 = vmatmul.mubr.msk.f32.vlgmr.msra.gmra.mrb[30].mxu1 %vm466_vm2, %v8224_v60 }
 0x87d   :  { %6806 = vmatpush3.bf16.msra.mxu0 %v7967_v46  ;;  %6813 = vmatpush3.bf16.msra.mxu1 %v6810_v23  ;;  %v6822_v46 = vpack.c.bf16 %v3081_v4, %v3080_v3  ;;  %v6830_v23 = vpack.c.bf16 %v3205_v22, %v3204_v34  ;;  %v2684_v34 = vadd.f32 %v2681_v17, %v8056_v2  ;;  %v3334_v2 = vld [vmem:[#allocation27] sm:$0xff] }
 0x87e   :  { %6300 = vmatprep.mubr.msk.f32.mxu1 %vm466_vm2, %v8233_v0  ;;  %6807 = vmatprep.subr.bf16.mxu0 %v7614_v13 }
 0x87f   :  { %6815 = vmatprep.subr.bf16.mxu1 %v6814_v61  ;;  %6289 = vmatprep.mubr.msk.f32.mxu0 %vm7615_vm1, %v7616_v26 }
 0x881   :  { %6809 = vmatpush3.bf16.msra.mxu0 %v7977_v50  ;;  %6817 = vmatpush3.bf16.msra.mxu1 %v6814_v61  ;;  %v8253_v50 = vld [vmem:[#allocation5 + $0x18] sm:$0xff] }
 0x882   :  { %6819 = vmatprep.subr.bf16.mxu0 %v6818_v1  ;;  %6827 = vmatprep.subr.bf16.mxu1 %v6826_v20 }
 0x883   :  { %v8268_v10 = vld [vmem:[#allocation5 + $0x30] sm:$0xff] }
 0x884   :  { %6290 = vmatmul.mubr.msk.f32.vlgmr.msra.gmra.mrb[44].mxu0 %vm466_vm2, %v8224_v60  ;;  %6301 = vmatmul.mubr.msk.f32.vlgmr.msra.gmra.mrb[32].mxu1 %vm466_vm2, %v8241_v5 }
 0x885   :  { %6303 = vmatprep.mubr.msk.f32.mxu1 %vm466_vm2, %v8247_v6  ;;  %6821 = vmatpush3.bf16.msra.mxu0 %v6818_v1 }
 0x886   :  { %6320 = vmatprep.mubr.msk.f32.mxu0 %vm466_vm2, %v8233_v0  ;;  %6823 = vmatprep.subr.bf16.mxu0 %v6822_v46 }
 0x887   :  { %6829 = vmatpush3.bf16.msra.mxu1 %v6826_v20 }
 0x888   :  { %6304 = vmatmul.mubr.msk.f32.gmra.mrb[34].mxu1 %vm466_vm2, %v8253_v50  ;;  %6831 = vmatprep.subr.bf16.mxu1 %v6830_v23 }
 0x889   :  { %6306 = vmatprep.mubr.msk.f32.mxu1 %vm466_vm2, %v8257_v8  ;;  %6825 = vmatpush3.bf16.msra.mxu0 %v6822_v46 }
 0x88a   :  { %6834 = vmatprep.subr.bf16.mxu0 %v7614_v13 }
 0x88b   :  { %6833 = vmatpush3.bf16.msra.mxu1 %v6830_v23 }
 0x88c   :  { %6307 = vmatmul.mubr.msk.f32.gmra.mrb[36].mxu1 %vm466_vm2, %v8262_v9  ;;  %6321 = vmatmul.mubr.msk.f32.vlgmr.msra.gmra.mrb[46].mxu0 %vm466_vm2, %v8241_v5 }
 0x88d   :  { %6309 = vmatprep.mubr.msk.f32.mxu1 %vm466_vm2, %v8268_v10  ;;  %6323 = vmatprep.mubr.msk.f32.mxu0 %vm466_vm2, %v8247_v6 }
 0x88e   :  { %6836 = vmatpush3.bf16.msra.mxu0 %v8282_v16  ;;  %6846 = vmatprep.subr.bf16.mxu1 %v7614_v13 }
 0x88f   :  { %6837 = vmatprep.subr.bf16.mxu0 %v7614_v13 }
 0x890   :  { %6324 = vmatmul.mubr.msk.f32.gmra.mrb[48].mxu0 %vm466_vm2, %v8253_v50 }
 0x891   :  { %6326 = vmatprep.mubr.msk.f32.mxu0 %vm466_vm2, %v8257_v8 }
 0x892   :  { %6839 = vmatpush3.bf16.msra.mxu0 %v8285_v21 }
 0x893   :  { %6840 = vmatprep.subr.bf16.mxu0 %v7614_v13 }
 0x894   :  { %6327 = vmatmul.mubr.msk.f32.gmra.mrb[50].mxu0 %vm466_vm2, %v8262_v9 }
 0x895   :  { %6329 = vmatprep.mubr.msk.f32.mxu0 %vm466_vm2, %v8268_v10 }
 0x94f   :  { %v2754_v29 = vpop.f32.mrb[42].mxu0  ;;  %v2824_v43 = vpop.f32.mrb[30].mxu1 }
 0x950   :  { %v2898_v53 = vadd.f32 %v2754_v29, %v2682_v37  ;;  %v2905_v30 = vadd.f32 %v2824_v43, %v2683_v28  ;;  %v6269_v31 = vpop.f32.mrb[43].mxu0  ;;  %v6280_v32 = vpop.f32.mrb[31].mxu1 }
 0x951   :  { %v3335_v31 = vld [vmem:[#allocation27 + $0x8] sm:$0xff] }
 0x952   :  { %v5535_v33 = vmul.f32 -1.442695, %v2898_v53  ;;  %v5536_v56 = vmul.f32 -1.442695, %v2905_v30  ;;  %v3331_v53 = vld [vmem:[#allocation26 + $0x8] sm:$0xff] }
 0x954   :  { %7108 = vpow2.f32 %v5535_v33  ;;  %v3332_v33 = vld [vmem:[#allocation26 + $0x10] sm:$0xff] }
 0x955   :  { %7110 = vpow2.f32 %v5536_v56  ;;  %v3333_v56 = vld [vmem:[#allocation26 + $0x18] sm:$0xff] }
 0x957   :  { %v2894_v36 = vpop.f32.mrb[44].mxu0  ;;  %v6302_v38 = vpop.f32.mrb[32].mxu1 }
 0x958   :  { %v3037_v39 = vadd.f32 %v6302_v38, %v8293_v35  ;;  %v6291_v40 = vpop.f32.mrb[45].mxu0  ;;  %v3031_v15 = vpop.f32.mrb[33].mxu1  ;;  %v2895_v19 = vadd.f32 %v8060_v7, %v2894_v36  ;;  %v3330_v7 = vld [vmem:[#allocation26] sm:$0xff]  ;;  %v8337_v36 = vpack.c.bf16 %v3335_v31, %v3334_v2  ;;  %v3336_v38 = vld [vmem:[#allocation27 + $0x10] sm:$0xff] }
 0x959   :  { %v3032_v25 = vadd.f32 %v8293_v35, %v3031_v15  ;;  %v8335_v32 = vpack.c.bf16 %v3331_v53, %v3330_v7 }
 0x95a   :  { %3071 = vst.msk [vmem:[#allocation2 + $0x8] sm:$0xff] %vm466_vm2, %v3037_v39  ;;  %v3337_v39 = vld [vmem:[#allocation27 + $0x18] sm:$0xff] }
 0x95b   :  { %3070 = vst.msk [vmem:[#allocation2] sm:$0xff] %vm466_vm2, %v3032_v25  ;;  %v6305_v41 = vpop.f32.mrb[34].mxu1 }
 0x95c   :  { %v3047_v42 = vadd.f32 %v6305_v41, %v8293_v35  ;;  %v3041_v44 = vpop.f32.mrb[35].mxu1  ;;  %v5555_v41 = vld [vmem:[%s8639_s4] ss:$0 sm:$0xff] }
 0x95d   :  { %v3042_v45 = vadd.f32 %v8293_v35, %v3041_v44 }
 0x95e   :  { %v7109_v48 = vpop.eup %7108  ;;  %3073 = vst.msk [vmem:[#allocation2 + $0x18] sm:$0xff] %vm466_vm2, %v3047_v42 }
 0x95f   :  { %v2902_v49 = vadd.f32 1.0, %v7109_v48  ;;  %3072 = vst.msk [vmem:[#allocation2 + $0x10] sm:$0xff] %vm466_vm2, %v3042_v45  ;;  %v6308_v51 = vpop.f32.mrb[36].mxu1  ;;  %v6322_v52 = vpop.f32.mrb[46].mxu0 }
 0x960   :  { %v3057_v54 = vadd.f32 %v6308_v51, %v8293_v35  ;;  %v3161_v55 = vadd.f32 %v6322_v52, %v8302_v47  ;;  %v3051_v57 = vpop.f32.mrb[37].mxu1  ;;  %v3155_v58 = vpop.f32.mrb[47].mxu0 }
 0x961   :  { %7112 = vrcp.f32 %v2902_v49  ;;  %v3052_v59 = vadd.f32 %v8293_v35, %v3051_v57  ;;  %v3156_v61 = vadd.f32 %v8302_v47, %v3155_v58  ;;  %v7111_v3 = vpop.eup %7110 }
 0x962   :  { %3075 = vst.msk [vmem:[#allocation2 + $0x28] sm:$0xff] %vm466_vm2, %v3057_v54  ;;  %3195 = vst.msk [vmem:[#allocation3 + $0x8] sm:$0xff] %vm466_vm2, %v3161_v55  ;;  %v2909_v11 = vadd.f32 1.0, %v7111_v3  ;;  %v3347_v44 = vld [vmem:[#allocation2] sm:$0xff] }
 0x963   :  { %3074 = vst.msk [vmem:[#allocation2 + $0x20] sm:$0xff] %vm466_vm2, %v3052_v59  ;;  %3194 = vst.msk [vmem:[#allocation3] sm:$0xff] %vm466_vm2, %v3156_v61  ;;  %v6325_v62 = vpop.f32.mrb[48].mxu0 }
 0x964   :  { %v3171_v63 = vadd.f32 %v6325_v62, %v8302_v47  ;;  %v3165_v1 = vpop.f32.mrb[49].mxu0  ;;  %7114 = vrcp.f32 %v2909_v11 }
 0x965   :  { %v3166_v4 = vadd.f32 %v8302_v47, %v3165_v1 }
 0x966   :  { %3197 = vst.msk [vmem:[#allocation3 + $0x18] sm:$0xff] %vm466_vm2, %v3171_v63 }
 0x967   :  { %3196 = vst.msk [vmem:[#allocation3 + $0x10] sm:$0xff] %vm466_vm2, %v3166_v4  ;;  %v6328_v46 = vpop.f32.mrb[50].mxu0 }
 0x968   :  { %v3181_v12 = vadd.f32 %v6328_v46, %v8302_v47  ;;  %v3175_v14 = vpop.f32.mrb[51].mxu0 }
 0x969   :  { %v3176_v18 = vadd.f32 %v8302_v47, %v3175_v14 }
 0x96a   :  { %3199 = vst.msk [vmem:[#allocation3 + $0x28] sm:$0xff] %vm466_vm2, %v3181_v12  ;;  %v3348_v59 = vld [vmem:[#allocation3] sm:$0xff] }
 0x96b   :  { %v7113_v20 = vpop.eup %7112  ;;  %3198 = vst.msk [vmem:[#allocation3 + $0x20] sm:$0xff] %vm466_vm2, %v3176_v18 }
 0x96c   :  { %v2912_v22 = vmul.f32 %v7113_v20, %v2895_v19 }
 0x96e   :  { %v2913_v23 = vadd.f32 %v2912_v22, %v2684_v34  ;;  %v7115_v24 = vpop.eup %7114 }
 0x96f   :  { %v2915_v27 = vsub.f32 1.0, %v7115_v24  ;;  %v2917_v28 = vmul.f32 %v7115_v24, %v8224_v60  ;;  %v8333_v60 = vld [vmem:[#allocation9 + $0x8] sm:$0xff] }
 0x970   :  { %7116 = vtanh.f32 %v2913_v23  ;;  %v8404_v23 = vld [vmem:[%s8640_s2] ss:$0 sm:$0xff] }
 0x97a   :  { %v7117_v37 = vpop.eup %7116 }
 0x97b   :  { %v2916_v29 = vmul.f32 %v7117_v37, %v2915_v27 }
 0x97d   :  { %v2918_v43 = vadd.f32 %v2917_v28, %v2916_v29 }
 0x97f   :  { %2920 = vst.msk [vmem:[#allocation5 + $0x38] sm:$0xff] %vm466_vm2, %v2918_v43  ;;  %2921 = vst.msk [vmem:[#allocation30] sm:$0xff] %vm466_vm2, %v2918_v43 }
 0x986   :  { %v2929_v30 = vld [vmem:[#allocation5 + $0x38] sm:$0xff] }
 0x987   :  { %6310 = vmatmul.mubr.msk.f32.gmra.mrb[38].mxu1 %vm466_vm2, %v2929_v30  ;;  %6330 = vmatmul.mubr.msk.f32.gmra.mrb[52].mxu0 %vm466_vm2, %v2929_v30 }
 0x988   :  { %6340 = vmatprep.mubr.msk.f32.mxu1 %vm466_vm2, %v8233_v0  ;;  %6360 = vmatprep.mubr.msk.f32.mxu0 %vm7615_vm1, %v7616_v26  ;;  %v8346_v0 = vpack.c.bf16 %v3333_v56, %v3332_v33 }
 0x98b   :  { %6341 = vmatmul.mubr.msk.f32.vlgmr.msra.gmra.mrb[40].mxu1 %vm466_vm2, %v8241_v5  ;;  %6361 = vmatmul.mubr.msk.f32.vlgmr.msra.gmra.mrb[54].mxu0 %vm466_vm2, %v8333_v60  ;;  %v8352_v5 = vpack.c.bf16 %v3337_v39, %v3336_v38 }
 0x98c   :  { %6842 = vmatpush3.bf16.msra.mxu0 %v8335_v32  ;;  %6343 = vmatprep.mubr.msk.f32.mxu1 %vm466_vm2, %v8247_v6 }
 0x98d   :  { %6843 = vmatprep.subr.bf16.mxu0 %v7614_v13  ;;  %6371 = vmatprep.mubr.msk.f32.mxu0 %vm7615_vm1, %v7616_v26 }
 0x98e   :  { %6848 = vmatpush3.bf16.msra.mxu1 %v8337_v36 }
 0x98f   :  { %6344 = vmatmul.mubr.msk.f32.gmra.mrb[42].mxu1 %vm466_vm2, %v8253_v50  ;;  %6849 = vmatprep.subr.bf16.mxu1 %v7614_v13 }
 0x990   :  { %6845 = vmatpush3.bf16.msra.mxu0 %v8346_v0  ;;  %6346 = vmatprep.mubr.msk.f32.mxu1 %vm466_vm2, %v8257_v8 }
 0x991   :  { %6852 = vmatprep.subr.bf16.mxu0 %v7614_v13 }
 0x992   :  { %6851 = vmatpush3.bf16.msra.mxu1 %v8352_v5 }
 0x993   :  { %6372 = vmatmul.mubr.msk.f32.vlgmr.msra.gmra.mrb[56].mxu0 %vm466_vm2, %v8333_v60  ;;  %6347 = vmatmul.mubr.msk.f32.gmra.mrb[44].mxu1 %vm466_vm2, %v8262_v9 }
 0x994   :  { %6349 = vmatprep.mubr.msk.f32.mxu1 %vm466_vm2, %v8268_v10  ;;  %6854 = vmatpush3.bf16.msra.mxu0 %v8282_v16 }
 0x995   :  { %6858 = vmatprep.subr.bf16.mxu1 %v7614_v13  ;;  %6855 = vmatprep.subr.bf16.mxu0 %v7614_v13 }
 0x996   :  { %6393 = vmatprep.mubr.msk.f32.mxu0 %vm7615_vm1, %v7616_v26 }
 0x997   :  { %6350 = vmatmul.mubr.msk.f32.gmra.mrb[46].mxu1 %vm466_vm2, %v2929_v30 }
 0x998   :  { %6382 = vmatprep.mubr.msk.f32.mxu1 %vm7615_vm1, %v7616_v26  ;;  %6857 = vmatpush3.bf16.msra.mxu0 %v8285_v21 }
 0x999   :  { %6864 = vmatprep.subr.bf16.mxu0 %v7614_v13 }
 0x99b   :  { %6383 = vmatmul.mubr.msk.f32.vlgmr.msra.gmra.mrb[48].mxu1 %vm466_vm2, %v8333_v60 }
 0x99c   :  { %6860 = vmatpush3.bf16.msra.mxu1 %v8335_v32  ;;  %6404 = vmatprep.mubr.msk.f32.mxu1 %vm7615_vm1, %v7616_v26 }
 0x99d   :  { %6861 = vmatprep.subr.bf16.mxu1 %v7614_v13 }
 0x9a0   :  { %6863 = vmatpush3.bf16.msra.mxu1 %v8346_v0 }
 0x9a1   :  { %6870 = vmatprep.subr.bf16.mxu1 %v7614_v13 }
 0xa5a   :  { %v6311_v6 = vpop.f32.mrb[38].mxu1  ;;  %v6331_v50 = vpop.f32.mrb[52].mxu0 }
 0xa5b   :  { %v3067_v8 = vadd.f32 %v6311_v6, %v8293_v35  ;;  %v3191_v9 = vadd.f32 %v6331_v50, %v8302_v47  ;;  %v3061_v10 = vpop.f32.mrb[39].mxu1  ;;  %v3185_v40 = vpop.f32.mrb[53].mxu0 }
 0xa5c   :  { %v3062_v15 = vadd.f32 %v8293_v35, %v3061_v10  ;;  %v3186_v25 = vadd.f32 %v8302_v47, %v3185_v40  ;;  %v3586_v10 = vld [vmem:[#allocation3 + $0x8] sm:$0xff] }
 0xa5d   :  { %3077 = vst.msk [vmem:[#allocation2 + $0x38] sm:$0xff] %vm466_vm2, %v3067_v8  ;;  %3201 = vst.msk [vmem:[#allocation3 + $0x38] sm:$0xff] %vm466_vm2, %v3191_v9 }
 0xa5e   :  { %3076 = vst.msk [vmem:[#allocation2 + $0x30] sm:$0xff] %vm466_vm2, %v3062_v15  ;;  %3200 = vst.msk [vmem:[#allocation3 + $0x30] sm:$0xff] %vm466_vm2, %v3186_v25  ;;  %v6342_v42 = vpop.f32.mrb[40].mxu1  ;;  %v3419_v45 = vpop.f32.mrb[54].mxu0 }
 0xa5f   :  { %v3285_v48 = vadd.f32 %v6342_v42, %v5555_v41  ;;  %v3563_v49 = vadd.f32 %v3419_v45, %v3347_v44  ;;  %v3279_v51 = vpop.f32.mrb[41].mxu1  ;;  %v6362_v52 = vpop.f32.mrb[55].mxu0 }
 0xa60   :  { %v3280_v54 = vadd.f32 %v5555_v41, %v3279_v51 }
 0xa61   :  { %3319 = vst.msk [vmem:[#allocation4 + $0x8] sm:$0xff] %vm466_vm2, %v3285_v48  ;;  %v5568_v35 = vmul.f32 -1.442695, %v3563_v49 }
 0xa62   :  { %3318 = vst.msk [vmem:[#allocation4] sm:$0xff] %vm466_vm2, %v3280_v54  ;;  %v6345_v47 = vpop.f32.mrb[42].mxu1 }
 0xa63   :  { %7118 = vpow2.f32 %v5568_v35  ;;  %v3295_v55 = vadd.f32 %v6345_v47, %v5555_v41  ;;  %v3289_v57 = vpop.f32.mrb[43].mxu1 }
 0xa64   :  { %v3290_v58 = vadd.f32 %v5555_v41, %v3289_v57 }
 0xa65   :  { %3321 = vst.msk [vmem:[#allocation4 + $0x18] sm:$0xff] %vm466_vm2, %v3295_v55 }
 0xa66   :  { %3320 = vst.msk [vmem:[#allocation4 + $0x10] sm:$0xff] %vm466_vm2, %v3290_v58  ;;  %v3489_v61 = vpop.f32.mrb[56].mxu0  ;;  %v6348_v62 = vpop.f32.mrb[44].mxu1 }
 0xa67   :  { %v3570_v63 = vadd.f32 %v3489_v61, %v3348_v59  ;;  %v3305_v1 = vadd.f32 %v6348_v62, %v5555_v41  ;;  %v3299_v3 = vpop.f32.mrb[45].mxu1  ;;  %v6373_v4 = vpop.f32.mrb[57].mxu0  ;;  %v3823_v62 = vld [vmem:[#allocation2 + $0x10] sm:$0xff] }
 0xa68   :  { %v3300_v46 = vadd.f32 %v5555_v41, %v3299_v3  ;;  %v3587_v54 = vld [vmem:[#allocation4 + $0x8] sm:$0xff] }
 0xa69   :  { %v5569_v11 = vmul.f32 -1.442695, %v3570_v63  ;;  %3323 = vst.msk [vmem:[#allocation4 + $0x28] sm:$0xff] %vm466_vm2, %v3305_v1  ;;  %v3349_v43 = vld [vmem:[#allocation4] sm:$0xff] }
 0xa6a   :  { %3322 = vst.msk [vmem:[#allocation4 + $0x20] sm:$0xff] %vm466_vm2, %v3300_v46  ;;  %v6351_v12 = vpop.f32.mrb[46].mxu1 }
 0xa6b   :  { %7120 = vpow2.f32 %v5569_v11  ;;  %v3315_v14 = vadd.f32 %v6351_v12, %v5555_v41  ;;  %v3309_v17 = vpop.f32.mrb[47].mxu1  ;;  %v3824_v12 = vld [vmem:[#allocation3 + $0x10] sm:$0xff] }
 0xa6c   :  { %v3310_v18 = vadd.f32 %v5555_v41, %v3309_v17 }
 0xa6d   :  { %v7119_v19 = vpop.eup %7118  ;;  %3325 = vst.msk [vmem:[#allocation4 + $0x38] sm:$0xff] %vm466_vm2, %v3315_v14 }
 0xa6e   :  { %v3567_v20 = vadd.f32 1.0, %v7119_v19  ;;  %3324 = vst.msk [vmem:[#allocation4 + $0x30] sm:$0xff] %vm466_vm2, %v3310_v18  ;;  %v3559_v34 = vpop.f32.mrb[48].mxu1 }
 0xa6f   :  { %v6384_v22 = vpop.f32.mrb[49].mxu1  ;;  %v3560_v37 = vadd.f32 %v8404_v23, %v3559_v34 }
 0xa70   :  { %7122 = vrcp.f32 %v3567_v20 }
 0xa75   :  { %v7121_v24 = vpop.eup %7120 }
 0xa76   :  { %v3574_v27 = vadd.f32 1.0, %v7121_v24 }
 0xa78   :  { %7124 = vrcp.f32 %v3574_v27 }
 0xa7a   :  { %v7123_v28 = vpop.eup %7122 }
 0xa7b   :  { %v3577_v29 = vmul.f32 %v7123_v28, %v3560_v37 }
 0xa7d   :  { %v3578_v7 = vadd.f32 %v3577_v29, %v3349_v43  ;;  %v3825_v29 = vld [vmem:[#allocation4 + $0x10] sm:$0xff] }
 0xa7f   :  { %7126 = vtanh.f32 %v3578_v7 }
 0xa82   :  { %v7125_v53 = vpop.eup %7124 }
 0xa83   :  { %v3580_v30 = vsub.f32 1.0, %v7125_v53  ;;  %v3582_v33 = vmul.f32 %v7125_v53, %v8333_v60  ;;  %v3585_v60 = vld [vmem:[#allocation2 + $0x8] sm:$0xff] }
 0xa89   :  { %v7127_v2 = vpop.eup %7126 }
 0xa8a   :  { %v3581_v31 = vmul.f32 %v7127_v2, %v3580_v30 }
 0xa8c   :  { %v3583_v56 = vadd.f32 %v3582_v33, %v3581_v31 }
 0xa8e   :  { %3584 = vst.msk [vmem:[#allocation5] sm:$0xff] %vm466_vm2, %v3583_v56  ;;  %6394 = vmatmul.mubr.msk.f32.vlgmr.msra.gmra.mrb[58].mxu0 %vm466_vm2, %v3583_v56  ;;  %6405 = vmatmul.mubr.msk.f32.vlgmr.msra.gmra.mrb[50].mxu1 %vm466_vm2, %v3583_v56 }
 0xa8f   :  { %6866 = vmatpush3.bf16.msra.mxu0 %v8337_v36  ;;  %6415 = vmatprep.mubr.msk.f32.mxu0 %vm7615_vm1, %v7616_v26 }
 0xa90   :  { %6867 = vmatprep.subr.bf16.mxu0 %v7614_v13  ;;  %6872 = vmatpush3.bf16.msra.mxu1 %v8282_v16 }
 0xa91   :  { %6873 = vmatprep.subr.bf16.mxu1 %v7614_v13  ;;  %6426 = vmatprep.mubr.msk.f32.mxu1 %vm7615_vm1, %v7616_v26 }
 0xa93   :  { %6869 = vmatpush3.bf16.msra.mxu0 %v8352_v5 }
 0xa94   :  { %6876 = vmatprep.subr.bf16.mxu0 %v7614_v13  ;;  %6875 = vmatpush3.bf16.msra.mxu1 %v8285_v21 }
 0xa95   :  { %6882 = vmatprep.subr.bf16.mxu1 %v7614_v13 }
 0xa96   :  { %6416 = vmatmul.mubr.msk.f32.vlgmr.msra.gmra.mrb[60].mxu0 %vm466_vm2, %v3583_v56 }
 0xa97   :  { %6878 = vmatpush3.bf16.msra.mxu0 %v8335_v32  ;;  %6437 = vmatprep.mubr.msk.f32.mxu0 %vm7615_vm1, %v7616_v26 }
 0xa98   :  { %6879 = vmatprep.subr.bf16.mxu0 %v7614_v13 }
 0xa9b   :  { %6881 = vmatpush3.bf16.msra.mxu0 %v8346_v0 }
 0xa9c   :  { %6888 = vmatprep.subr.bf16.mxu0 %v7614_v13 }
 0xb61   :  { %v3657_v38 = vpop.f32.mrb[58].mxu0  ;;  %v3727_v39 = vpop.f32.mrb[50].mxu1 }
 0xb62   :  { %v3801_v6 = vadd.f32 %v3657_v38, %v3585_v60  ;;  %v6395_v50 = vpop.f32.mrb[59].mxu0  ;;  %v6406_v8 = vpop.f32.mrb[51].mxu1  ;;  %v3808_v40 = vadd.f32 %v3727_v39, %v3586_v10 }
 0xb64   :  { %v5573_v9 = vmul.f32 -1.442695, %v3801_v6  ;;  %v5574_v15 = vmul.f32 -1.442695, %v3808_v40 }
 0xb66   :  { %7128 = vpow2.f32 %v5573_v9  ;;  %v4062_v9 = vld [vmem:[#allocation3 + $0x18] sm:$0xff] }
 0xb67   :  { %7130 = vpow2.f32 %v5574_v15 }
 0xb69   :  { %v3797_v25 = vpop.f32.mrb[60].mxu0 }
 0xb6a   :  { %v6417_v41 = vpop.f32.mrb[61].mxu0  ;;  %v3798_v49 = vadd.f32 %v8404_v23, %v3797_v25 }
 0xb70   :  { %v7129_v42 = vpop.eup %7128 }
 0xb71   :  { %v3805_v44 = vadd.f32 1.0, %v7129_v42  ;;  %v7131_v45 = vpop.eup %7130 }
 0xb72   :  { %v3812_v48 = vadd.f32 1.0, %v7131_v45 }
 0xb73   :  { %7132 = vrcp.f32 %v3805_v44 }
 0xb74   :  { %7134 = vrcp.f32 %v3812_v48 }
 0xb7d   :  { %v7133_v51 = vpop.eup %7132 }
 0xb7e   :  { %v3815_v52 = vmul.f32 %v7133_v51, %v3798_v49  ;;  %v7135_v47 = vpop.eup %7134 }
 0xb7f   :  { %v3818_v55 = vsub.f32 1.0, %v7135_v47  ;;  %v3820_v59 = vmul.f32 %v7135_v47, %v3583_v56  ;;  %v4061_v56 = vld [vmem:[#allocation2 + $0x18] sm:$0xff] }
 0xb80   :  { %v3816_v35 = vadd.f32 %v3815_v52, %v3587_v54  ;;  %v4063_v52 = vld [vmem:[#allocation4 + $0x18] sm:$0xff] }
 0xb82   :  { %7136 = vtanh.f32 %v3816_v35 }
 0xb8c   :  { %v7137_v57 = vpop.eup %7136 }
 0xb8d   :  { %v3819_v58 = vmul.f32 %v7137_v57, %v3818_v55 }
 0xb8f   :  { %v3821_v61 = vadd.f32 %v3820_v59, %v3819_v58 }
 0xb91   :  { %3822 = vst.msk [vmem:[#allocation5 + $0x8] sm:$0xff] %vm466_vm2, %v3821_v61  ;;  %6427 = vmatmul.mubr.msk.f32.vlgmr.msra.gmra.mrb[52].mxu1 %vm466_vm2, %v3821_v61  ;;  %6438 = vmatmul.mubr.msk.f32.vlgmr.msra.gmra.mrb[62].mxu0 %vm466_vm2, %v3821_v61 }
 0xb92   :  { %6884 = vmatpush3.bf16.msra.mxu1 %v8337_v36  ;;  %6448 = vmatprep.mubr.msk.f32.mxu1 %vm7615_vm1, %v7616_v26 }
 0xb93   :  { %6885 = vmatprep.subr.bf16.mxu1 %v7614_v13  ;;  %6890 = vmatpush3.bf16.msra.mxu0 %v8282_v16 }
 0xb94   :  { %6891 = vmatprep.subr.bf16.mxu0 %v7614_v13  ;;  %6459 = vmatprep.mubr.msk.f32.mxu0 %vm7615_vm1, %v7616_v26 }
 0xb96   :  { %6887 = vmatpush3.bf16.msra.mxu1 %v8352_v5 }
 0xb97   :  { %6894 = vmatprep.subr.bf16.mxu1 %v7614_v13  ;;  %6893 = vmatpush3.bf16.msra.mxu0 %v8285_v21 }
 0xb98   :  { %6900 = vmatprep.subr.bf16.mxu0 %v7614_v13 }
 0xb99   :  { %6449 = vmatmul.mubr.msk.f32.vlgmr.msra.gmra.mrb[54].mxu1 %vm466_vm2, %v3821_v61 }
 0xb9a   :  { %6896 = vmatpush3.bf16.msra.mxu1 %v8335_v32  ;;  %6470 = vmatprep.mubr.msk.f32.mxu1 %vm7615_vm1, %v7616_v26 }
 0xb9b   :  { %6897 = vmatprep.subr.bf16.mxu1 %v7614_v13 }
 0xb9e   :  { %6899 = vmatpush3.bf16.msra.mxu1 %v8346_v0 }
 0xb9f   :  { %6906 = vmatprep.subr.bf16.mxu1 %v7614_v13 }
 0xc64   :  { %v3895_v63 = vpop.f32.mrb[52].mxu1  ;;  %v3965_v1 = vpop.f32.mrb[62].mxu0 }
 0xc65   :  { %v4039_v3 = vadd.f32 %v3895_v63, %v3823_v62  ;;  %v6428_v4 = vpop.f32.mrb[53].mxu1  ;;  %v6439_v46 = vpop.f32.mrb[63].mxu0  ;;  %v4046_v14 = vadd.f32 %v3965_v1, %v3824_v12 }
 0xc67   :  { %v5578_v11 = vmul.f32 -1.442695, %v4039_v3  ;;  %v5579_v17 = vmul.f32 -1.442695, %v4046_v14 }
 0xc69   :  { %7138 = vpow2.f32 %v5578_v11  ;;  %v4300_v11 = vld [vmem:[#allocation3 + $0x20] sm:$0xff] }
 0xc6a   :  { %7140 = vpow2.f32 %v5579_v17 }
 0xc6c   :  { %v4035_v18 = vpop.f32.mrb[54].mxu1 }
 0xc6d   :  { %v6450_v19 = vpop.f32.mrb[55].mxu1  ;;  %v4036_v27 = vadd.f32 %v8404_v23, %v4035_v18 }
 0xc73   :  { %v7139_v20 = vpop.eup %7138 }
 0xc74   :  { %v4043_v34 = vadd.f32 1.0, %v7139_v20  ;;  %v7141_v22 = vpop.eup %7140 }
 0xc75   :  { %v4050_v24 = vadd.f32 1.0, %v7141_v22 }
 0xc76   :  { %7142 = vrcp.f32 %v4043_v34 }
 0xc77   :  { %7144 = vrcp.f32 %v4050_v24 }
 0xc80   :  { %v7143_v37 = vpop.eup %7142 }
 0xc81   :  { %v4053_v28 = vmul.f32 %v7143_v37, %v4036_v27  ;;  %v7145_v7 = vpop.eup %7144 }
 0xc82   :  { %v4056_v53 = vsub.f32 1.0, %v7145_v7  ;;  %v4058_v31 = vmul.f32 %v7145_v7, %v3821_v61  ;;  %v4299_v61 = vld [vmem:[#allocation2 + $0x20] sm:$0xff] }
 0xc83   :  { %v4054_v43 = vadd.f32 %v4053_v28, %v3825_v29  ;;  %v4301_v28 = vld [vmem:[#allocation4 + $0x20] sm:$0xff] }
 0xc85   :  { %7146 = vtanh.f32 %v4054_v43 }
 0xc8f   :  { %v7147_v30 = vpop.eup %7146 }
 0xc90   :  { %v4057_v2 = vmul.f32 %v7147_v30, %v4056_v53 }
 0xc92   :  { %v4059_v33 = vadd.f32 %v4058_v31, %v4057_v2 }
 0xc94   :  { %4060 = vst.msk [vmem:[#allocation5 + $0x10] sm:$0xff] %vm466_vm2, %v4059_v33  ;;  %6460 = vmatmul.mubr.msk.f32.vlgmr.msra.gmra.mrb[64].mxu0 %vm466_vm2, %v4059_v33  ;;  %6471 = vmatmul.mubr.msk.f32.vlgmr.msra.gmra.mrb[56].mxu1 %vm466_vm2, %v4059_v33 }
 0xc95   :  { %6902 = vmatpush3.bf16.msra.mxu0 %v8337_v36  ;;  %6481 = vmatprep.mubr.msk.f32.mxu0 %vm7615_vm1, %v7616_v26 }
 0xc96   :  { %6903 = vmatprep.subr.bf16.mxu0 %v7614_v13  ;;  %6908 = vmatpush3.bf16.msra.mxu1 %v8282_v16 }
 0xc97   :  { %6909 = vmatprep.subr.bf16.mxu1 %v7614_v13  ;;  %6492 = vmatprep.mubr.msk.f32.mxu1 %vm7615_vm1, %v7616_v26 }
 0xc99   :  { %6905 = vmatpush3.bf16.msra.mxu0 %v8352_v5 }
 0xc9a   :  { %6912 = vmatprep.subr.bf16.mxu0 %v7614_v13  ;;  %6911 = vmatpush3.bf16.msra.mxu1 %v8285_v21 }
 0xc9b   :  { %6918 = vmatprep.subr.bf16.mxu1 %v7614_v13 }
 0xc9c   :  { %6482 = vmatmul.mubr.msk.f32.vlgmr.msra.gmra.mrb[66].mxu0 %vm466_vm2, %v4059_v33 }
 0xc9d   :  { %6914 = vmatpush3.bf16.msra.mxu0 %v8335_v32  ;;  %6503 = vmatprep.mubr.msk.f32.mxu0 %vm7615_vm1, %v7616_v26 }
 0xc9e   :  { %6915 = vmatprep.subr.bf16.mxu0 %v7614_v13 }
 0xca1   :  { %6917 = vmatpush3.bf16.msra.mxu0 %v8346_v0 }
 0xca2   :  { %6924 = vmatprep.subr.bf16.mxu0 %v7614_v13 }
 0xd67   :  { %v4133_v60 = vpop.f32.mrb[64].mxu0  ;;  %v4203_v38 = vpop.f32.mrb[56].mxu1 }
 0xd68   :  { %v4277_v39 = vadd.f32 %v4133_v60, %v4061_v56  ;;  %v6461_v6 = vpop.f32.mrb[65].mxu0  ;;  %v6472_v50 = vpop.f32.mrb[57].mxu1  ;;  %v4284_v10 = vadd.f32 %v4203_v38, %v4062_v9 }
 0xd6a   :  { %v5583_v8 = vmul.f32 -1.442695, %v4277_v39  ;;  %v5584_v40 = vmul.f32 -1.442695, %v4284_v10 }
 0xd6c   :  { %7148 = vpow2.f32 %v5583_v8  ;;  %v4538_v8 = vld [vmem:[#allocation3 + $0x28] sm:$0xff] }
 0xd6d   :  { %7150 = vpow2.f32 %v5584_v40 }
 0xd6f   :  { %v4273_v15 = vpop.f32.mrb[66].mxu0 }
 0xd70   :  { %v6483_v25 = vpop.f32.mrb[67].mxu0  ;;  %v4274_v48 = vadd.f32 %v8404_v23, %v4273_v15 }
 0xd76   :  { %v7149_v41 = vpop.eup %7148 }
 0xd77   :  { %v4281_v42 = vadd.f32 1.0, %v7149_v41  ;;  %v7151_v44 = vpop.eup %7150 }
 0xd78   :  { %v4288_v45 = vadd.f32 1.0, %v7151_v44 }
 0xd79   :  { %7152 = vrcp.f32 %v4281_v42 }
 0xd7a   :  { %7154 = vrcp.f32 %v4288_v45 }
 0xd83   :  { %v7153_v49 = vpop.eup %7152 }
 0xd84   :  { %v4291_v51 = vmul.f32 %v7153_v49, %v4274_v48  ;;  %v7155_v35 = vpop.eup %7154 }
 0xd85   :  { %v4294_v47 = vsub.f32 1.0, %v7155_v35  ;;  %v4296_v58 = vmul.f32 %v7155_v35, %v4059_v33  ;;  %v4537_v33 = vld [vmem:[#allocation2 + $0x28] sm:$0xff] }
 0xd86   :  { %v4292_v54 = vadd.f32 %v4291_v51, %v4063_v52  ;;  %v4539_v51 = vld [vmem:[#allocation4 + $0x28] sm:$0xff] }
 0xd88   :  { %7156 = vtanh.f32 %v4292_v54 }
 0xd92   :  { %v7157_v55 = vpop.eup %7156 }
 0xd93   :  { %v4295_v57 = vmul.f32 %v7157_v55, %v4294_v47 }
 0xd95   :  { %v4297_v59 = vadd.f32 %v4296_v58, %v4295_v57 }
 0xd97   :  { %4298 = vst.msk [vmem:[#allocation5 + $0x18] sm:$0xff] %vm466_vm2, %v4297_v59  ;;  %6493 = vmatmul.mubr.msk.f32.vlgmr.msra.gmra.mrb[58].mxu1 %vm466_vm2, %v4297_v59  ;;  %6504 = vmatmul.mubr.msk.f32.vlgmr.msra.gmra.mrb[68].mxu0 %vm466_vm2, %v4297_v59 }
 0xd98   :  { %6920 = vmatpush3.bf16.msra.mxu1 %v8337_v36  ;;  %6514 = vmatprep.mubr.msk.f32.mxu1 %vm7615_vm1, %v7616_v26 }
 0xd99   :  { %6921 = vmatprep.subr.bf16.mxu1 %v7614_v13  ;;  %6926 = vmatpush3.bf16.msra.mxu0 %v8282_v16 }
 0xd9a   :  { %6927 = vmatprep.subr.bf16.mxu0 %v7614_v13  ;;  %6525 = vmatprep.mubr.msk.f32.mxu0 %vm7615_vm1, %v7616_v26 }
 0xd9c   :  { %6923 = vmatpush3.bf16.msra.mxu1 %v8352_v5 }
 0xd9d   :  { %6930 = vmatprep.subr.bf16.mxu1 %v7614_v13  ;;  %6929 = vmatpush3.bf16.msra.mxu0 %v8285_v21 }
 0xd9e   :  { %6936 = vmatprep.subr.bf16.mxu0 %v7614_v13 }
 0xd9f   :  { %6515 = vmatmul.mubr.msk.f32.vlgmr.msra.gmra.mrb[60].mxu1 %vm466_vm2, %v4297_v59 }
 0xda0   :  { %6932 = vmatpush3.bf16.msra.mxu1 %v8335_v32  ;;  %6536 = vmatprep.mubr.msk.f32.mxu1 %vm7615_vm1, %v7616_v26 }
 0xda1   :  { %6933 = vmatprep.subr.bf16.mxu1 %v7614_v13 }
 0xda4   :  { %6935 = vmatpush3.bf16.msra.mxu1 %v8346_v0 }
 0xda5   :  { %6942 = vmatprep.subr.bf16.mxu1 %v7614_v13 }
 0xe6a   :  { %v4371_v62 = vpop.f32.mrb[58].mxu1  ;;  %v4441_v63 = vpop.f32.mrb[68].mxu0 }
 0xe6b   :  { %v4515_v1 = vadd.f32 %v4371_v62, %v4299_v61  ;;  %v6494_v3 = vpop.f32.mrb[59].mxu1  ;;  %v6505_v4 = vpop.f32.mrb[69].mxu0  ;;  %v4522_v12 = vadd.f32 %v4441_v63, %v4300_v11  ;;  %v4775_v62 = vld [vmem:[#allocation2 + $0x30] sm:$0xff] }
 0xe6c   :  { %v4776_v11 = vld [vmem:[#allocation3 + $0x30] sm:$0xff] }
 0xe6d   :  { %v5588_v46 = vmul.f32 -1.442695, %v4515_v1  ;;  %v5589_v14 = vmul.f32 -1.442695, %v4522_v12 }
 0xe6f   :  { %7158 = vpow2.f32 %v5588_v46 }
 0xe70   :  { %7160 = vpow2.f32 %v5589_v14 }
 0xe72   :  { %v4511_v17 = vpop.f32.mrb[60].mxu1 }
 0xe73   :  { %v6516_v18 = vpop.f32.mrb[61].mxu1  ;;  %v4512_v24 = vadd.f32 %v8404_v23, %v4511_v17 }
 0xe79   :  { %v7159_v19 = vpop.eup %7158 }
 0xe7a   :  { %v4519_v20 = vadd.f32 1.0, %v7159_v19  ;;  %v7161_v34 = vpop.eup %7160 }
 0xe7b   :  { %v4526_v22 = vadd.f32 1.0, %v7161_v34 }
 0xe7c   :  { %7162 = vrcp.f32 %v4519_v20 }
 0xe7d   :  { %7164 = vrcp.f32 %v4526_v22 }
 0xe86   :  { %v7163_v27 = vpop.eup %7162 }
 0xe87   :  { %v4529_v37 = vmul.f32 %v7163_v27, %v4512_v24  ;;  %v7165_v43 = vpop.eup %7164  ;;  %v4777_v27 = vld [vmem:[#allocation4 + $0x30] sm:$0xff] }
 0xe88   :  { %v4532_v7 = vsub.f32 1.0, %v7165_v43  ;;  %v4534_v2 = vmul.f32 %v7165_v43, %v4297_v59  ;;  %v5262_v59 = vld [vmem:[%s7756_s8 + $0x8] sm:$0xff] }
 0xe89   :  { %v4530_v29 = vadd.f32 %v4529_v37, %v4301_v28 }
 0xe8b   :  { %7166 = vtanh.f32 %v4530_v29 }
 0xe95   :  { %v7167_v53 = vpop.eup %7166 }
 0xe96   :  { %v4533_v30 = vmul.f32 %v7167_v53, %v4532_v7 }
 0xe98   :  { %v4535_v31 = vadd.f32 %v4534_v2, %v4533_v30  ;;  %v5263_v30 = vld [vmem:[%s7756_s8 + $0x10] sm:$0xff]  ;;  %v5264_v2 = vld [vmem:[%s7756_s8 + $0x18] sm:$0xff] }
 0xe9a   :  { %4536 = vst.msk [vmem:[#allocation5 + $0x20] sm:$0xff] %vm466_vm2, %v4535_v31  ;;  %6526 = vmatmul.mubr.msk.f32.vlgmr.msra.gmra.mrb[70].mxu0 %vm466_vm2, %v4535_v31  ;;  %6537 = vmatmul.mubr.msk.f32.vlgmr.msra.gmra.mrb[62].mxu1 %vm466_vm2, %v4535_v31 }
 0xe9b   :  { %6938 = vmatpush3.bf16.msra.mxu0 %v8337_v36  ;;  %6547 = vmatprep.mubr.msk.f32.mxu0 %vm7615_vm1, %v7616_v26 }
 0xe9c   :  { %6939 = vmatprep.subr.bf16.mxu0 %v7614_v13  ;;  %6944 = vmatpush3.bf16.msra.mxu1 %v8282_v16 }
 0xe9d   :  { %6945 = vmatprep.subr.bf16.mxu1 %v7614_v13  ;;  %6558 = vmatprep.mubr.msk.f32.mxu1 %vm7615_vm1, %v7616_v26 }
 0xe9f   :  { %6941 = vmatpush3.bf16.msra.mxu0 %v8352_v5 }
 0xea0   :  { %6948 = vmatprep.subr.bf16.mxu0 %v7614_v13  ;;  %6947 = vmatpush3.bf16.msra.mxu1 %v8285_v21 }
 0xea1   :  { %6954 = vmatprep.subr.bf16.mxu1 %v7614_v13 }
 0xea2   :  { %6548 = vmatmul.mubr.msk.f32.vlgmr.msra.gmra.mrb[72].mxu0 %vm466_vm2, %v4535_v31 }
 0xea3   :  { %6950 = vmatpush3.bf16.msra.mxu0 %v8335_v32  ;;  %6569 = vmatprep.mubr.msk.f32.mxu0 %vm7615_vm1, %v7616_v26 }
 0xea4   :  { %6951 = vmatprep.subr.bf16.mxu0 %v7614_v13 }
 0xea7   :  { %6953 = vmatpush3.bf16.msra.mxu0 %v8346_v0 }
 0xea8   :  { %6960 = vmatprep.subr.bf16.mxu0 %v7614_v13 }
 0xf6d   :  { %v4609_v56 = vpop.f32.mrb[70].mxu0  ;;  %v4679_v60 = vpop.f32.mrb[62].mxu1 }
 0xf6e   :  { %v4753_v38 = vadd.f32 %v4609_v56, %v4537_v33  ;;  %v6527_v39 = vpop.f32.mrb[71].mxu0  ;;  %v6538_v6 = vpop.f32.mrb[63].mxu1  ;;  %v4760_v9 = vadd.f32 %v4679_v60, %v4538_v8  ;;  %v6982_v33 = vpack.c.bf16 %v5264_v2, %v5263_v30  ;;  %v5253_v56 = vld [vmem:[#allocation5] sm:$0xff]  ;;  %v5254_v60 = vld [vmem:[#allocation5 + $0x8] sm:$0xff] }
 0xf6f   :  { %v5013_v39 = vld [vmem:[#allocation2 + $0x38] sm:$0xff] }
 0xf70   :  { %v5593_v50 = vmul.f32 -1.442695, %v4753_v38  ;;  %v5594_v10 = vmul.f32 -1.442695, %v4760_v9  ;;  %v5256_v38 = vld [vmem:[#allocation5 + $0x18] sm:$0xff] }
 0xf72   :  { %7168 = vpow2.f32 %v5593_v50 }
 0xf73   :  { %7170 = vpow2.f32 %v5594_v10 }
 0xf75   :  { %v4749_v40 = vpop.f32.mrb[72].mxu0 }
 0xf76   :  { %v6549_v15 = vpop.f32.mrb[73].mxu0  ;;  %v4750_v45 = vadd.f32 %v8404_v23, %v4749_v40 }
 0xf77   :  { %v5014_v15 = vld [vmem:[#allocation3 + $0x38] sm:$0xff] }
 0xf7c   :  { %v7169_v25 = vpop.eup %7168 }
 0xf7d   :  { %v4757_v41 = vadd.f32 1.0, %v7169_v25  ;;  %v7171_v42 = vpop.eup %7170 }
 0xf7e   :  { %v4764_v44 = vadd.f32 1.0, %v7171_v42 }
 0xf7f   :  { %7172 = vrcp.f32 %v4757_v41  ;;  %v8572_v41 = vld [vmem:[%s7761_s3] ss:$0 sm:$0xff]  ;;  %s7617_s3 = smov [#allocation30]  }
 0xf80   :  { %7174 = vrcp.f32 %v4764_v44 }
 0xf89   :  { %v7173_v48 = vpop.eup %7172 }
 0xf8a   :  { %v4767_v49 = vmul.f32 %v7173_v48, %v4750_v45  ;;  %v7175_v54 = vpop.eup %7174 }
 0xf8b   :  { %v4770_v35 = vsub.f32 1.0, %v7175_v54  ;;  %v4772_v57 = vmul.f32 %v7175_v54, %v4535_v31 }
 0xf8c   :  { %v4768_v52 = vadd.f32 %v4767_v49, %v4539_v51 }
 0xf8e   :  { %7176 = vtanh.f32 %v4768_v52 }
 0xf98   :  { %v7177_v47 = vpop.eup %7176 }
 0xf99   :  { %v4771_v55 = vmul.f32 %v7177_v47, %v4770_v35 }
 0xf9b   :  { %v4773_v58 = vadd.f32 %v4772_v57, %v4771_v55 }
 0xf9d   :  { %4774 = vst.msk [vmem:[#allocation5 + $0x28] sm:$0xff] %vm466_vm2, %v4773_v58  ;;  %6559 = vmatmul.mubr.msk.f32.vlgmr.msra.gmra.mrb[64].mxu1 %vm466_vm2, %v4773_v58  ;;  %6570 = vmatmul.mubr.msk.f32.vlgmr.msra.gmra.mrb[74].mxu0 %vm466_vm2, %v4773_v58 }
 0xf9e   :  { %6956 = vmatpush3.bf16.msra.mxu1 %v8337_v36  ;;  %6580 = vmatprep.mubr.msk.f32.mxu1 %vm7615_vm1, %v7616_v26 }
 0xf9f   :  { %6957 = vmatprep.subr.bf16.mxu1 %v7614_v13  ;;  %6962 = vmatpush3.bf16.msra.mxu0 %v8282_v16  ;;  %v5261_v16 = vld [vmem:[%s7756_s8] sm:$0xff]  ;;  %s5416_s8 = sshll.u32 %s7617_s3, 4  ;;  %s5417_s8 = int_to_ptr.vmem [resolvable:$true] %s5416_s8 }
 0xfa0   :  { %6963 = vmatprep.subr.bf16.mxu0 %v7614_v13  ;;  %6591 = vmatprep.mubr.msk.f32.mxu0 %vm7615_vm1, %v7616_v26  ;;  %v6978_v61 = vpack.c.bf16 %v5262_v59, %v5261_v16  ;;  %s7528_s20 = scalar_lea.vmem %s5417_s8, 256  ;;  %p7533_p9 = scmp.lt.s32.totalorder %s5417_s8, %s5417_s8 }
 0xfa1   :  { %p7529_p8 = scmp.ne.s32.totalorder %s5417_s8, %s7528_s20  ;;  %p7534_p10 = scmp.lt.s32.totalorder %s7528_s20, %s7528_s20 }
 0xfa2   :  { %6959 = vmatpush3.bf16.msra.mxu1 %v8352_v5 }
 0xfa3   :  { %6966 = vmatprep.subr.bf16.mxu1 %v7614_v13  ;;  %6965 = vmatpush3.bf16.msra.mxu0 %v8285_v21  ;;  %p7535_p11 = por %p7534_p10, %p7533_p9 }
 0xfa4   :  { %6972 = vmatprep.subr.bf16.mxu0 %v7614_v13 }
 0xfa5   :  { %6581 = vmatmul.mubr.msk.f32.vlgmr.msra.gmra.mrb[66].mxu1 %vm466_vm2, %v4773_v58  ;;  %p7536_p12 = pnand %p7535_p11, %p7529_p8 }
 0xfa6   :  { %6968 = vmatpush3.bf16.msra.mxu1 %v8335_v32  ;;  %6602 = vmatprep.mubr.msk.f32.mxu1 %vm7615_vm1, %v7616_v26 }
 0xfa7   :  { %6969 = vmatprep.subr.bf16.mxu1 %v7614_v13 }
 0xfaa   :  { %6971 = vmatpush3.bf16.msra.mxu1 %v8346_v0 }
 0xfab   :  { %6979 = vmatprep.subr.bf16.mxu1 %v6978_v61 }
0x1070   :  { %v4847_v63 = vpop.f32.mrb[64].mxu1  ;;  %v4917_v21 = vpop.f32.mrb[74].mxu0 }
0x1071   :  { %v4991_v1 = vadd.f32 %v4847_v63, %v4775_v62  ;;  %v6560_v3 = vpop.f32.mrb[65].mxu1  ;;  %v6571_v4 = vpop.f32.mrb[75].mxu0  ;;  %v4998_v32 = vadd.f32 %v4917_v21, %v4776_v11 }
0x1073   :  { %v5598_v46 = vmul.f32 -1.442695, %v4991_v1  ;;  %v5599_v12 = vmul.f32 -1.442695, %v4998_v32 }
0x1075   :  { %7178 = vpow2.f32 %v5598_v46  ;;  %v5015_v46 = vld [vmem:[#allocation4 + $0x38] sm:$0xff] }
0x1076   :  { %7180 = vpow2.f32 %v5599_v12 }
0x1078   :  { %v4987_v14 = vpop.f32.mrb[66].mxu1 }
0x1079   :  { %v6582_v17 = vpop.f32.mrb[67].mxu1  ;;  %v4988_v34 = vadd.f32 %v8404_v23, %v4987_v14 }
0x107f   :  { %v7179_v18 = vpop.eup %7178 }
0x1080   :  { %v4995_v0 = vadd.f32 1.0, %v7179_v18  ;;  %v7181_v19 = vpop.eup %7180 }
0x1081   :  { %v5002_v20 = vadd.f32 1.0, %v7181_v19 }
0x1082   :  { %7182 = vrcp.f32 %v4995_v0 }
0x1083   :  { %7184 = vrcp.f32 %v5002_v20 }
0x108c   :  { %v7183_v22 = vpop.eup %7182 }
0x108d   :  { %v5005_v24 = vmul.f32 %v7183_v22, %v4988_v34  ;;  %v7185_v28 = vpop.eup %7184 }
0x108e   :  { %v5008_v29 = vsub.f32 1.0, %v7185_v28  ;;  %v5010_v53 = vmul.f32 %v7185_v28, %v4773_v58 }
0x108f   :  { %v5006_v37 = vadd.f32 %v5005_v24, %v4777_v27 }
0x1091   :  { %7186 = vtanh.f32 %v5006_v37 }
0x109b   :  { %v7187_v43 = vpop.eup %7186 }
0x109c   :  { %v5009_v7 = vmul.f32 %v7187_v43, %v5008_v29 }
0x109e   :  { %v8549_v31 = vadd.f32 %v5010_v53, %v5009_v7 }
0x10a0   :  { %5012 = vst.msk [vmem:[#allocation5 + $0x30] sm:$0xff] %vm466_vm2, %v8549_v31  ;;  %6592 = vmatmul.mubr.msk.f32.vlgmr.msra.gmra.mrb[76].mxu0 %vm466_vm2, %v8549_v31  ;;  %6603 = vmatmul.mubr.msk.f32.vlgmr.msra.gmra.mrb[68].mxu1 %vm466_vm2, %v8549_v31 }
0x10a1   :  { %6974 = vmatpush3.bf16.msra.mxu0 %v8337_v36  ;;  %6981 = vmatpush3.bf16.msra.mxu1 %v6978_v61  ;;  %v5255_v36 = vld [vmem:[#allocation5 + $0x10] sm:$0xff] }
0x10a2   :  { %6624 = vmatprep.mubr.msk.f32.mxu1 %vm466_vm2, %v5253_v56  ;;  %6975 = vmatprep.subr.bf16.mxu0 %v7614_v13  ;;  %v5257_v13 = vld [vmem:[#allocation5 + $0x20] sm:$0xff] }
0x10a3   :  { %6983 = vmatprep.subr.bf16.mxu1 %v6982_v33  ;;  %6613 = vmatprep.mubr.msk.f32.mxu0 %vm7615_vm1, %v7616_v26  ;;  %v5258_v26 = vld [vmem:[#allocation5 + $0x28] sm:$0xff] }
0x10a5   :  { %6977 = vmatpush3.bf16.msra.mxu0 %v8352_v5  ;;  %6985 = vmatpush3.bf16.msra.mxu1 %v6982_v33 }
0x10a7   :  { %v5259_v5 = vld [vmem:[#allocation5 + $0x30] sm:$0xff] }
0x10a8   :  { %6614 = vmatmul.mubr.msk.f32.vlgmr.msra.gmra.mrb[78].mxu0 %vm466_vm2, %v8549_v31  ;;  %6625 = vmatmul.mubr.msk.f32.vlgmr.msra.gmra.mrb[70].mxu1 %vm466_vm2, %v5254_v60 }
0x10a9   :  { %6627 = vmatprep.mubr.msk.f32.mxu1 %vm466_vm2, %v5255_v36 }
0x10ac   :  { %6628 = vmatmul.mubr.msk.f32.gmra.mrb[72].mxu1 %vm466_vm2, %v5256_v38 }
0x10ad   :  { %6630 = vmatprep.mubr.msk.f32.mxu1 %vm466_vm2, %v5257_v13 }
0x10b0   :  { %6631 = vmatmul.mubr.msk.f32.gmra.mrb[74].mxu1 %vm466_vm2, %v5258_v26 }
0x10b1   :  { %6633 = vmatprep.mubr.msk.f32.mxu1 %vm466_vm2, %v5259_v5 }
0x1173   :  { %v5085_v6 = vpop.f32.mrb[76].mxu0  ;;  %v5155_v50 = vpop.f32.mrb[68].mxu1 }
0x1174   :  { %v5229_v8 = vadd.f32 %v5085_v6, %v5013_v39  ;;  %v6593_v9 = vpop.f32.mrb[77].mxu0  ;;  %v6604_v10 = vpop.f32.mrb[69].mxu1  ;;  %v5236_v25 = vadd.f32 %v5155_v50, %v5014_v15 }
0x1176   :  { %v5603_v40 = vmul.f32 -1.442695, %v5229_v8  ;;  %v5604_v42 = vmul.f32 -1.442695, %v5236_v25 }
0x1178   :  { %7188 = vpow2.f32 %v5603_v40 }
0x1179   :  { %7190 = vpow2.f32 %v5604_v42 }
0x117b   :  { %v5225_v44 = vpop.f32.mrb[78].mxu0  ;;  %v6626_v45 = vpop.f32.mrb[70].mxu1 }
0x117c   :  { %v5368_v48 = vadd.f32 %v6626_v45, %v8572_v41  ;;  %v6615_v49 = vpop.f32.mrb[79].mxu0  ;;  %v5362_v51 = vpop.f32.mrb[71].mxu1  ;;  %v5226_v1 = vadd.f32 %v8404_v23, %v5225_v44 }
0x117d   :  { %v5363_v52 = vadd.f32 %v8572_v41, %v5362_v51 }
0x117e   :  { %5402 = vst.msk [vmem:[%s7766_s29 + $0x8] sm:$0xff] %vm466_vm2, %v5368_v48 }
0x117f   :  { %5401 = vst.msk [vmem:[%s7766_s29] sm:$0xff] %vm466_vm2, %v5363_v52  ;;  %v6629_v54 = vpop.f32.mrb[72].mxu1 }
0x1180   :  { %v5378_v35 = vadd.f32 %v6629_v54, %v8572_v41  ;;  %v5372_v47 = vpop.f32.mrb[73].mxu1 }
0x1181   :  { %v5373_v55 = vadd.f32 %v8572_v41, %v5372_v47 }
0x1182   :  { %v7189_v57 = vpop.eup %7188  ;;  %5404 = vst.msk [vmem:[%s7766_s29 + $0x18] sm:$0xff] %vm466_vm2, %v5378_v35 }
0x1183   :  { %v5233_v58 = vadd.f32 1.0, %v7189_v57  ;;  %5403 = vst.msk [vmem:[%s7766_s29 + $0x10] sm:$0xff] %vm466_vm2, %v5373_v55  ;;  %v6632_v16 = vpop.f32.mrb[74].mxu1  ;;  %v7191_v63 = vpop.eup %7190 }
0x1184   :  { %v5388_v59 = vadd.f32 %v6632_v16, %v8572_v41  ;;  %v5382_v61 = vpop.f32.mrb[75].mxu1  ;;  %v5240_v21 = vadd.f32 1.0, %v7191_v63 }
0x1185   :  { %7192 = vrcp.f32 %v5233_v58  ;;  %v5383_v62 = vadd.f32 %v8572_v41, %v5382_v61 }
0x1186   :  { %5406 = vst.msk [vmem:[%s7766_s29 + $0x28] sm:$0xff] %vm466_vm2, %v5388_v59  ;;  %7194 = vrcp.f32 %v5240_v21 }
0x1187   :  { %5405 = vst.msk [vmem:[%s7766_s29 + $0x20] sm:$0xff] %vm466_vm2, %v5383_v62 }
0x118f   :  { %v7193_v3 = vpop.eup %7192 }
0x1190   :  { %v5243_v4 = vmul.f32 %v7193_v3, %v5226_v1  ;;  %v7195_v32 = vpop.eup %7194 }
0x1191   :  { %v5246_v12 = vsub.f32 1.0, %v7195_v32  ;;  %v5248_v17 = vmul.f32 %v7195_v32, %v8549_v31 }
0x1192   :  { %v5244_v11 = vadd.f32 %v5243_v4, %v5015_v46 }
0x1194   :  { %7196 = vtanh.f32 %v5244_v11 }
0x119e   :  { %v7197_v14 = vpop.eup %7196 }
0x119f   :  { %v5247_v18 = vmul.f32 %v7197_v14, %v5246_v12 }
0x11a1   :  { %v5249_v0 = vadd.f32 %v5248_v17, %v5247_v18 }
0x11a3   :  { %5250 = vst.msk [vmem:[#allocation5 + $0x38] sm:$0xff] %vm466_vm2, %v5249_v0  ;;  %5252 = vst.msk [vmem:[#allocation30 + $0x8] sm:$0xff] %vm466_vm2, %v5249_v0 }
0x11aa   :  { %v5260_v19 = vld [vmem:[#allocation5 + $0x38] sm:$0xff] }
0x11ab   :  { %6634 = vmatmul.mubr.msk.f32.gmra.mrb[76].mxu1 %vm466_vm2, %v5260_v19 }
0x11ac   :  { %7539 = shalt.err (!%p7536_p12)
}
0x11ad   :  { %s7540_s21 = scalar_lea.hbm %s7771_s5, 256 }
0x11ae   :  { %p7541_p13 = scmp.ne.s32.totalorder %s7771_s5, %s7540_s21  ;;  %p7544_p0 = scmp.lt.u32.totalorder %s7540_s21, %s7771_s5 }
0x11b0   :  { %p7546_p1 = pnand %p7544_p0, %p7541_p13 }
0x11b2   :  { %7549 = shalt.err (!%p7546_p1)
}
0x11b3   :  { %5422 = dma.vmem_to_hbm [thread:$0]  %s5417_s8, 256, %s7771_s5, [#allocation8], %s7598_s15, %s7598_s15, %s7599_s16  }
0x127e   :  { %v6635_v23 = vpop.f32.mrb[76].mxu1 }
0x127f   :  { %v5398_v20 = vadd.f32 %v6635_v23, %v8572_v41  ;;  %v5392_v34 = vpop.f32.mrb[77].mxu1 }
0x1280   :  { %v5393_v22 = vadd.f32 %v8572_v41, %v5392_v34 }
0x1281   :  { %5408 = vst.msk [vmem:[%s7766_s29 + $0x38] sm:$0xff] %vm466_vm2, %v5398_v20 }
0x1282   :  { %5407 = vst.msk [vmem:[%s7766_s29 + $0x30] sm:$0xff] %vm466_vm2, %v5393_v22 }
0x1283   :  { %7566 = dma.done.wait [#allocation8], 256  }
0x1284   :  { %7567 = vsyncadd [#allocation8], 4294967040 }
0x1285   :  { %5428 = vsyncpa [#allocation7], 1 }
0x1286   :  { %5429 = vsyncpa [#allocation10], 1 }
0x1287   :  { %5430 = vsyncpa [#allocation13], 1 }
0x1288   :  { %5431 = vsyncpa [#allocation16], 1 }
0x1289   :  { %5432 = vsyncpa [#allocation19], 1 }
0x128a   :  { %5433 = vsyncpa [#allocation22], 1 }
0x128b   :  { %5434 = vsyncpa [#allocation25], 1 }
0x128c   :  { %5435 = vsyncpa [#allocation28], 1 }
0x128d   :  { %5436 = vsyncpa [#allocation8], 1 }

</bundles_post_ra>
